<compile_context>
chip_gen: v7x
topology: tpu7x:2x2x1
jax: 0.10.0
libtpu: 0.0.40
codegen_flags: <defaults>
</compile_context>

<pallas_src>
import math

import jax
import jax.numpy as jnp
from jax import lax
from jax.experimental import pallas as pl
from jax.experimental.pallas import tpu as pltpu


# ----------------------------------------------------------------------------
# Kernel 1: per-position 1x1-conv chain (conv1+ReLU -> gated -> conv3)
# ----------------------------------------------------------------------------
def feature_kernel(x_ref, w1_ref, b1_ref, w2a_ref, b2a_ref, w2b_ref, b2b_ref,
                   w3_ref, b3_ref, hid_ref, params_ref):
    x = x_ref[...]                                                      # (TN, 1024) bf16

    hid = jnp.dot(x, w1_ref[...], preferred_element_type=jnp.float32) + b1_ref[...]
    hid = jnp.maximum(hid, 0.0)                                         # ReLU, f32 (TN, 512)
    hid_ref[...] = hid.astype(hid_ref.dtype)

    hid_b = hid.astype(jnp.bfloat16)
    fa = jax.nn.sigmoid(
        jnp.dot(hid_b, w2a_ref[...], preferred_element_type=jnp.float32) + b2a_ref[...])
    fb = jnp.tanh(
        jnp.dot(hid_b, w2b_ref[...], preferred_element_type=jnp.float32) + b2b_ref[...])
    feat = (fa * fb).astype(jnp.bfloat16)                               # (TN, 256)

    out = jnp.dot(feat, w3_ref[...], preferred_element_type=jnp.float32) + b3_ref[...]
    params_ref[...] = out.astype(params_ref.dtype)                      # (TN, 2) = [mu, logvar]


def _run_feature_kernel(x_bf, w1, b1, w2a, b2a, w2b, b2b, w3, b3, tile_n):
    n_pad, d0 = x_bf.shape
    d1 = w1.shape[1]
    d2 = w2a.shape[1]
    c3 = w3.shape[1]
    grid = (n_pad // tile_n,)

    rows = lambda i: (i, 0)
    const = lambda i: (0, 0)

    hid, mu_logvar = pl.pallas_call(
        feature_kernel,
        out_shape=(
            jax.ShapeDtypeStruct((n_pad, d1), jnp.bfloat16),
            jax.ShapeDtypeStruct((n_pad, c3), jnp.float32),
        ),
        grid=grid,
        in_specs=[
            pl.BlockSpec((tile_n, d0), rows),     # x tile (streamed)
            pl.BlockSpec((d0, d1), const),        # w1 (VMEM-resident)
            pl.BlockSpec((1, d1), const),         # b1
            pl.BlockSpec((d1, d2), const),        # w2a
            pl.BlockSpec((1, d2), const),         # b2a
            pl.BlockSpec((d1, d2), const),        # w2b
            pl.BlockSpec((1, d2), const),         # b2b
            pl.BlockSpec((d2, c3), const),        # w3
            pl.BlockSpec((1, c3), const),         # b3
        ],
        out_specs=(
            pl.BlockSpec((tile_n, d1), rows),     # hid
            pl.BlockSpec((tile_n, c3), rows),     # [mu, logvar]
        ),
        compiler_params=pltpu.CompilerParams(
            dimension_semantics=("parallel",)),
    )(x_bf, w1, b1, w2a, b2a, w2b, b2b, w3, b3)
    return hid, mu_logvar


# ----------------------------------------------------------------------------
# Kernel 2: attention pooling (reduction over N) + classifier + softmax
# ----------------------------------------------------------------------------
def pool_classify_kernel(a_ref, hid_ref, wc_ref, bc_ref,
                         logits_ref, probs_ref, acc_ref, asum_ref):
    k = pl.program_id(0)

    @pl.when(k == 0)
    def _init():
        acc_ref[...] = jnp.zeros_like(acc_ref)
        asum_ref[...] = jnp.zeros_like(asum_ref)

    a = a_ref[...]                                                      # (1, TN) f32
    acc_ref[...] += jnp.dot(a.astype(jnp.bfloat16), hid_ref[...],
                            preferred_element_type=jnp.float32)         # (1, 512)
    asum_ref[...] += jnp.sum(a, axis=1, keepdims=True)                  # (1, 1)

    @pl.when(k == pl.num_programs(0) - 1)
    def _finalize():
        m_pool = acc_ref[...] * pl.reciprocal(asum_ref[...], approx=True)   # (1, 512)
        logits = jnp.dot(m_pool, wc_ref[...],
                         preferred_element_type=jnp.float32) + bc_ref[...]  # (1, 2)
        logits_ref[...] = logits
        mx = jnp.max(logits, axis=1, keepdims=True)
        e = jnp.exp(logits - mx)
        probs_ref[...] = e * pl.reciprocal(jnp.sum(e, axis=1, keepdims=True),
                                           approx=True)


def _run_pool_classify(a_flat, hid, wc, bc, tile_n):
    n_pad, d1 = hid.shape
    c = wc.shape[1]
    grid = (n_pad // tile_n,)

    logits, probs = pl.pallas_call(
        pool_classify_kernel,
        out_shape=(
            jax.ShapeDtypeStruct((1, c), jnp.float32),
            jax.ShapeDtypeStruct((1, c), jnp.float32),
        ),
        grid=grid,
        in_specs=[
            pl.BlockSpec((1, tile_n), lambda k: (0, k)),   # attention tile
            pl.BlockSpec((tile_n, d1), lambda k: (k, 0)),  # hid tile
            pl.BlockSpec((d1, c), lambda k: (0, 0)),       # classifier weight (resident)
            pl.BlockSpec((1, c), lambda k: (0, 0)),        # classifier bias
        ],
        out_specs=(
            pl.BlockSpec((1, c), lambda k: (0, 0)),
            pl.BlockSpec((1, c), lambda k: (0, 0)),
        ),
        scratch_shapes=[
            pltpu.VMEM((1, d1), jnp.float32),   # pooled accumulator
            pltpu.VMEM((1, 1), jnp.float32),    # sum(A) accumulator
        ],
        compiler_params=pltpu.CompilerParams(
            dimension_semantics=("arbitrary",)),
    )(a_flat, hid, wc, bc)
    return logits, probs


# ----------------------------------------------------------------------------
# Plain-JAX glue: CRF smoothing, reparameterization, KL, top-k
# ----------------------------------------------------------------------------
def _compute_conv_param(log_sigma2, kernel_size=3):
    mg = jnp.meshgrid(jnp.arange(kernel_size, dtype=jnp.float32),
                      jnp.arange(kernel_size, dtype=jnp.float32), indexing="ij")
    mean = (kernel_size - 1) / 2.0
    kernel = jnp.ones((kernel_size, kernel_size), dtype=jnp.float32)
    for ls2, m in zip((log_sigma2[0], log_sigma2[1]), mg):
        std = jnp.exp(ls2 / 2.0)
        kernel = kernel * (1.0 / (std * math.sqrt(2.0 * math.pi))) \
                 * jnp.exp(-(((m - mean) / std) ** 2) / 2.0)
    return kernel / jnp.sum(kernel)


def _crf_learning(mu, crf_kernel, message_param):
    unary = mu
    q = jnp.exp(mu) / jnp.sum(jnp.exp(mu))
    qp = jnp.pad(q, 1)
    msg = lax.conv(qp[None, None, :, :], crf_kernel[None, None, :, :],
                   window_strides=(1, 1), padding="VALID")[0, 0]
    a = unary + msg * message_param
    return jnp.exp(a) / jnp.sum(jnp.exp(a))


def _kl_logistic_normal(mu_pr, mu_pos, logvar_pr, logvar_pos):
    return ((logvar_pr - logvar_pos) / 2.0
            + (logvar_pos ** 2 + (mu_pr - mu_pos) ** 2) / (2.0 * logvar_pr ** 2)
            - 0.5)


def bmil_crf_forward(h, params, *, rng_key, slide_label=None, validation=False,
                     top_k=1, tile_n=512):
    """h: (H, W, 1024) feature map for one bag."""
    hs, ws, d0 = h.shape
    n = hs * ws
    if tile_n % 16 != 0:
        raise ValueError("tile_n must be a multiple of 16 (bf16 sublane packing)")
    n_pad = pl.cdiv(n, tile_n) * tile_n

    x2d = h.reshape(n, d0).astype(jnp.float32)
    if n_pad != n:
        x2d = jnp.pad(x2d, ((0, n_pad - n), (0, 0)))
    x_bf = x2d.astype(jnp.bfloat16)

    # --- Kernel 1: fused 1x1-conv chain over all positions ---
    hid, mu_logvar = _run_feature_kernel(
        x_bf,
        params["w1"].astype(jnp.bfloat16), params["b1"],
        params["w2a"].astype(jnp.bfloat16), params["b2a"],
        params["w2b"].astype(jnp.bfloat16), params["b2b"],
        params["w3"].astype(jnp.bfloat16), params["b3"],
        tile_n,
    )

    mu = mu_logvar[:n, 0].reshape(hs, ws)
    logvar = mu_logvar[:n, 1].reshape(hs, ws)

    # --- CRF message passing (tiny O(H*W), global normalizations) ---
    crf_kernel = _compute_conv_param(params["log_sigma2"], kernel_size=3)
    smooth_mu = _crf_learning(mu, crf_kernel, params["message_param"])

    # --- Gaussian reparameterization -> attention map ---
    eps = jax.random.normal(rng_key, smooth_mu.shape, dtype=jnp.float32)
    gaus = smooth_mu + eps * jnp.exp(0.5 * logvar)
    attn = jax.nn.sigmoid(gaus)                          # (H, W)

    a_flat = attn.reshape(1, n)
    if n_pad != n:
        a_flat = jnp.pad(a_flat, ((0, 0), (0, n_pad - n)))  # zero A on padded rows

    # --- Kernel 2: attention pooling + classifier + softmax ---
    logits, y_probs = _run_pool_classify(a_flat, hid, params["wc"], params["bc"], tile_n)

    # --- top-k glue (single bag row; lax.top_k instead of argsort) ---
    top_idx = lax.top_k(y_probs[:, 1], top_k)[1]
    top_instance = jnp.take(logits, top_idx, axis=0)
    Y_hat = jnp.argmax(top_instance, axis=1, keepdims=True)
    Y_prob = jax.nn.softmax(top_instance, axis=1)

    if not validation:
        mu_pr = jnp.broadcast_to(params["prior_mu"][slide_label], smooth_mu.shape)
        logvar_pr = params["prior_logvar"][slide_label]
        kl_div = _kl_logistic_normal(mu_pr, smooth_mu, logvar_pr, logvar)
        return top_instance, Y_prob, Y_hat, kl_div, y_probs, attn.reshape(1, -1)
    return top_instance, Y_prob, Y_hat, y_probs, attn.reshape(1, -1)


if __name__ == "__main__":
    # size_dict['small'] = [1024, 512, 256], n_classes = 2; small spatial map 16x16.
    HS, WS = 16, 16
    D0, D1, D2, C = 1024, 512, 256, 2

    key = jax.random.PRNGKey(0)
    keys = jax.random.split(key, 10)

    h = jax.random.normal(keys[0], (HS, WS, D0), dtype=jnp.float32)

    def xavier(k, shape):
        fan_in, fan_out = shape
        return jax.random.normal(k, shape, dtype=jnp.float32) * (2.0 / (fan_in + fan_out)) ** 0.5

    params = {
        "w1": xavier(keys[1], (D0, D1)), "b1": jnp.zeros((1, D1), jnp.float32),
        "w2a": xavier(keys[2], (D1, D2)), "b2a": jnp.zeros((1, D2), jnp.float32),
        "w2b": xavier(keys[3], (D1, D2)), "b2b": jnp.zeros((1, D2), jnp.float32),
        "w3": xavier(keys[4], (D2, C)), "b3": jnp.zeros((1, C), jnp.float32),
        "wc": xavier(keys[5], (D1, C)), "bc": jnp.zeros((1, C), jnp.float32),
        "log_sigma2": jax.random.normal(keys[6], (2,), dtype=jnp.float32),
        "message_param": jax.random.normal(keys[7], (), dtype=jnp.float32),
        "prior_mu": jnp.array([-5.0, 0.0], jnp.float32),
        "prior_logvar": jnp.array([-1.0, 3.0], jnp.float32),
    }

    outs = bmil_crf_forward(h, params, rng_key=keys[8], slide_label=1,
                            validation=False, top_k=1, tile_n=128)
    jax.block_until_ready(outs)
    print("KERNEL_OK")
</pallas_src>

<mosaic_0001>
module attributes {stable_mosaic.version = 11 : i64} {
  func.func @feature_kernel(%arg0: i32, %arg1: memref<128x1024xbf16, #tpu.memory_space<vmem>>, %arg2: memref<1024x512xbf16, #tpu.memory_space<vmem>>, %arg3: memref<1x512xf32, #tpu.memory_space<vmem>>, %arg4: memref<512x256xbf16, #tpu.memory_space<vmem>>, %arg5: memref<1x256xf32, #tpu.memory_space<vmem>>, %arg6: memref<512x256xbf16, #tpu.memory_space<vmem>>, %arg7: memref<1x256xf32, #tpu.memory_space<vmem>>, %arg8: memref<256x2xbf16, #tpu.memory_space<vmem>>, %arg9: memref<1x2xf32, #tpu.memory_space<vmem>>, %arg10: memref<128x512xbf16, #tpu.memory_space<vmem>>, %arg11: memref<128x2xf32, #tpu.memory_space<vmem>>) attributes {dimension_semantics = [#tpu.dimension_semantics<parallel>], iteration_bounds = array<i64: 2>, scalar_prefetch = 0 : i64, scratch_operands = 0 : i64, tpu.core_type = #tpu.core_type<tc>, window_params = [{transform_indices = @transform_0, window_bounds = array<i64: 128, 1024>}, {pipeline_mode = #tpu.pipeline_mode<synchronous>, transform_indices = @transform_1, window_bounds = array<i64: 1024, 512>}, {pipeline_mode = #tpu.pipeline_mode<synchronous>, transform_indices = @transform_2, window_bounds = array<i64: 1, 512>}, {pipeline_mode = #tpu.pipeline_mode<synchronous>, transform_indices = @transform_3, window_bounds = array<i64: 512, 256>}, {pipeline_mode = #tpu.pipeline_mode<synchronous>, transform_indices = @transform_4, window_bounds = array<i64: 1, 256>}, {pipeline_mode = #tpu.pipeline_mode<synchronous>, transform_indices = @transform_5, window_bounds = array<i64: 512, 256>}, {pipeline_mode = #tpu.pipeline_mode<synchronous>, transform_indices = @transform_6, window_bounds = array<i64: 1, 256>}, {pipeline_mode = #tpu.pipeline_mode<synchronous>, transform_indices = @transform_7, window_bounds = array<i64: 256, 2>}, {pipeline_mode = #tpu.pipeline_mode<synchronous>, transform_indices = @transform_8, window_bounds = array<i64: 1, 2>}, {transform_indices = @transform_9, window_bounds = array<i64: 128, 512>}, {transform_indices = @transform_10, window_bounds = array<i64: 128, 2>}]} {
    %c0 = arith.constant 0 : index
    %c0_0 = arith.constant 0 : index
    %0 = vector.load %arg1[%c0, %c0_0] : memref<128x1024xbf16, #tpu.memory_space<vmem>>, vector<128x1024xbf16>
    %c0_1 = arith.constant 0 : index
    %c0_2 = arith.constant 0 : index
    %1 = vector.load %arg2[%c0_1, %c0_2] : memref<1024x512xbf16, #tpu.memory_space<vmem>>, vector<1024x512xbf16>
    %cst = arith.constant dense<0.000000e+00> : vector<128x512xf32>
    %2 = tpu.matmul %0, %1, %cst {dimension_numbers = #tpu.dot_dimension_numbers<[1], [0], [0], [1], [0, 0, 1, 1], [], []>} : vector<128x1024xbf16>, vector<1024x512xbf16>, vector<128x512xf32> -> vector<128x512xf32>
    %c0_3 = arith.constant 0 : index
    %c0_4 = arith.constant 0 : index
    %3 = vector.load %arg3[%c0_3, %c0_4] : memref<1x512xf32, #tpu.memory_space<vmem>>, vector<1x512xf32>
    %4 = vector.broadcast %3 : vector<1x512xf32> to vector<128x512xf32>
    %5 = arith.addf %2, %4 : vector<128x512xf32>
    %cst_5 = arith.constant 0.000000e+00 : f32
    %6 = vector.broadcast %cst_5 : f32 to vector<128x512xf32>
    %7 = arith.maximumf %5, %6 : vector<128x512xf32>
    %8 = arith.truncf %7 : vector<128x512xf32> to vector<128x512xbf16>
    %c0_6 = arith.constant 0 : index
    %c0_7 = arith.constant 0 : index
    %9 = vector.load %arg10[%c0_6, %c0_7] : memref<128x512xbf16, #tpu.memory_space<vmem>>, vector<128x512xbf16>
    tpu.vector_store %arg10[%c0_6, %c0_7], %8 {strides = array<i32>} : memref<128x512xbf16, #tpu.memory_space<vmem>>, vector<128x512xbf16>,
    %10 = arith.truncf %7 : vector<128x512xf32> to vector<128x512xbf16>
    %c0_8 = arith.constant 0 : index
    %c0_9 = arith.constant 0 : index
    %11 = vector.load %arg4[%c0_8, %c0_9] : memref<512x256xbf16, #tpu.memory_space<vmem>>, vector<512x256xbf16>
    %cst_10 = arith.constant dense<0.000000e+00> : vector<128x256xf32>
    %12 = tpu.matmul %10, %11, %cst_10 {dimension_numbers = #tpu.dot_dimension_numbers<[1], [0], [0], [1], [0, 0, 1, 1], [], []>} : vector<128x512xbf16>, vector<512x256xbf16>, vector<128x256xf32> -> vector<128x256xf32>
    %c0_11 = arith.constant 0 : index
    %c0_12 = arith.constant 0 : index
    %13 = vector.load %arg5[%c0_11, %c0_12] : memref<1x256xf32, #tpu.memory_space<vmem>>, vector<1x256xf32>
    %14 = vector.broadcast %13 : vector<1x256xf32> to vector<128x256xf32>
    %15 = arith.addf %12, %14 : vector<128x256xf32>
    %16 = arith.negf %15 : vector<128x256xf32>
    %17 = math.exp %16 : vector<128x256xf32>
    %cst_13 = arith.constant 1.000000e+00 : f32
    %18 = vector.broadcast %cst_13 : f32 to vector<128x256xf32>
    %19 = arith.addf %18, %17 : vector<128x256xf32>
    %20 = arith.divf %18, %19 : vector<128x256xf32>
    %c0_14 = arith.constant 0 : index
    %c0_15 = arith.constant 0 : index
    %21 = vector.load %arg6[%c0_14, %c0_15] : memref<512x256xbf16, #tpu.memory_space<vmem>>, vector<512x256xbf16>
    %cst_16 = arith.constant dense<0.000000e+00> : vector<128x256xf32>
    %22 = tpu.matmul %10, %21, %cst_16 {dimension_numbers = #tpu.dot_dimension_numbers<[1], [0], [0], [1], [0, 0, 1, 1], [], []>} : vector<128x512xbf16>, vector<512x256xbf16>, vector<128x256xf32> -> vector<128x256xf32>
    %c0_17 = arith.constant 0 : index
    %c0_18 = arith.constant 0 : index
    %23 = vector.load %arg7[%c0_17, %c0_18] : memref<1x256xf32, #tpu.memory_space<vmem>>, vector<1x256xf32>
    %24 = vector.broadcast %23 : vector<1x256xf32> to vector<128x256xf32>
    %25 = arith.addf %22, %24 : vector<128x256xf32>
    %26 = math.tanh %25 : vector<128x256xf32>
    %27 = arith.mulf %20, %26 : vector<128x256xf32>
    %28 = arith.truncf %27 : vector<128x256xf32> to vector<128x256xbf16>
    %c0_19 = arith.constant 0 : index
    %c0_20 = arith.constant 0 : index
    %29 = vector.load %arg8[%c0_19, %c0_20] : memref<256x2xbf16, #tpu.memory_space<vmem>>, vector<256x2xbf16>
    %cst_21 = arith.constant dense<0.000000e+00> : vector<128x2xf32>
    %30 = tpu.matmul %28, %29, %cst_21 {dimension_numbers = #tpu.dot_dimension_numbers<[1], [0], [0], [1], [0, 0, 1, 1], [], []>} : vector<128x256xbf16>, vector<256x2xbf16>, vector<128x2xf32> -> vector<128x2xf32>
    %c0_22 = arith.constant 0 : index
    %c0_23 = arith.constant 0 : index
    %31 = vector.load %arg9[%c0_22, %c0_23] : memref<1x2xf32, #tpu.memory_space<vmem>>, vector<1x2xf32>
    %32 = vector.broadcast %31 : vector<1x2xf32> to vector<128x2xf32>
    %33 = arith.addf %30, %32 : vector<128x2xf32>
    %c0_24 = arith.constant 0 : index
    %c0_25 = arith.constant 0 : index
    %34 = vector.load %arg11[%c0_24, %c0_25] : memref<128x2xf32, #tpu.memory_space<vmem>>, vector<128x2xf32>
    tpu.vector_store %arg11[%c0_24, %c0_25], %33 {strides = array<i32>} : memref<128x2xf32, #tpu.memory_space<vmem>>, vector<128x2xf32>,
    return
  }
  func.func @transform_0(%arg0: i32) -> (i32, i32) {
    %c0_i32 = arith.constant 0 : i32
    %c0_i32_0 = arith.constant 0 : i32
    return %arg0, %c0_i32 : i32, i32
  }
  func.func @transform_1(%arg0: i32) -> (i32, i32) {
    %c0_i32 = arith.constant 0 : i32
    %c0_i32_0 = arith.constant 0 : i32
    %c0_i32_1 = arith.constant 0 : i32
    return %c0_i32, %c0_i32_0 : i32, i32
  }
  func.func @transform_2(%arg0: i32) -> (i32, i32) {
    %c0_i32 = arith.constant 0 : i32
    %c0_i32_0 = arith.constant 0 : i32
    %c0_i32_1 = arith.constant 0 : i32
    return %c0_i32, %c0_i32_0 : i32, i32
  }
  func.func @transform_3(%arg0: i32) -> (i32, i32) {
    %c0_i32 = arith.constant 0 : i32
    %c0_i32_0 = arith.constant 0 : i32
    %c0_i32_1 = arith.constant 0 : i32
    return %c0_i32, %c0_i32_0 : i32, i32
  }
  func.func @transform_4(%arg0: i32) -> (i32, i32) {
    %c0_i32 = arith.constant 0 : i32
    %c0_i32_0 = arith.constant 0 : i32
    %c0_i32_1 = arith.constant 0 : i32
    return %c0_i32, %c0_i32_0 : i32, i32
  }
  func.func @transform_5(%arg0: i32) -> (i32, i32) {
    %c0_i32 = arith.constant 0 : i32
    %c0_i32_0 = arith.constant 0 : i32
    %c0_i32_1 = arith.constant 0 : i32
    return %c0_i32, %c0_i32_0 : i32, i32
  }
  func.func @transform_6(%arg0: i32) -> (i32, i32) {
    %c0_i32 = arith.constant 0 : i32
    %c0_i32_0 = arith.constant 0 : i32
    %c0_i32_1 = arith.constant 0 : i32
    return %c0_i32, %c0_i32_0 : i32, i32
  }
  func.func @transform_7(%arg0: i32) -> (i32, i32) {
    %c0_i32 = arith.constant 0 : i32
    %c0_i32_0 = arith.constant 0 : i32
    %c0_i32_1 = arith.constant 0 : i32
    return %c0_i32, %c0_i32_0 : i32, i32
  }
  func.func @transform_8(%arg0: i32) -> (i32, i32) {
    %c0_i32 = arith.constant 0 : i32
    %c0_i32_0 = arith.constant 0 : i32
    %c0_i32_1 = arith.constant 0 : i32
    return %c0_i32, %c0_i32_0 : i32, i32
  }
  func.func @transform_9(%arg0: i32) -> (i32, i32) {
    %c0_i32 = arith.constant 0 : i32
    %c0_i32_0 = arith.constant 0 : i32
    return %arg0, %c0_i32 : i32, i32
  }
  func.func @transform_10(%arg0: i32) -> (i32, i32) {
    %c0_i32 = arith.constant 0 : i32
    %c0_i32_0 = arith.constant 0 : i32
    return %arg0, %c0_i32 : i32, i32
  }
}

</mosaic_0001>

<bundles_post_ra>
// kernel: tpu_custom_call.1
= control target key start
LH: loop header
LB: loop body
LE: loop exit
PB: predicated region body
PF: predicated region fallthrough
CT: control target
= control target key end

     0   :  { %s8471_s0 = inlined_call_operand.hbm [shape: bf16[256,1024], index: 0, kind: input, shape index: {}]   ;;  %s8472_s1 = inlined_call_operand.hbm [shape: bf16[1024,512], index: 1, kind: input, shape index: {}]   ;;  %s8473_s2 = inlined_call_operand.vmem [shape: f32[1,512], index: 2, kind: input, shape index: {}]   ;;  %s8474_s3 = inlined_call_operand.hbm [shape: bf16[512,256], index: 3, kind: input, shape index: {}]   ;;  %s8475_s4 = inlined_call_operand.vmem [shape: f32[1,256], index: 4, kind: input, shape index: {}]   ;;  %s8476_s5 = inlined_call_operand.hbm [shape: bf16[512,256], index: 5, kind: input, shape index: {}]   ;;  %s8477_s6 = inlined_call_operand.vmem [shape: f32[1,256], index: 6, kind: input, shape index: {}]   ;;  %s8478_s7 = inlined_call_operand.vmem [shape: bf16[256,2], index: 7, kind: input, shape index: {}]   ;;  %s8479_s8 = inlined_call_operand.vmem [shape: f32[1,2], index: 8, kind: input, shape index: {}]   ;;  %s8480_s9 = inlined_call_operand.hbm [shape: bf16[256,512], index: 9, kind: output, shape index: {0}]   ;;  %s8481_s10 = inlined_call_operand.vmem [shape: f32[256,2], index: 10, kind: output, shape index: {1}]  }
   0x1   :  { %8487 = sst [smem:[#allocation17_spill]] %s8472_s1 }
   0x2   :  { %8488 = sst [smem:[#allocation18_spill]] %s8479_s8 }
   0x3   :  { %8489 = sst [smem:[#allocation19_spill]] %s8481_s10 }
   0x4   :  { %16 = vsyncpa [#allocation3], 0 }
   0x5   :  { %18 = vsyncpa [#allocation3 + $0x1], 0 }
   0x6   :  { %19 = vsyncpa [#allocation6], 0 }
   0x7   :  { %20 = vsyncpa [#allocation9], 0 }
   0x8   :  { %21 = vsyncpa [#allocation4], 0 }
   0x9   :  { %23 = vsyncpa [#allocation4 + $0x1], 0  ;;  %s7670_s13 = smov 0   ;;  %s7672_s14 = smov 0  }
   0xa   :  { %s7674_s15 = smov 0   ;;  %s7676_s16 = smov 0  }
   0xb LB: > { %8490 = sst [smem:[#allocation15_spill]] %s7588_s13  ;;  %s7691_s17 = sadd.s32 4294967295, %s7600_s16   ;;  %s7600_s16 = sphi %s7676_s16, %s8516_s16   ;;  %s7596_s15 = sphi %s7674_s15, %s8515_s15   ;;  %s7592_s14 = sphi %s7672_s14, %s8514_s14   ;;  %s7588_s13 = sphi %s7670_s13, %s8513_s13  }
   0xc   : > { %s5490_s18 = sadd.s32 4294967294, %s7600_s16   ;;  %p49_p0 = scmp.ne.s32.totalorder %s7592_s14, %s7588_s13 }
   0xd   : > { %p8482_p1 = scmp.eq.s32.totalorder %s7691_s17, 0  ;;  %p247_p3 = scmp.eq.s32.totalorder %s5490_s18, 1 }
   0xe   : > { %p5491_p5 = scmp.ge.s32.totalorder %s7600_s16, 1  ;;  %p280_p7 = scmp.lt.s32.totalorder %s7600_s16, 3 }
   0xf   : > { %p7700_p4 = por %p8482_p1, %p49_p0  ;;  %p7705_p6 = por %p247_p3, %p49_p0 }
  0x10   : > { %p7710_p8 = pnand %p5491_p5, %p280_p7  ;;  %s7602_s22 = smov [#allocation5]  }
  0x11   : > { %s8491_s19 = scalar_select %p7700_p4, 1, 0 }
  0x12   : > { %s8492_s20 = scalar_select %p7705_p6, 1, 0 }
  0x13   : > { %s8494_s21 = scalar_select %p7710_p8, 1, 0 }
  0x14   : > { %8493 = sst [smem:[#allocation16_spill]] %s8492_s20  ;;  %s292_s23 = sshll.u32 %s7602_s22, 4  ;;  %s7714_s23 = int_to_ptr.vmem [resolvable:$true] %s292_s23 }
  0x15   : > { %p6559_p9 = pneg %p7710_p8  ;;  %s7603_s25 = smov [#allocation7]  }
  0x16   : > { %s308_s26 = sshll.u32 %s7603_s25, 4  ;;  %s8496_s1 = sld [smem:[#allocation17_spill]]  ;;  %s7725_s26 = int_to_ptr.vmem [resolvable:$true] %s308_s26 }
  0x17   : > { %p7721_p11 = pnand %p6559_p9, %p8482_p1 }
  0x19   : > { %p7735_p13 = pneg %p7721_p11 }
  0x1c   : > { %s7412_s29 = scalar_lea.hbm %s8496_s1, 32768 }
  0x1d   : > { %p7413_p12 = scmp.ne.s32.totalorder %s8496_s1, %s7412_s29  ;;  %p7419_p5 = scmp.lt.u32.totalorder %s7412_s29, %s8496_s1 }
  0x1f   : > { %p7415_p0 = pnand %p7735_p13, %p7413_p12 }
  0x21   : > { %p7416_p3 = pneg %p7415_p0 }
  0x23   : > { %p7421_p7 = pnand %p7419_p5, %p7416_p3 }
  0x25   : > { %7424 = shalt.err (!%p7421_p7)
}
  0x26   : > { %s7425_s25 = scalar_lea.vmem %s7714_s23, 32768  ;;  %p7433_p2 = scmp.lt.s32.totalorder %s7714_s23, %s7714_s23 }
  0x27   : > { %p7426_p9 = scmp.ne.s32.totalorder %s7714_s23, %s7425_s25  ;;  %p7434_p6 = scmp.lt.s32.totalorder %s7425_s25, %s7425_s25 }
  0x29   : > { %p7428_p10 = pnand %p7426_p9, %p7735_p13  ;;  %p7435_p12 = por %p7434_p6, %p7433_p2 }
  0x2b   : > { %p7429_p1 = pneg %p7428_p10 }
  0x2d   : > { %p7436_p0 = pnand %p7435_p12, %p7429_p1 }
  0x2f   : > { %7439 = shalt.err (!%p7436_p0)
}
  0x30   : > { %s7604_s27 = smov 256   ;;  %s7605_s28 = smov 16  }
  0x31   : > { %6562 = dma.hbm_to_vmem [thread:$0]  (!%p7721_p11), %s8496_s1, 32768, %s7714_s23, [#allocation6], %s7604_s27, %s7604_s27, %s7605_s28  }
  0x32   : > { %s7440_s22 = scalar_lea.hbm %s8474_s3, 8192 }
  0x33   : > { %p7441_p2 = scmp.ne.s32.totalorder %s8474_s3, %s7440_s22  ;;  %p7447_p10 = scmp.lt.u32.totalorder %s7440_s22, %s8474_s3 }
  0x35   : > { %p7443_p1 = pnand %p7441_p2, %p7735_p13 }
  0x37   : > { %p7444_p6 = pneg %p7443_p1 }
  0x39   : > { %p7449_p3 = pnand %p7447_p10, %p7444_p6 }
  0x3b   : > { %7452 = shalt.err (!%p7449_p3)
}
  0x3c   : > { %s7453_s23 = scalar_lea.vmem %s7725_s26, 8192  ;;  %p7461_p12 = scmp.lt.s32.totalorder %s7725_s26, %s7725_s26 }
  0x3d   : > { %p7454_p5 = scmp.ne.s32.totalorder %s7725_s26, %s7453_s23  ;;  %p7462_p0 = scmp.lt.s32.totalorder %s7453_s23, %s7453_s23 }
  0x3f   : > { %p7456_p7 = pnand %p7454_p5, %p7735_p13  ;;  %p7463_p2 = por %p7462_p0, %p7461_p12 }
  0x41   : > { %p7457_p9 = pneg %p7456_p7 }
  0x43   : > { %p7464_p1 = pnand %p7463_p2, %p7457_p9 }
  0x45   : > { %7467 = shalt.err (!%p7464_p1)
}
  0x46   : > { %s7606_s13 = smov 128   ;;  %s7607_s10 = smov 8  }
  0x47   : > { %6565 = dma.hbm_to_vmem [thread:$0]  (!%p7721_p11), %s8474_s3, 8192, %s7725_s26, [#allocation6], %s7606_s13, %s7606_s13, %s7607_s10  }
  0x48   : > { %s7608_s28 = smov [#allocation8]   ;;  %s7780_s30 = sadd.s32 1, %s7600_s16  }
  0x49   : > { %s324_s29 = sshll.u32 %s7608_s28, 4  ;;  %s7468_s22 = scalar_lea.hbm %s8476_s5, 8192  ;;  %s325_s29 = int_to_ptr.vmem [resolvable:$true] %s324_s29 }
  0x4a   : > { %p7469_p6 = scmp.ne.s32.totalorder %s8476_s5, %s7468_s22  ;;  %p7475_p5 = scmp.lt.u32.totalorder %s7468_s22, %s8476_s5 }
  0x4c   : > { %p7471_p10 = pnand %p7469_p6, %p7735_p13 }
  0x4e   : > { %p7472_p3 = pneg %p7471_p10 }
  0x50   : > { %p7477_p7 = pnand %p7475_p5, %p7472_p3 }
  0x52   : > { %7480 = shalt.err (!%p7477_p7)
}
  0x53   : > { %s7481_s26 = scalar_lea.vmem %s325_s29, 8192  ;;  %p7489_p2 = scmp.lt.s32.totalorder %s325_s29, %s325_s29 }
  0x54   : > { %p7482_p9 = scmp.ne.s32.totalorder %s325_s29, %s7481_s26  ;;  %p7490_p1 = scmp.lt.s32.totalorder %s7481_s26, %s7481_s26 }
  0x56   : > { %p7484_p12 = pnand %p7482_p9, %p7735_p13  ;;  %p7491_p4 = por %p7490_p1, %p7489_p2 }
  0x58   : > { %p7485_p0 = pneg %p7484_p12 }
  0x5a   : > { %p7492_p8 = pnand %p7491_p4, %p7485_p0 }
  0x5c   : > { %7495 = shalt.err (!%p7492_p8)
}
  0x5d   : > { %6568 = dma.hbm_to_vmem [thread:$0]  (!%p7721_p11), %s8476_s5, 8192, %s325_s29, [#allocation9], %s7606_s13, %s7606_s13, %s7607_s10  }
  0x5e   : > { %s33_s1 = ssub.s32 %s7600_s16, %s7780_s30  ;;  %s36_s8 = sadd.s32 1, %s7596_s15 }
  0x5f   : > { %p34_p4 = scmp.eq.s32.totalorder %s33_s1, 0  ;;  %p43_p8 = scmp.ne.s32.totalorder %s7596_s15, %s7592_s14 }
  0x60   : > { %p44_p13 = scmp.eq.s32.totalorder %s7600_s16, 0  ;;  %p6580_p6 = scmp.lt.s32.totalorder %s7600_s16, 2 }
  0x61   : > { %s7808_s24 = scalar_select %p34_p4, %s7596_s15, %s36_s8  }
  0x62   : > { %p45_p10 = por %p44_p13, %p43_p8  ;;  %p8498_p3 = scmp.eq.s32.totalorder %s7691_s17, 1 }
  0x63   : > { %s347_s28 = sand.u32 1, %s7596_s15   ;;  %s6044_s11 = sshll.u32 %s7600_s16, 13 }
  0x64   : > { %p7812_p5 = por %p8498_p3, %p43_p8  ;;  %s5496_s18 = sshll.u32 %s347_s28, 9 }
  0x65   : > { %s7821_s13 = scalar_lea.hbm %s8471_s0, %s6044_s11  ;;  %s351_s10 = scalar_lea.vmem [#allocation2], %s5496_s18 }
  0x66   : > { %s359_s29 = sshll.u32 %s351_s10, 4  ;;  %p7823_p11 = pnand %p6580_p6, %p45_p10  ;;  %s7827_s29 = int_to_ptr.vmem [resolvable:$true] %s359_s29 }
  0x67   : > { %s7829_s26 = scalar_lea.sflag [#allocation3], %s347_s28  ;;  %s7496_s20 = scalar_lea.hbm %s7821_s13, 8192 }
  0x68   : > { %p7497_p7 = scmp.ne.s32.totalorder %s7821_s13, %s7496_s20  ;;  %p7498_p9 = pneg %p7823_p11 }
  0x69   : > { %s7501_s8 = scalar_lea.hbm %s8471_s0, 16384  ;;  %p7502_p2 = scmp.lt.u32.totalorder %s7821_s13, %s8471_s0 }
  0x6a   : > { %p7499_p12 = pnand %p7498_p9, %p7497_p7  ;;  %p7503_p1 = scmp.lt.u32.totalorder %s7501_s8, %s7496_s20 }
  0x6b   : > { %p7505_p8 = scmp.lt.u32.totalorder %s7496_s20, %s7821_s13 }
  0x6c   : > { %p7500_p0 = pneg %p7499_p12  ;;  %p7504_p4 = por %p7503_p1, %p7502_p2 }
  0x6e   : > { %p7506_p13 = por %p7505_p8, %p7504_p4 }
  0x70   : > { %p7507_p6 = pnand %p7506_p13, %p7500_p0 }
  0x72   : > { %7510 = shalt.err (!%p7507_p6)
}
  0x73   : > { %s7511_s28 = scalar_lea.vmem %s7827_s29, 8192  ;;  %s7609_s22 = smov [#allocation2]  }
  0x74   : > { %p7512_p10 = scmp.ne.s32.totalorder %s7827_s29, %s7511_s28  ;;  %s7516_s25 = sshll.u32 %s7609_s22, 4  ;;  %s7517_s25 = int_to_ptr.vmem [resolvable:$false] %s7516_s25 }
  0x75   : > { %s7518_s10 = scalar_lea.vmem %s7517_s25, 16384  ;;  %p7519_p12 = scmp.lt.s32.totalorder %s7827_s29, %s7517_s25 }
  0x76   : > { %p7514_p3 = pnand %p7512_p10, %p7498_p9  ;;  %p7520_p2 = scmp.lt.s32.totalorder %s7518_s10, %s7511_s28 }
  0x78   : > { %p7515_p7 = pneg %p7514_p3  ;;  %p7521_p1 = por %p7520_p2, %p7519_p12 }
  0x7a   : > { %p7522_p4 = pnand %p7521_p1, %p7515_p7 }
  0x7c   : > { %7525 = shalt.err (!%p7522_p4)
}
  0x7d   : > { %s7610_s20 = smov 512   ;;  %s7611_s27 = smov 32  }
  0x7e   : > { %6572 = dma.hbm_to_vmem [thread:$0]  (!%p7823_p11), %s7821_s13, 8192, %s7827_s29, %s7829_s26, %s7610_s20, %s7610_s20, %s7611_s27  }
  0x7f   : > { %p8501_p9 = scmp.ne.s32.totalorder %s8494_s21, 0 }
  0x80   : > { %s7860_s1 = sand.u32 (!%p8501_p9), 1, %s7592_s14   ;;  %p8502_p0 = scmp.ne.s32.totalorder (!%p8501_p9), %s8491_s19, 0 }
  0x81   : > { %371 = sbr.rel (%p8501_p9) target bundleno = 1242 (0x4da), region = 56  ;;  %s5501_s8 = sshll.u32 (!%p8501_p9), %s7860_s1, 9 }
  0x82   : > { %s374_s11 = scalar_lea.sflag (!%p8501_p9), [#allocation3], %s7860_s1  ;;  %s7864_s18 = scalar_lea.vmem (!%p8501_p9), [#allocation2], %s5501_s8 }
  0x88   : > { %7571 = dma.done.wait (%p8502_p0), %s374_s11, 8192  }
  0x89   : > { %7573 = vsyncadd (%p8502_p0), %s374_s11, 4294959104  ;;  %p8503_p11 = scmp.eq.s32.totalorder %s7691_s17, 0 }
  0x8b   : > { %7575 = dma.done.wait (%p8503_p11), [#allocation6], 40960   ;;  %p8504_p8 = pmov %p8503_p11 }
  0x8d   : > { %7577 = vsyncadd (%p8504_p8), [#allocation6], 4294926336  ;;  %p8505_p13 = pmov %p8504_p8 }
  0x8e   : > { %p8506_p6 = pmov %p8504_p8 }
  0x8f   : > { %7579 = dma.done.wait (%p8505_p13), [#allocation9], 8192  }
  0x90   : > { %7581 = vsyncadd (%p8506_p6), [#allocation9], 4294959104  ;;  %v6628_v0 = vld [vmem:[#allocation5 + $0x4] ss:$16 sps:$4 sm:$0xff]   ;;  %v6630_v1 = vld [vmem:[#allocation5 + $0xc] ss:$16 sps:$4 sm:$0xff]  }
  0x91   : > { %2382 = vmatprep.subr.bf16.mxu0 %v6628_v0  ;;  %v6632_v2 = vld [vmem:[#allocation5] ss:$16 sps:$4 sm:$0xff]   ;;  %v6633_v3 = vld [vmem:[#allocation5 + $0x8] ss:$16 sps:$4 sm:$0xff]   ;;  %2834 = vmatprep.subr.bf16.mxu1 %v6630_v1  ;;  %v6634_v4 = vld [vmem:[#allocation5 + $0x24] ss:$16 sps:$4 sm:$0xff]  }
  0x92   : > { %2383 = vmatpush1.bf16.msra.mxu0 %v6632_v2  ;;  %2835 = vmatpush1.bf16.msra.mxu1 %v6633_v3  ;;  %v6636_v5 = vld [vmem:[#allocation5 + $0x2c] ss:$16 sps:$4 sm:$0xff]   ;;  %v6638_v6 = vld [vmem:[#allocation5 + $0x20] ss:$16 sps:$4 sm:$0xff]   ;;  %v6639_v7 = vld [vmem:[#allocation5 + $0x28] ss:$16 sps:$4 sm:$0xff]  }
  0x93   : > { %2384 = vmatprep.subr.bf16.mxu0 %v6634_v4  ;;  %2836 = vmatprep.subr.bf16.mxu1 %v6636_v5  ;;  %v6640_v8 = vld [vmem:[#allocation5 + $0x44] ss:$16 sps:$4 sm:$0xff]   ;;  %v6642_v9 = vld [vmem:[#allocation5 + $0x4c] ss:$16 sps:$4 sm:$0xff]   ;;  %v6644_v10 = vld [vmem:[#allocation5 + $0x40] ss:$16 sps:$4 sm:$0xff]  }
  0x94   : > { %v6645_v11 = vld [vmem:[#allocation5 + $0x48] ss:$16 sps:$4 sm:$0xff]   ;;  %v6646_v12 = vld [vmem:[#allocation5 + $0x64] ss:$16 sps:$4 sm:$0xff]   ;;  %v6648_v13 = vld [vmem:[#allocation5 + $0x6c] ss:$16 sps:$4 sm:$0xff]  }
  0x95   : > { %v6650_v14 = vld [vmem:[#allocation5 + $0x60] ss:$16 sps:$4 sm:$0xff]   ;;  %v6651_v15 = vld [vmem:[#allocation5 + $0x68] ss:$16 sps:$4 sm:$0xff]   ;;  %v6652_v16 = vld [vmem:[#allocation5 + $0x84] ss:$16 sps:$4 sm:$0xff]  }
  0x96   : > { %2385 = vmatpush1.bf16.msra.mxu0 %v6638_v6  ;;  %2837 = vmatpush1.bf16.msra.mxu1 %v6639_v7  ;;  %v6654_v17 = vld [vmem:[#allocation5 + $0x8c] ss:$16 sps:$4 sm:$0xff]   ;;  %v6656_v18 = vld [vmem:[#allocation5 + $0x80] ss:$16 sps:$4 sm:$0xff]   ;;  %v6657_v19 = vld [vmem:[#allocation5 + $0x88] ss:$16 sps:$4 sm:$0xff]  }
  0x97   : > { %2386 = vmatprep.subr.bf16.mxu0 %v6640_v8  ;;  %2838 = vmatprep.subr.bf16.mxu1 %v6642_v9  ;;  %v6658_v20 = vld [vmem:[#allocation5 + $0xa4] ss:$16 sps:$4 sm:$0xff]   ;;  %v6660_v21 = vld [vmem:[#allocation5 + $0xac] ss:$16 sps:$4 sm:$0xff]   ;;  %v6662_v22 = vld [vmem:[#allocation5 + $0xa0] ss:$16 sps:$4 sm:$0xff]  }
  0x98   : > { %v6663_v23 = vld [vmem:[#allocation5 + $0xa8] ss:$16 sps:$4 sm:$0xff]   ;;  %v6664_v24 = vld [vmem:[#allocation5 + $0xc4] ss:$16 sps:$4 sm:$0xff]   ;;  %v6666_v25 = vld [vmem:[#allocation5 + $0xcc] ss:$16 sps:$4 sm:$0xff]  }
  0x99   : > { %v6668_v26 = vld [vmem:[#allocation5 + $0xc0] ss:$16 sps:$4 sm:$0xff]   ;;  %v6669_v27 = vld [vmem:[#allocation5 + $0xc8] ss:$16 sps:$4 sm:$0xff]   ;;  %v6670_v28 = vld [vmem:[#allocation5 + $0xe4] ss:$16 sps:$4 sm:$0xff]  }
  0x9a   : > { %2387 = vmatpush1.bf16.msra.mxu0 %v6644_v10  ;;  %2839 = vmatpush1.bf16.msra.mxu1 %v6645_v11  ;;  %v6672_v29 = vld [vmem:[#allocation5 + $0xec] ss:$16 sps:$4 sm:$0xff]   ;;  %v6674_v30 = vld [vmem:[#allocation5 + $0xe0] ss:$16 sps:$4 sm:$0xff]   ;;  %v6675_v31 = vld [vmem:[#allocation5 + $0xe8] ss:$16 sps:$4 sm:$0xff]  }
  0x9b   : > { %2388 = vmatprep.subr.bf16.mxu0 %v6646_v12  ;;  %2840 = vmatprep.subr.bf16.mxu1 %v6648_v13  ;;  %v6676_v32 = vld [vmem:[#allocation5 + $0x104] ss:$16 sps:$4 sm:$0xff]   ;;  %v6678_v33 = vld [vmem:[#allocation5 + $0x10c] ss:$16 sps:$4 sm:$0xff]   ;;  %v6680_v34 = vld [vmem:[#allocation5 + $0x100] ss:$16 sps:$4 sm:$0xff]  }
  0x9c   : > { %v6681_v35 = vld [vmem:[#allocation5 + $0x108] ss:$16 sps:$4 sm:$0xff]   ;;  %v6682_v36 = vld [vmem:[#allocation5 + $0x124] ss:$16 sps:$4 sm:$0xff]   ;;  %v6684_v37 = vld [vmem:[#allocation5 + $0x12c] ss:$16 sps:$4 sm:$0xff]  }
  0x9d   : > { %v6686_v38 = vld [vmem:[#allocation5 + $0x120] ss:$16 sps:$4 sm:$0xff]   ;;  %v6687_v39 = vld [vmem:[#allocation5 + $0x128] ss:$16 sps:$4 sm:$0xff]   ;;  %v6688_v40 = vld [vmem:[#allocation5 + $0x144] ss:$16 sps:$4 sm:$0xff]  }
  0x9e   : > { %2389 = vmatpush1.bf16.msra.mxu0 %v6650_v14  ;;  %2841 = vmatpush1.bf16.msra.mxu1 %v6651_v15  ;;  %v6690_v41 = vld [vmem:[#allocation5 + $0x14c] ss:$16 sps:$4 sm:$0xff]   ;;  %v6692_v42 = vld [vmem:[#allocation5 + $0x140] ss:$16 sps:$4 sm:$0xff]   ;;  %v6693_v43 = vld [vmem:[#allocation5 + $0x148] ss:$16 sps:$4 sm:$0xff]  }
  0x9f   : > { %2390 = vmatprep.subr.bf16.mxu0 %v6652_v16  ;;  %2842 = vmatprep.subr.bf16.mxu1 %v6654_v17  ;;  %v6694_v44 = vld [vmem:[#allocation5 + $0x164] ss:$16 sps:$4 sm:$0xff]   ;;  %v6696_v45 = vld [vmem:[#allocation5 + $0x16c] ss:$16 sps:$4 sm:$0xff]   ;;  %v6698_v48 = vld [vmem:[#allocation5 + $0x160] ss:$16 sps:$4 sm:$0xff]  }
  0xa0   : > { %v440_v46 = vld [vmem:[%s7864_s18] sm:$0xff]  ;;  %v6699_v49 = vld [vmem:[#allocation5 + $0x168] ss:$16 sps:$4 sm:$0xff]   ;;  %v6702_v52 = vld [vmem:[#allocation5 + $0x18c] ss:$16 sps:$4 sm:$0xff]   ;;  %s5505_s13 = sshll.u32 %s7860_s1, 8 }
  0xa1   : > { %v444_v47 = vld [vmem:[%s7864_s18 + $0x20] sm:$0xff]  ;;  %v6705_v54 = vld [vmem:[#allocation5 + $0x188] ss:$16 sps:$4 sm:$0xff]   ;;  %v6708_v56 = vld [vmem:[#allocation5 + $0x1ac] ss:$16 sps:$4 sm:$0xff]   ;;  %s7970_s29 = scalar_lea.vmem [#allocation10], %s5505_s13 }
  0xa2   : > { %2391 = vmatpush1.bf16.msra.mxu0 %v6656_v18  ;;  %2843 = vmatpush1.bf16.msra.mxu1 %v6657_v19  ;;  %v5509_v50 = vcombine.high %v440_v46, %v444_v47  ;;  %v6700_v51 = vld [vmem:[#allocation5 + $0x184] ss:$16 sps:$4 sm:$0xff]   ;;  %v6704_v53 = vld [vmem:[#allocation5 + $0x180] ss:$16 sps:$4 sm:$0xff]   ;;  %v6711_v58 = vld [vmem:[#allocation5 + $0x1a8] ss:$16 sps:$4 sm:$0xff]   ;;  %v5508_v7 = vcombine.low %v440_v46, %v444_v47 }
  0xa3   : > { %2392 = vmatprep.subr.bf16.mxu0 %v6658_v20  ;;  %2844 = vmatprep.subr.bf16.mxu1 %v6660_v21  ;;  %v6706_v55 = vld [vmem:[#allocation5 + $0x1a4] ss:$16 sps:$4 sm:$0xff]   ;;  %v6710_v57 = vld [vmem:[#allocation5 + $0x1a0] ss:$16 sps:$4 sm:$0xff]   ;;  %v6714_v60 = vld [vmem:[#allocation5 + $0x1cc] ss:$16 sps:$4 sm:$0xff]  }
  0xa4   : > { %2414 = vmatprep.mubr.bf16.mxu0 %v5509_v50  ;;  %2866 = vmatprep.mubr.bf16.mxu1 %v5509_v50  ;;  %v6712_v59 = vld [vmem:[#allocation5 + $0x1c4] ss:$16 sps:$4 sm:$0xff]   ;;  %v6716_v61 = vld [vmem:[#allocation5 + $0x1c0] ss:$16 sps:$4 sm:$0xff]   ;;  %v6717_v62 = vld [vmem:[#allocation5 + $0x1c8] ss:$16 sps:$4 sm:$0xff]  }
  0xa5   : > { %v6718_v63 = vld [vmem:[#allocation5 + $0x1e4] ss:$16 sps:$4 sm:$0xff]   ;;  %v6720_v0 = vld [vmem:[#allocation5 + $0x1ec] ss:$16 sps:$4 sm:$0xff]   ;;  %v6722_v1 = vld [vmem:[#allocation5 + $0x1e0] ss:$16 sps:$4 sm:$0xff]  }
  0xa6   : > { %2393 = vmatpush1.bf16.msra.mxu0 %v6662_v22  ;;  %2845 = vmatpush1.bf16.msra.mxu1 %v6663_v23  ;;  %v6723_v2 = vld [vmem:[#allocation5 + $0x1e8] ss:$16 sps:$4 sm:$0xff]   ;;  %v6726_v3 = vld [vmem:[#allocation5 + $0x204] ss:$16 sps:$4 sm:$0xff]   ;;  %v6729_v4 = vld [vmem:[#allocation5 + $0x20c] ss:$16 sps:$4 sm:$0xff]  }
  0xa7   : > { %2394 = vmatprep.subr.bf16.mxu0 %v6664_v24  ;;  %2846 = vmatprep.subr.bf16.mxu1 %v6666_v25  ;;  %v6724_v5 = vld [vmem:[#allocation5 + $0x200] ss:$16 sps:$4 sm:$0xff]   ;;  %v6727_v6 = vld [vmem:[#allocation5 + $0x208] ss:$16 sps:$4 sm:$0xff]   ;;  %v6732_v10 = vld [vmem:[#allocation5 + $0x224] ss:$16 sps:$4 sm:$0xff]  }
  0xa8   : > { %v448_v8 = vld [vmem:[%s7864_s18 + $0x40] sm:$0xff]  ;;  %v6735_v11 = vld [vmem:[#allocation5 + $0x22c] ss:$16 sps:$4 sm:$0xff]   ;;  %v6733_v14 = vld [vmem:[#allocation5 + $0x228] ss:$16 sps:$4 sm:$0xff]   ;;  %s6078_s8 = sshll.u32 %s7691_s17, 12 }
  0xa9   : > { %v452_v9 = vld [vmem:[%s7864_s18 + $0x60] sm:$0xff]  ;;  %v6741_v16 = vld [vmem:[#allocation5 + $0x24c] ss:$16 sps:$4 sm:$0xff]   ;;  %v6739_v21 = vld [vmem:[#allocation5 + $0x248] ss:$16 sps:$4 sm:$0xff]   ;;  %s8365_s19 = scalar_lea.hbm %s8480_s9, %s6078_s8  ;;  %s5359_s21 = sshll.u32 %s7970_s29, 4  ;;  %s8368_s21 = int_to_ptr.vmem [resolvable:$true] %s5359_s21 }
  0xaa   : > { %2395 = vmatpush1.bf16.msra.mxu0 %v6668_v26  ;;  %2847 = vmatpush1.bf16.msra.mxu1 %v6669_v27  ;;  %v5517_v12 = vcombine.high %v448_v8, %v452_v9  ;;  %v6730_v13 = vld [vmem:[#allocation5 + $0x220] ss:$16 sps:$4 sm:$0xff]   ;;  %v6738_v15 = vld [vmem:[#allocation5 + $0x244] ss:$16 sps:$4 sm:$0xff]   ;;  %v5516_v18 = vcombine.low %v448_v8, %v452_v9  ;;  %v6747_v23 = vld [vmem:[#allocation5 + $0x26c] ss:$16 sps:$4 sm:$0xff]  }
  0xab   : > { %2396 = vmatprep.subr.bf16.mxu0 %v6670_v28  ;;  %2848 = vmatprep.subr.bf16.mxu1 %v6672_v29  ;;  %v456_v17 = vld [vmem:[%s7864_s18 + $0x80] sm:$0xff]  ;;  %v6745_v26 = vld [vmem:[#allocation5 + $0x268] ss:$16 sps:$4 sm:$0xff]   ;;  %v6753_v28 = vld [vmem:[#allocation5 + $0x28c] ss:$16 sps:$4 sm:$0xff]   ;;  %s5340_s13 = scalar_lea.sflag [#allocation4], %s7860_s1 }
  0xac   : > { %v460_v19 = vld [vmem:[%s7864_s18 + $0xa0] sm:$0xff]  ;;  %v6771_v47 = vld [vmem:[#allocation5 + $0x2ec] ss:$16 sps:$4 sm:$0xff]   ;;  %v6769_v50 = vld [vmem:[#allocation5 + $0x2e8] ss:$16 sps:$4 sm:$0xff]   ;;  %s7526_s23 = scalar_lea.vmem %s8368_s21, 4096 }
  0xad   : > { %v6736_v20 = vld [vmem:[#allocation5 + $0x240] ss:$16 sps:$4 sm:$0xff]   ;;  %v6744_v22 = vld [vmem:[#allocation5 + $0x264] ss:$16 sps:$4 sm:$0xff]   ;;  %v5525_v24 = vcombine.high %v456_v17, %v460_v19  ;;  %p7527_p10 = scmp.ne.s32.totalorder %s8368_s21, %s7526_s23  ;;  %s7612_s26 = smov [#allocation10]  }
  0xae   : > { %2397 = vmatpush1.bf16.msra.mxu0 %v6674_v30  ;;  %2849 = vmatpush1.bf16.msra.mxu1 %v6675_v31  ;;  %v6742_v25 = vld [vmem:[#allocation5 + $0x260] ss:$16 sps:$4 sm:$0xff]   ;;  %v6750_v27 = vld [vmem:[#allocation5 + $0x284] ss:$16 sps:$4 sm:$0xff]   ;;  %v5524_v30 = vcombine.low %v456_v17, %v460_v19  ;;  %v6807_v19 = vld [vmem:[#allocation5 + $0x3ac] ss:$16 sps:$4 sm:$0xff]  }
  0xaf   : > { %2398 = vmatprep.subr.bf16.mxu0 %v6676_v32  ;;  %2850 = vmatprep.subr.bf16.mxu1 %v6678_v33  ;;  %v464_v29 = vld [vmem:[%s7864_s18 + $0xc0] sm:$0xff]  ;;  %v6751_v33 = vld [vmem:[#allocation5 + $0x288] ss:$16 sps:$4 sm:$0xff]   ;;  %p7528_p3 = pnand %p7527_p10, %p7812_p5  ;;  %s7530_s28 = sshll.u32 %s7612_s26, 4  ;;  %s7531_s28 = int_to_ptr.vmem [resolvable:$false] %s7530_s28 }
  0xb0   : > { %v468_v31 = vld [vmem:[%s7864_s18 + $0xe0] sm:$0xff]  ;;  %s7532_s22 = scalar_lea.vmem %s7531_s28, 8192  ;;  %p7533_p12 = scmp.lt.s32.totalorder %s8368_s21, %s7531_s28 }
  0xb1   : > { %v6748_v32 = vld [vmem:[#allocation5 + $0x280] ss:$16 sps:$4 sm:$0xff]   ;;  %v6768_v46 = vld [vmem:[#allocation5 + $0x2e4] ss:$16 sps:$4 sm:$0xff]   ;;  %p7529_p7 = pneg %p7528_p3  ;;  %p7534_p2 = scmp.lt.s32.totalorder %s7532_s22, %s7526_s23 }
  0xb2   : > { %2399 = vmatpush1.bf16.msra.mxu0 %v6680_v34  ;;  %2851 = vmatpush1.bf16.msra.mxu1 %v6681_v35  ;;  %v6756_v34 = vld [vmem:[#allocation5 + $0x2a4] ss:$16 sps:$4 sm:$0xff]   ;;  %v6759_v35 = vld [vmem:[#allocation5 + $0x2ac] ss:$16 sps:$4 sm:$0xff]   ;;  %v6790_v9 = vld [vmem:[#allocation5 + $0x360] ss:$16 sps:$4 sm:$0xff]  }
  0xb3   : > { %2400 = vmatprep.subr.bf16.mxu0 %v6682_v36  ;;  %2852 = vmatprep.subr.bf16.mxu1 %v6684_v37  ;;  %v5533_v36 = vcombine.high %v464_v29, %v468_v31  ;;  %v6754_v37 = vld [vmem:[#allocation5 + $0x2a0] ss:$16 sps:$4 sm:$0xff]   ;;  %p7535_p1 = por %p7534_p2, %p7533_p12 }
  0xb4   : > { %v500_v17 = vld [vmem:[%s7864_s18 + $0x1e0] sm:$0xff] }
  0xb5   : > { %p7536_p4 = pnand %p7535_p1, %p7529_p7 }
  0xb6   : > { %2401 = vmatpush1.bf16.msra.mxu0 %v6686_v38  ;;  %2853 = vmatpush1.bf16.msra.mxu1 %v6687_v39  ;;  %v6757_v38 = vld [vmem:[#allocation5 + $0x2a8] ss:$16 sps:$4 sm:$0xff]   ;;  %v6762_v39 = vld [vmem:[#allocation5 + $0x2c4] ss:$16 sps:$4 sm:$0xff]  }
  0xb7   : > { %2402 = vmatprep.subr.bf16.mxu0 %v6688_v40  ;;  %2854 = vmatprep.subr.bf16.mxu1 %v6690_v41  ;;  %v6765_v40 = vld [vmem:[#allocation5 + $0x2cc] ss:$16 sps:$4 sm:$0xff]   ;;  %v6760_v41 = vld [vmem:[#allocation5 + $0x2c0] ss:$16 sps:$4 sm:$0xff]  }
  0xba   : > { %2403 = vmatpush1.bf16.msra.mxu0 %v6692_v42  ;;  %2855 = vmatpush1.bf16.msra.mxu1 %v6693_v43  ;;  %v6763_v42 = vld [vmem:[#allocation5 + $0x2c8] ss:$16 sps:$4 sm:$0xff]   ;;  %v5532_v43 = vcombine.low %v464_v29, %v468_v31  ;;  %v6819_v31 = vld [vmem:[#allocation5 + $0x3ec] ss:$16 sps:$4 sm:$0xff]  }
  0xbb   : > { %2404 = vmatprep.subr.bf16.mxu0 %v6694_v44  ;;  %2856 = vmatprep.subr.bf16.mxu1 %v6696_v45  ;;  %v472_v44 = vld [vmem:[%s7864_s18 + $0x100] sm:$0xff]  ;;  %v6811_v29 = vld [vmem:[#allocation5 + $0x3c8] ss:$16 sps:$4 sm:$0xff]  }
  0xbc   : > { %v476_v45 = vld [vmem:[%s7864_s18 + $0x120] sm:$0xff] }
  0xbe   : > { %2405 = vmatpush1.bf16.msra.mxu0 %v6698_v48  ;;  %2857 = vmatpush1.bf16.msra.mxu1 %v6699_v49  ;;  %v5541_v48 = vcombine.high %v472_v44, %v476_v45  ;;  %v6766_v49 = vld [vmem:[#allocation5 + $0x2e0] ss:$16 sps:$4 sm:$0xff]  }
  0xbf   : > { %2406 = vmatprep.subr.bf16.mxu0 %v6700_v51  ;;  %2858 = vmatprep.subr.bf16.mxu1 %v6702_v52  ;;  %v6774_v51 = vld [vmem:[#allocation5 + $0x304] ss:$16 sps:$4 sm:$0xff]   ;;  %v6777_v52 = vld [vmem:[#allocation5 + $0x30c] ss:$16 sps:$4 sm:$0xff]  }
  0xc2   : > { %2407 = vmatpush1.bf16.msra.mxu0 %v6704_v53  ;;  %2859 = vmatpush1.bf16.msra.mxu1 %v6705_v54  ;;  %v480_v53 = vld [vmem:[%s7864_s18 + $0x140] sm:$0xff]  ;;  %v5540_v54 = vcombine.low %v472_v44, %v476_v45 }
  0xc3   : > { %2408 = vmatprep.subr.bf16.mxu0 %v6706_v55  ;;  %2860 = vmatprep.subr.bf16.mxu1 %v6708_v56  ;;  %v484_v55 = vld [vmem:[%s7864_s18 + $0x160] sm:$0xff] }
  0xc4   : > { %v6772_v56 = vld [vmem:[#allocation5 + $0x300] ss:$16 sps:$4 sm:$0xff]  }
  0xc5   : > { %v6826_v45 = vld [vmem:[#allocation5 + $0x420] ss:$16 sps:$4 sm:$0xff]  }
  0xc6   : > { %2409 = vmatpush1.bf16.msra.mxu0 %v6710_v57  ;;  %2861 = vmatpush1.bf16.msra.mxu1 %v6711_v58  ;;  %v6775_v57 = vld [vmem:[#allocation5 + $0x308] ss:$16 sps:$4 sm:$0xff]   ;;  %v6780_v58 = vld [vmem:[#allocation5 + $0x324] ss:$16 sps:$4 sm:$0xff]  }
  0xc7   : > { %2410 = vmatprep.subr.bf16.mxu0 %v6712_v59  ;;  %2862 = vmatprep.subr.bf16.mxu1 %v6714_v60  ;;  %v6783_v59 = vld [vmem:[#allocation5 + $0x32c] ss:$16 sps:$4 sm:$0xff]   ;;  %v5549_v60 = vcombine.high %v480_v53, %v484_v55 }
  0xca   : > { %2411 = vmatpush1.bf16.msra.mxu0 %v6716_v61  ;;  %2863 = vmatpush1.bf16.msra.mxu1 %v6717_v62  ;;  %v6778_v61 = vld [vmem:[#allocation5 + $0x320] ss:$16 sps:$4 sm:$0xff]   ;;  %v6781_v62 = vld [vmem:[#allocation5 + $0x328] ss:$16 sps:$4 sm:$0xff]  }
  0xcb   : > { %2412 = vmatprep.subr.bf16.mxu0 %v6718_v63  ;;  %2864 = vmatprep.subr.bf16.mxu1 %v6720_v0  ;;  %v6786_v63 = vld [vmem:[#allocation5 + $0x344] ss:$16 sps:$4 sm:$0xff]   ;;  %v6789_v0 = vld [vmem:[#allocation5 + $0x34c] ss:$16 sps:$4 sm:$0xff]  }
  0xce   : > { %2413 = vmatpush1.bf16.msra.mxu0 %v6722_v1  ;;  %2865 = vmatpush1.bf16.msra.mxu1 %v6723_v2  ;;  %v488_v1 = vld [vmem:[%s7864_s18 + $0x180] sm:$0xff]  ;;  %v5548_v2 = vcombine.low %v480_v53, %v484_v55  ;;  %v461_v53 = vld [vmem:[%s7864_s18 + $0xa8] sm:$0xff] }
  0xcf   : > { %2495 = vmatprep.subr.bf16.mxu0 %v6726_v3  ;;  %2947 = vmatprep.subr.bf16.mxu1 %v6729_v4  ;;  %v492_v3 = vld [vmem:[%s7864_s18 + $0x1a0] sm:$0xff]  ;;  %v6843_v55 = vld [vmem:[#allocation5 + $0x46c] ss:$16 sps:$4 sm:$0xff]  }
  0xd0   : > { %v6784_v4 = vld [vmem:[#allocation5 + $0x340] ss:$16 sps:$4 sm:$0xff]   ;;  %v5557_v8 = vcombine.high %v488_v1, %v492_v3 }
  0xd1   : > { %2415 = vmatmul.mubr.bf16.vlgmr.msra.gmra.mrb[0].mxu0 %v5508_v7  ;;  %2867 = vmatmul.mubr.bf16.vlgmr.msra.gmra.mrb[0].mxu1 %v5508_v7  ;;  %v6795_v7 = vld [vmem:[#allocation5 + $0x36c] ss:$16 sps:$4 sm:$0xff]  }
  0xd2   : > { %2496 = vmatpush1.bf16.msra.mxu0 %v6724_v5  ;;  %2948 = vmatpush1.bf16.msra.mxu1 %v6727_v6  ;;  %v6787_v5 = vld [vmem:[#allocation5 + $0x348] ss:$16 sps:$4 sm:$0xff]   ;;  %v6792_v6 = vld [vmem:[#allocation5 + $0x364] ss:$16 sps:$4 sm:$0xff]  }
  0xd3   : > { %2497 = vmatprep.subr.bf16.mxu0 %v6732_v10  ;;  %2949 = vmatprep.subr.bf16.mxu1 %v6735_v11  ;;  %v6793_v10 = vld [vmem:[#allocation5 + $0x368] ss:$16 sps:$4 sm:$0xff]   ;;  %v6798_v11 = vld [vmem:[#allocation5 + $0x384] ss:$16 sps:$4 sm:$0xff]  }
  0xd4   : > { %2424 = vmatprep.mubr.bf16.mxu0 %v5517_v12  ;;  %2876 = vmatprep.mubr.bf16.mxu1 %v5517_v12  ;;  %v6801_v12 = vld [vmem:[#allocation5 + $0x38c] ss:$16 sps:$4 sm:$0xff]  }
  0xd6   : > { %2498 = vmatpush1.bf16.msra.mxu0 %v6730_v13  ;;  %2950 = vmatpush1.bf16.msra.mxu1 %v6733_v14  ;;  %v6796_v13 = vld [vmem:[#allocation5 + $0x380] ss:$16 sps:$4 sm:$0xff]   ;;  %v6799_v14 = vld [vmem:[#allocation5 + $0x388] ss:$16 sps:$4 sm:$0xff]  }
  0xd7   : > { %2499 = vmatprep.subr.bf16.mxu0 %v6738_v15  ;;  %2951 = vmatprep.subr.bf16.mxu1 %v6741_v16  ;;  %v5556_v15 = vcombine.low %v488_v1, %v492_v3  ;;  %v496_v16 = vld [vmem:[%s7864_s18 + $0x1c0] sm:$0xff]  ;;  %v6847_v1 = vld [vmem:[#allocation5 + $0x488] ss:$16 sps:$4 sm:$0xff]   ;;  %v6855_v3 = vld [vmem:[#allocation5 + $0x4ac] ss:$16 sps:$4 sm:$0xff]  }
  0xd9   : > { %2425 = vmatmul.mubr.bf16.gmra.mrb[4].mxu0 %v5516_v18  ;;  %2877 = vmatmul.mubr.bf16.gmra.mrb[4].mxu1 %v5516_v18  ;;  %v6804_v18 = vld [vmem:[#allocation5 + $0x3a4] ss:$16 sps:$4 sm:$0xff]  }
  0xda   : > { %2500 = vmatpush1.bf16.msra.mxu0 %v6736_v20  ;;  %2952 = vmatpush1.bf16.msra.mxu1 %v6739_v21  ;;  %v5565_v20 = vcombine.high %v496_v16, %v500_v17  ;;  %v6802_v21 = vld [vmem:[#allocation5 + $0x3a0] ss:$16 sps:$4 sm:$0xff]  }
  0xdb   : > { %2501 = vmatprep.subr.bf16.mxu0 %v6744_v22  ;;  %2953 = vmatprep.subr.bf16.mxu1 %v6747_v23  ;;  %v6805_v22 = vld [vmem:[#allocation5 + $0x3a8] ss:$16 sps:$4 sm:$0xff]   ;;  %v6810_v23 = vld [vmem:[#allocation5 + $0x3c4] ss:$16 sps:$4 sm:$0xff]  }
  0xdc   : > { %2434 = vmatprep.mubr.bf16.mxu0 %v5525_v24  ;;  %2886 = vmatprep.mubr.bf16.mxu1 %v5525_v24  ;;  %v6813_v24 = vld [vmem:[#allocation5 + $0x3cc] ss:$16 sps:$4 sm:$0xff]  }
  0xde   : > { %2502 = vmatpush1.bf16.msra.mxu0 %v6742_v25  ;;  %2954 = vmatpush1.bf16.msra.mxu1 %v6745_v26  ;;  %v441_v25 = vld [vmem:[%s7864_s18 + $0x8] sm:$0xff]  ;;  %v5564_v26 = vcombine.low %v496_v16, %v500_v17  ;;  %v6862_v17 = vld [vmem:[#allocation5 + $0x4e0] ss:$16 sps:$4 sm:$0xff]  }
  0xdf   : > { %2503 = vmatprep.subr.bf16.mxu0 %v6750_v27  ;;  %2955 = vmatprep.subr.bf16.mxu1 %v6753_v28  ;;  %v445_v27 = vld [vmem:[%s7864_s18 + $0x28] sm:$0xff]  ;;  %v6808_v28 = vld [vmem:[#allocation5 + $0x3c0] ss:$16 sps:$4 sm:$0xff]  }
  0xe1   : > { %2435 = vmatmul.mubr.bf16.gmra.mrb[8].mxu0 %v5524_v30  ;;  %2887 = vmatmul.mubr.bf16.gmra.mrb[8].mxu1 %v5524_v30  ;;  %v6816_v30 = vld [vmem:[#allocation5 + $0x3e4] ss:$16 sps:$4 sm:$0xff]  }
  0xe2   : > { %2504 = vmatpush1.bf16.msra.mxu0 %v6748_v32  ;;  %2956 = vmatpush1.bf16.msra.mxu1 %v6751_v33  ;;  %v5511_v32 = vcombine.high %v441_v25, %v445_v27  ;;  %v6814_v33 = vld [vmem:[#allocation5 + $0x3e0] ss:$16 sps:$4 sm:$0xff]  }
  0xe3   : > { %2505 = vmatprep.subr.bf16.mxu0 %v6756_v34  ;;  %2957 = vmatprep.subr.bf16.mxu1 %v6759_v35  ;;  %v6817_v34 = vld [vmem:[#allocation5 + $0x3e8] ss:$16 sps:$4 sm:$0xff]   ;;  %v6822_v35 = vld [vmem:[#allocation5 + $0x404] ss:$16 sps:$4 sm:$0xff]  }
  0xe4   : > { %2444 = vmatprep.mubr.bf16.mxu0 %v5533_v36  ;;  %2896 = vmatprep.mubr.bf16.mxu1 %v5533_v36  ;;  %v6825_v36 = vld [vmem:[#allocation5 + $0x40c] ss:$16 sps:$4 sm:$0xff]  }
  0xe6   : > { %2506 = vmatpush1.bf16.msra.mxu0 %v6754_v37  ;;  %2958 = vmatpush1.bf16.msra.mxu1 %v6757_v38  ;;  %v449_v37 = vld [vmem:[%s7864_s18 + $0x48] sm:$0xff]  ;;  %v5510_v38 = vcombine.low %v441_v25, %v445_v27 }
  0xe7   : > { %2507 = vmatprep.subr.bf16.mxu0 %v6762_v39  ;;  %2959 = vmatprep.subr.bf16.mxu1 %v6765_v40  ;;  %v453_v39 = vld [vmem:[%s7864_s18 + $0x68] sm:$0xff]  ;;  %v6820_v40 = vld [vmem:[#allocation5 + $0x400] ss:$16 sps:$4 sm:$0xff]  }
  0xe8   : > { %v5519_v44 = vcombine.high %v449_v37, %v453_v39  ;;  %v485_v25 = vld [vmem:[%s7864_s18 + $0x168] sm:$0xff] }
  0xe9   : > { %2445 = vmatmul.mubr.bf16.gmra.mrb[12].mxu0 %v5532_v43  ;;  %2897 = vmatmul.mubr.bf16.gmra.mrb[12].mxu1 %v5532_v43  ;;  %v6831_v43 = vld [vmem:[#allocation5 + $0x42c] ss:$16 sps:$4 sm:$0xff]  }
  0xea   : > { %2508 = vmatpush1.bf16.msra.mxu0 %v6760_v41  ;;  %2960 = vmatpush1.bf16.msra.mxu1 %v6763_v42  ;;  %v6823_v41 = vld [vmem:[#allocation5 + $0x408] ss:$16 sps:$4 sm:$0xff]   ;;  %v6828_v42 = vld [vmem:[#allocation5 + $0x424] ss:$16 sps:$4 sm:$0xff]   ;;  %v6879_v27 = vld [vmem:[#allocation5 + $0x52c] ss:$16 sps:$4 sm:$0xff]  }
  0xeb   : > { %2509 = vmatprep.subr.bf16.mxu0 %v6768_v46  ;;  %2961 = vmatprep.subr.bf16.mxu1 %v6771_v47  ;;  %v6829_v46 = vld [vmem:[#allocation5 + $0x428] ss:$16 sps:$4 sm:$0xff]   ;;  %v6834_v47 = vld [vmem:[#allocation5 + $0x444] ss:$16 sps:$4 sm:$0xff]  }
  0xec   : > { %2454 = vmatprep.mubr.bf16.mxu0 %v5541_v48  ;;  %2906 = vmatprep.mubr.bf16.mxu1 %v5541_v48  ;;  %v6837_v48 = vld [vmem:[#allocation5 + $0x44c] ss:$16 sps:$4 sm:$0xff]  }
  0xee   : > { %2510 = vmatpush1.bf16.msra.mxu0 %v6766_v49  ;;  %2962 = vmatpush1.bf16.msra.mxu1 %v6769_v50  ;;  %v6832_v49 = vld [vmem:[#allocation5 + $0x440] ss:$16 sps:$4 sm:$0xff]   ;;  %v6835_v50 = vld [vmem:[#allocation5 + $0x448] ss:$16 sps:$4 sm:$0xff]  }
  0xef   : > { %2511 = vmatprep.subr.bf16.mxu0 %v6774_v51  ;;  %2963 = vmatprep.subr.bf16.mxu1 %v6777_v52  ;;  %v5518_v51 = vcombine.low %v449_v37, %v453_v39  ;;  %v457_v52 = vld [vmem:[%s7864_s18 + $0x88] sm:$0xff] }
  0xf0   : > { %v6883_v37 = vld [vmem:[#allocation5 + $0x548] ss:$16 sps:$4 sm:$0xff]   ;;  %v6891_v39 = vld [vmem:[#allocation5 + $0x56c] ss:$16 sps:$4 sm:$0xff]  }
  0xf1   : > { %2455 = vmatmul.mubr.bf16.gmra.mrb[16].mxu0 %v5540_v54  ;;  %2907 = vmatmul.mubr.bf16.gmra.mrb[16].mxu1 %v5540_v54  ;;  %v6840_v54 = vld [vmem:[#allocation5 + $0x464] ss:$16 sps:$4 sm:$0xff]  }
  0xf2   : > { %2512 = vmatpush1.bf16.msra.mxu0 %v6772_v56  ;;  %2964 = vmatpush1.bf16.msra.mxu1 %v6775_v57  ;;  %v5527_v56 = vcombine.high %v457_v52, %v461_v53  ;;  %v6838_v57 = vld [vmem:[#allocation5 + $0x460] ss:$16 sps:$4 sm:$0xff]  }
  0xf3   : > { %2513 = vmatprep.subr.bf16.mxu0 %v6780_v58  ;;  %2965 = vmatprep.subr.bf16.mxu1 %v6783_v59  ;;  %v6841_v58 = vld [vmem:[#allocation5 + $0x468] ss:$16 sps:$4 sm:$0xff]   ;;  %v6846_v59 = vld [vmem:[#allocation5 + $0x484] ss:$16 sps:$4 sm:$0xff]  }
  0xf4   : > { %2464 = vmatprep.mubr.bf16.mxu0 %v5549_v60  ;;  %2916 = vmatprep.mubr.bf16.mxu1 %v5549_v60  ;;  %v6849_v60 = vld [vmem:[#allocation5 + $0x48c] ss:$16 sps:$4 sm:$0xff]  }
  0xf6   : > { %2514 = vmatpush1.bf16.msra.mxu0 %v6778_v61  ;;  %2966 = vmatpush1.bf16.msra.mxu1 %v6781_v62  ;;  %v465_v61 = vld [vmem:[%s7864_s18 + $0xc8] sm:$0xff]  ;;  %v5526_v62 = vcombine.low %v457_v52, %v461_v53  ;;  %v6898_v53 = vld [vmem:[#allocation5 + $0x5a0] ss:$16 sps:$4 sm:$0xff]  }
  0xf7   : > { %2515 = vmatprep.subr.bf16.mxu0 %v6786_v63  ;;  %2967 = vmatprep.subr.bf16.mxu1 %v6789_v0  ;;  %v469_v63 = vld [vmem:[%s7864_s18 + $0xe8] sm:$0xff]  ;;  %v6844_v0 = vld [vmem:[#allocation5 + $0x480] ss:$16 sps:$4 sm:$0xff]  }
  0xf9   : > { %2465 = vmatmul.mubr.bf16.gmra.mrb[20].mxu0 %v5548_v2  ;;  %2917 = vmatmul.mubr.bf16.gmra.mrb[20].mxu1 %v5548_v2  ;;  %v6852_v2 = vld [vmem:[#allocation5 + $0x4a4] ss:$16 sps:$4 sm:$0xff]  }
  0xfa   : > { %2516 = vmatpush1.bf16.msra.mxu0 %v6784_v4  ;;  %2968 = vmatpush1.bf16.msra.mxu1 %v6787_v5  ;;  %v5535_v4 = vcombine.high %v465_v61, %v469_v63  ;;  %v6850_v5 = vld [vmem:[#allocation5 + $0x4a0] ss:$16 sps:$4 sm:$0xff]  }
  0xfb   : > { %2517 = vmatprep.subr.bf16.mxu0 %v6792_v6  ;;  %2969 = vmatprep.subr.bf16.mxu1 %v6795_v7  ;;  %v6853_v6 = vld [vmem:[#allocation5 + $0x4a8] ss:$16 sps:$4 sm:$0xff]   ;;  %v6858_v7 = vld [vmem:[#allocation5 + $0x4c4] ss:$16 sps:$4 sm:$0xff]  }
  0xfc   : > { %2474 = vmatprep.mubr.bf16.mxu0 %v5557_v8  ;;  %2926 = vmatprep.mubr.bf16.mxu1 %v5557_v8  ;;  %v6861_v8 = vld [vmem:[#allocation5 + $0x4cc] ss:$16 sps:$4 sm:$0xff]  }
  0xfe   : > { %2518 = vmatpush1.bf16.msra.mxu0 %v6790_v9  ;;  %2970 = vmatpush1.bf16.msra.mxu1 %v6793_v10  ;;  %v473_v9 = vld [vmem:[%s7864_s18 + $0x108] sm:$0xff]  ;;  %v5534_v10 = vcombine.low %v465_v61, %v469_v63  ;;  %v446_v61 = vld [vmem:[%s7864_s18 + $0x30] sm:$0xff] }
  0xff   : > { %2519 = vmatprep.subr.bf16.mxu0 %v6798_v11  ;;  %2971 = vmatprep.subr.bf16.mxu1 %v6801_v12  ;;  %v477_v11 = vld [vmem:[%s7864_s18 + $0x128] sm:$0xff]  ;;  %v6856_v12 = vld [vmem:[#allocation5 + $0x4c0] ss:$16 sps:$4 sm:$0xff]  }
 0x100   : > { %v5543_v16 = vcombine.high %v473_v9, %v477_v11  ;;  %v6915_v63 = vld [vmem:[#allocation5 + $0x5ec] ss:$16 sps:$4 sm:$0xff]  }
 0x101   : > { %2475 = vmatmul.mubr.bf16.gmra.mrb[24].mxu0 %v5556_v15  ;;  %2927 = vmatmul.mubr.bf16.gmra.mrb[24].mxu1 %v5556_v15  ;;  %v6867_v15 = vld [vmem:[#allocation5 + $0x4ec] ss:$16 sps:$4 sm:$0xff]  }
 0x102   : > { %2520 = vmatpush1.bf16.msra.mxu0 %v6796_v13  ;;  %2972 = vmatpush1.bf16.msra.mxu1 %v6799_v14  ;;  %v6859_v13 = vld [vmem:[#allocation5 + $0x4c8] ss:$16 sps:$4 sm:$0xff]   ;;  %v6864_v14 = vld [vmem:[#allocation5 + $0x4e4] ss:$16 sps:$4 sm:$0xff]  }
 0x103   : > { %2521 = vmatprep.subr.bf16.mxu0 %v6804_v18  ;;  %2973 = vmatprep.subr.bf16.mxu1 %v6807_v19  ;;  %v6865_v18 = vld [vmem:[#allocation5 + $0x4e8] ss:$16 sps:$4 sm:$0xff]   ;;  %v6870_v19 = vld [vmem:[#allocation5 + $0x504] ss:$16 sps:$4 sm:$0xff]  }
 0x104   : > { %2484 = vmatprep.mubr.bf16.mxu0 %v5565_v20  ;;  %2936 = vmatprep.mubr.bf16.mxu1 %v5565_v20  ;;  %v6873_v20 = vld [vmem:[#allocation5 + $0x50c] ss:$16 sps:$4 sm:$0xff]  }
 0x106   : > { %2522 = vmatpush1.bf16.msra.mxu0 %v6802_v21  ;;  %2974 = vmatpush1.bf16.msra.mxu1 %v6805_v22  ;;  %v6868_v21 = vld [vmem:[#allocation5 + $0x500] ss:$16 sps:$4 sm:$0xff]   ;;  %v6871_v22 = vld [vmem:[#allocation5 + $0x508] ss:$16 sps:$4 sm:$0xff]  }
 0x107   : > { %2523 = vmatprep.subr.bf16.mxu0 %v6810_v23  ;;  %2975 = vmatprep.subr.bf16.mxu1 %v6813_v24  ;;  %v5542_v23 = vcombine.low %v473_v9, %v477_v11  ;;  %v481_v24 = vld [vmem:[%s7864_s18 + $0x148] sm:$0xff]  ;;  %v454_v9 = vld [vmem:[%s7864_s18 + $0x70] sm:$0xff] }
 0x108   : > { %v6927_v11 = vld [vmem:[#allocation5 + $0x62c] ss:$16 sps:$4 sm:$0xff]  }
 0x109   : > { %2485 = vmatmul.mubr.bf16.gmra.mrb[28].mxu0 %v5564_v26  ;;  %2937 = vmatmul.mubr.bf16.gmra.mrb[28].mxu1 %v5564_v26  ;;  %v6876_v26 = vld [vmem:[#allocation5 + $0x524] ss:$16 sps:$4 sm:$0xff]  }
 0x10a   : > { %2524 = vmatpush1.bf16.msra.mxu0 %v6808_v28  ;;  %2976 = vmatpush1.bf16.msra.mxu1 %v6811_v29  ;;  %v5551_v28 = vcombine.high %v481_v24, %v485_v25  ;;  %v6874_v29 = vld [vmem:[#allocation5 + $0x520] ss:$16 sps:$4 sm:$0xff]  }
 0x10b   : > { %2525 = vmatprep.subr.bf16.mxu0 %v6816_v30  ;;  %2977 = vmatprep.subr.bf16.mxu1 %v6819_v31  ;;  %v6877_v30 = vld [vmem:[#allocation5 + $0x528] ss:$16 sps:$4 sm:$0xff]   ;;  %v6882_v31 = vld [vmem:[#allocation5 + $0x544] ss:$16 sps:$4 sm:$0xff]  }
 0x10c   : > { %2527 = vmatprep.mubr.bf16.mxu0 %v5511_v32  ;;  %2979 = vmatprep.mubr.bf16.mxu1 %v5511_v32  ;;  %v6885_v32 = vld [vmem:[#allocation5 + $0x54c] ss:$16 sps:$4 sm:$0xff]  }
 0x10e   : > { %2526 = vmatpush1.bf16.msra.mxu0 %v6814_v33  ;;  %2978 = vmatpush1.bf16.msra.mxu1 %v6817_v34  ;;  %v489_v33 = vld [vmem:[%s7864_s18 + $0x188] sm:$0xff]  ;;  %v5550_v34 = vcombine.low %v481_v24, %v485_v25  ;;  %v6934_v25 = vld [vmem:[#allocation5 + $0x660] ss:$16 sps:$4 sm:$0xff]  }
 0x10f   : > { %2608 = vmatprep.subr.bf16.mxu0 %v6822_v35  ;;  %3060 = vmatprep.subr.bf16.mxu1 %v6825_v36  ;;  %v493_v35 = vld [vmem:[%s7864_s18 + $0x1a8] sm:$0xff]  ;;  %v6880_v36 = vld [vmem:[#allocation5 + $0x540] ss:$16 sps:$4 sm:$0xff]  }
 0x111   : > { %2528 = vmatmul.mubr.bf16.vlgmr.msra.gmra.mrb[0].mxu0 %v5510_v38  ;;  %2980 = vmatmul.mubr.bf16.vlgmr.msra.gmra.mrb[0].mxu1 %v5510_v38  ;;  %v6888_v38 = vld [vmem:[#allocation5 + $0x564] ss:$16 sps:$4 sm:$0xff]  }
 0x112   : > { %2609 = vmatpush1.bf16.msra.mxu0 %v6820_v40  ;;  %3061 = vmatpush1.bf16.msra.mxu1 %v6823_v41  ;;  %v5559_v40 = vcombine.high %v489_v33, %v493_v35  ;;  %v6886_v41 = vld [vmem:[#allocation5 + $0x560] ss:$16 sps:$4 sm:$0xff]  }
 0x113   : > { %2610 = vmatprep.subr.bf16.mxu0 %v6828_v42  ;;  %3062 = vmatprep.subr.bf16.mxu1 %v6831_v43  ;;  %v6889_v42 = vld [vmem:[#allocation5 + $0x568] ss:$16 sps:$4 sm:$0xff]   ;;  %v6894_v43 = vld [vmem:[#allocation5 + $0x584] ss:$16 sps:$4 sm:$0xff]  }
 0x114   : > { %2537 = vmatprep.mubr.bf16.mxu0 %v5519_v44  ;;  %2989 = vmatprep.mubr.bf16.mxu1 %v5519_v44  ;;  %v6897_v44 = vld [vmem:[#allocation5 + $0x58c] ss:$16 sps:$4 sm:$0xff]  }
 0x116   : > { %2611 = vmatpush1.bf16.msra.mxu0 %v6826_v45  ;;  %3063 = vmatpush1.bf16.msra.mxu1 %v6829_v46  ;;  %v497_v45 = vld [vmem:[%s7864_s18 + $0x1c8] sm:$0xff]  ;;  %v5558_v46 = vcombine.low %v489_v33, %v493_v35  ;;  %v470_v33 = vld [vmem:[%s7864_s18 + $0xf0] sm:$0xff] }
 0x117   : > { %2612 = vmatprep.subr.bf16.mxu0 %v6834_v47  ;;  %3064 = vmatprep.subr.bf16.mxu1 %v6837_v48  ;;  %v501_v47 = vld [vmem:[%s7864_s18 + $0x1e8] sm:$0xff]  ;;  %v6892_v48 = vld [vmem:[#allocation5 + $0x580] ss:$16 sps:$4 sm:$0xff]  }
 0x118   : > { %v5567_v52 = vcombine.high %v497_v45, %v501_v47  ;;  %v6951_v35 = vld [vmem:[#allocation5 + $0x6ac] ss:$16 sps:$4 sm:$0xff]  }
 0x119   : > { %2538 = vmatmul.mubr.bf16.gmra.mrb[4].mxu0 %v5518_v51  ;;  %2990 = vmatmul.mubr.bf16.gmra.mrb[4].mxu1 %v5518_v51  ;;  %v6903_v51 = vld [vmem:[#allocation5 + $0x5ac] ss:$16 sps:$4 sm:$0xff]  }
 0x11a   : > { %2613 = vmatpush1.bf16.msra.mxu0 %v6832_v49  ;;  %3065 = vmatpush1.bf16.msra.mxu1 %v6835_v50  ;;  %v6895_v49 = vld [vmem:[#allocation5 + $0x588] ss:$16 sps:$4 sm:$0xff]   ;;  %v6900_v50 = vld [vmem:[#allocation5 + $0x5a4] ss:$16 sps:$4 sm:$0xff]  }
 0x11b   : > { %2614 = vmatprep.subr.bf16.mxu0 %v6840_v54  ;;  %3066 = vmatprep.subr.bf16.mxu1 %v6843_v55  ;;  %v6901_v54 = vld [vmem:[#allocation5 + $0x5a8] ss:$16 sps:$4 sm:$0xff]   ;;  %v6906_v55 = vld [vmem:[#allocation5 + $0x5c4] ss:$16 sps:$4 sm:$0xff]  }
 0x11c   : > { %2547 = vmatprep.mubr.bf16.mxu0 %v5527_v56  ;;  %2999 = vmatprep.mubr.bf16.mxu1 %v5527_v56  ;;  %v6909_v56 = vld [vmem:[#allocation5 + $0x5cc] ss:$16 sps:$4 sm:$0xff]  }
 0x11e   : > { %2615 = vmatpush1.bf16.msra.mxu0 %v6838_v57  ;;  %3067 = vmatpush1.bf16.msra.mxu1 %v6841_v58  ;;  %v6904_v57 = vld [vmem:[#allocation5 + $0x5c0] ss:$16 sps:$4 sm:$0xff]   ;;  %v6907_v58 = vld [vmem:[#allocation5 + $0x5c8] ss:$16 sps:$4 sm:$0xff]  }
 0x11f   : > { %2616 = vmatprep.subr.bf16.mxu0 %v6846_v59  ;;  %3068 = vmatprep.subr.bf16.mxu1 %v6849_v60  ;;  %v5566_v59 = vcombine.low %v497_v45, %v501_v47  ;;  %v442_v60 = vld [vmem:[%s7864_s18 + $0x10] sm:$0xff]  ;;  %v6963_v47 = vld [vmem:[#allocation5 + $0x6ec] ss:$16 sps:$4 sm:$0xff]  }
 0x120   : > { %v478_v45 = vld [vmem:[%s7864_s18 + $0x130] sm:$0xff] }
 0x121   : > { %2548 = vmatmul.mubr.bf16.gmra.mrb[8].mxu0 %v5526_v62  ;;  %3000 = vmatmul.mubr.bf16.gmra.mrb[8].mxu1 %v5526_v62  ;;  %v6912_v62 = vld [vmem:[#allocation5 + $0x5e4] ss:$16 sps:$4 sm:$0xff]  }
 0x122   : > { %2617 = vmatpush1.bf16.msra.mxu0 %v6844_v0  ;;  %3069 = vmatpush1.bf16.msra.mxu1 %v6847_v1  ;;  %v5513_v0 = vcombine.high %v442_v60, %v446_v61  ;;  %v6910_v1 = vld [vmem:[#allocation5 + $0x5e0] ss:$16 sps:$4 sm:$0xff]  }
 0x123   : > { %2618 = vmatprep.subr.bf16.mxu0 %v6852_v2  ;;  %3070 = vmatprep.subr.bf16.mxu1 %v6855_v3  ;;  %v6913_v2 = vld [vmem:[#allocation5 + $0x5e8] ss:$16 sps:$4 sm:$0xff]   ;;  %v6918_v3 = vld [vmem:[#allocation5 + $0x604] ss:$16 sps:$4 sm:$0xff]  }
 0x124   : > { %2557 = vmatprep.mubr.bf16.mxu0 %v5535_v4  ;;  %3009 = vmatprep.mubr.bf16.mxu1 %v5535_v4  ;;  %v6921_v4 = vld [vmem:[#allocation5 + $0x60c] ss:$16 sps:$4 sm:$0xff]  }
 0x126   : > { %2619 = vmatpush1.bf16.msra.mxu0 %v6850_v5  ;;  %3071 = vmatpush1.bf16.msra.mxu1 %v6853_v6  ;;  %v6916_v5 = vld [vmem:[#allocation5 + $0x600] ss:$16 sps:$4 sm:$0xff]   ;;  %v5512_v6 = vcombine.low %v442_v60, %v446_v61 }
 0x127   : > { %2620 = vmatprep.subr.bf16.mxu0 %v6858_v7  ;;  %3072 = vmatprep.subr.bf16.mxu1 %v6861_v8  ;;  %v6919_v7 = vld [vmem:[#allocation5 + $0x608] ss:$16 sps:$4 sm:$0xff]   ;;  %v450_v8 = vld [vmem:[%s7864_s18 + $0x50] sm:$0xff] }
 0x128   : > { %v6970_v60 = vld [vmem:[#allocation5 + $0x720] ss:$16 sps:$4 sm:$0xff]  }
 0x129   : > { %2558 = vmatmul.mubr.bf16.gmra.mrb[12].mxu0 %v5534_v10  ;;  %3010 = vmatmul.mubr.bf16.gmra.mrb[12].mxu1 %v5534_v10  ;;  %v6924_v10 = vld [vmem:[#allocation5 + $0x624] ss:$16 sps:$4 sm:$0xff]  }
 0x12a   : > { %2621 = vmatpush1.bf16.msra.mxu0 %v6856_v12  ;;  %3073 = vmatpush1.bf16.msra.mxu1 %v6859_v13  ;;  %v5521_v12 = vcombine.high %v450_v8, %v454_v9  ;;  %v6922_v13 = vld [vmem:[#allocation5 + $0x620] ss:$16 sps:$4 sm:$0xff]  }
 0x12b   : > { %2622 = vmatprep.subr.bf16.mxu0 %v6864_v14  ;;  %3074 = vmatprep.subr.bf16.mxu1 %v6867_v15  ;;  %v6925_v14 = vld [vmem:[#allocation5 + $0x628] ss:$16 sps:$4 sm:$0xff]   ;;  %v6930_v15 = vld [vmem:[#allocation5 + $0x644] ss:$16 sps:$4 sm:$0xff]  }
 0x12c   : > { %2567 = vmatprep.mubr.bf16.mxu0 %v5543_v16  ;;  %3019 = vmatprep.mubr.bf16.mxu1 %v5543_v16  ;;  %v6933_v16 = vld [vmem:[#allocation5 + $0x64c] ss:$16 sps:$4 sm:$0xff]  }
 0x12e   : > { %2623 = vmatpush1.bf16.msra.mxu0 %v6862_v17  ;;  %3075 = vmatpush1.bf16.msra.mxu1 %v6865_v18  ;;  %v6928_v17 = vld [vmem:[#allocation5 + $0x640] ss:$16 sps:$4 sm:$0xff]   ;;  %v6931_v18 = vld [vmem:[#allocation5 + $0x648] ss:$16 sps:$4 sm:$0xff]  }
 0x12f   : > { %2624 = vmatprep.subr.bf16.mxu0 %v6870_v19  ;;  %3076 = vmatprep.subr.bf16.mxu1 %v6873_v20  ;;  %v5520_v19 = vcombine.low %v450_v8, %v454_v9  ;;  %v458_v20 = vld [vmem:[%s7864_s18 + $0x90] sm:$0xff]  ;;  %v6985_v9 = vld [vmem:[#allocation5 + $0x768] ss:$16 sps:$4 sm:$0xff]  }
 0x130   : > { %v6982_v8 = vld [vmem:[#allocation5 + $0x760] ss:$16 sps:$4 sm:$0xff]  }
 0x131   : > { %2568 = vmatmul.mubr.bf16.gmra.mrb[16].mxu0 %v5542_v23  ;;  %3020 = vmatmul.mubr.bf16.gmra.mrb[16].mxu1 %v5542_v23  ;;  %v6939_v23 = vld [vmem:[#allocation5 + $0x66c] ss:$16 sps:$4 sm:$0xff]  }
 0x132   : > { %2625 = vmatpush1.bf16.msra.mxu0 %v6868_v21  ;;  %3077 = vmatpush1.bf16.msra.mxu1 %v6871_v22  ;;  %v462_v21 = vld [vmem:[%s7864_s18 + $0xb0] sm:$0xff] }
 0x133   : > { %2626 = vmatprep.subr.bf16.mxu0 %v6876_v26  ;;  %3078 = vmatprep.subr.bf16.mxu1 %v6879_v27  ;;  %v6936_v22 = vld [vmem:[#allocation5 + $0x664] ss:$16 sps:$4 sm:$0xff]   ;;  %v5529_v24 = vcombine.high %v458_v20, %v462_v21  ;;  %v6937_v26 = vld [vmem:[#allocation5 + $0x668] ss:$16 sps:$4 sm:$0xff]  }
 0x134   : > { %2577 = vmatprep.mubr.bf16.mxu0 %v5551_v28  ;;  %3029 = vmatprep.mubr.bf16.mxu1 %v5551_v28  ;;  %v6942_v27 = vld [vmem:[#allocation5 + $0x684] ss:$16 sps:$4 sm:$0xff]   ;;  %v6945_v28 = vld [vmem:[#allocation5 + $0x68c] ss:$16 sps:$4 sm:$0xff]  }
 0x136   : > { %2627 = vmatpush1.bf16.msra.mxu0 %v6874_v29  ;;  %3079 = vmatpush1.bf16.msra.mxu1 %v6877_v30  ;;  %v6940_v29 = vld [vmem:[#allocation5 + $0x680] ss:$16 sps:$4 sm:$0xff]   ;;  %v6943_v30 = vld [vmem:[#allocation5 + $0x688] ss:$16 sps:$4 sm:$0xff]  }
 0x137   : > { %2628 = vmatprep.subr.bf16.mxu0 %v6882_v31  ;;  %3080 = vmatprep.subr.bf16.mxu1 %v6885_v32  ;;  %v5528_v31 = vcombine.low %v458_v20, %v462_v21  ;;  %v466_v32 = vld [vmem:[%s7864_s18 + $0xd0] sm:$0xff]  ;;  %v6997_v21 = vld [vmem:[#allocation5 + $0x7a8] ss:$16 sps:$4 sm:$0xff]  }
 0x138   : > { %v6994_v20 = vld [vmem:[#allocation5 + $0x7a0] ss:$16 sps:$4 sm:$0xff]  }
 0x139   : > { %2578 = vmatmul.mubr.bf16.gmra.mrb[20].mxu0 %v5550_v34  ;;  %3030 = vmatmul.mubr.bf16.gmra.mrb[20].mxu1 %v5550_v34  ;;  %v6948_v34 = vld [vmem:[#allocation5 + $0x6a4] ss:$16 sps:$4 sm:$0xff]  }
 0x13a   : > { %2629 = vmatpush1.bf16.msra.mxu0 %v6880_v36  ;;  %3081 = vmatpush1.bf16.msra.mxu1 %v6883_v37  ;;  %v5537_v36 = vcombine.high %v466_v32, %v470_v33  ;;  %v6946_v37 = vld [vmem:[#allocation5 + $0x6a0] ss:$16 sps:$4 sm:$0xff]  }
 0x13b   : > { %2630 = vmatprep.subr.bf16.mxu0 %v6888_v38  ;;  %3082 = vmatprep.subr.bf16.mxu1 %v6891_v39  ;;  %v6949_v38 = vld [vmem:[#allocation5 + $0x6a8] ss:$16 sps:$4 sm:$0xff]   ;;  %v6954_v39 = vld [vmem:[#allocation5 + $0x6c4] ss:$16 sps:$4 sm:$0xff]  }
 0x13c   : > { %2587 = vmatprep.mubr.bf16.mxu0 %v5559_v40  ;;  %3039 = vmatprep.mubr.bf16.mxu1 %v5559_v40  ;;  %v6957_v40 = vld [vmem:[#allocation5 + $0x6cc] ss:$16 sps:$4 sm:$0xff]  }
 0x13e   : > { %2631 = vmatpush1.bf16.msra.mxu0 %v6886_v41  ;;  %3083 = vmatpush1.bf16.msra.mxu1 %v6889_v42  ;;  %v6952_v41 = vld [vmem:[#allocation5 + $0x6c0] ss:$16 sps:$4 sm:$0xff]   ;;  %v6955_v42 = vld [vmem:[#allocation5 + $0x6c8] ss:$16 sps:$4 sm:$0xff]  }
 0x13f   : > { %2632 = vmatprep.subr.bf16.mxu0 %v6894_v43  ;;  %3084 = vmatprep.subr.bf16.mxu1 %v6897_v44  ;;  %v5536_v43 = vcombine.low %v466_v32, %v470_v33  ;;  %v474_v44 = vld [vmem:[%s7864_s18 + $0x110] sm:$0xff]  ;;  %v7009_v33 = vld [vmem:[#allocation5 + $0x7e8] ss:$16 sps:$4 sm:$0xff]  }
 0x140   : > { %v7006_v32 = vld [vmem:[#allocation5 + $0x7e0] ss:$16 sps:$4 sm:$0xff]  }
 0x141   : > { %2588 = vmatmul.mubr.bf16.gmra.mrb[24].mxu0 %v5558_v46  ;;  %3040 = vmatmul.mubr.bf16.gmra.mrb[24].mxu1 %v5558_v46  ;;  %v6960_v46 = vld [vmem:[#allocation5 + $0x6e4] ss:$16 sps:$4 sm:$0xff]  }
 0x142   : > { %2633 = vmatpush1.bf16.msra.mxu0 %v6892_v48  ;;  %3085 = vmatpush1.bf16.msra.mxu1 %v6895_v49  ;;  %v5545_v48 = vcombine.high %v474_v44, %v478_v45  ;;  %v6958_v49 = vld [vmem:[#allocation5 + $0x6e0] ss:$16 sps:$4 sm:$0xff]  }
 0x143   : > { %2634 = vmatprep.subr.bf16.mxu0 %v6900_v50  ;;  %3086 = vmatprep.subr.bf16.mxu1 %v6903_v51  ;;  %v6961_v50 = vld [vmem:[#allocation5 + $0x6e8] ss:$16 sps:$4 sm:$0xff]   ;;  %v6966_v51 = vld [vmem:[#allocation5 + $0x704] ss:$16 sps:$4 sm:$0xff]  }
 0x144   : > { %2597 = vmatprep.mubr.bf16.mxu0 %v5567_v52  ;;  %3049 = vmatprep.mubr.bf16.mxu1 %v5567_v52  ;;  %v6969_v52 = vld [vmem:[#allocation5 + $0x70c] ss:$16 sps:$4 sm:$0xff]  }
 0x146   : > { %2635 = vmatpush1.bf16.msra.mxu0 %v6898_v53  ;;  %3087 = vmatpush1.bf16.msra.mxu1 %v6901_v54  ;;  %v6964_v53 = vld [vmem:[#allocation5 + $0x700] ss:$16 sps:$4 sm:$0xff]   ;;  %v6967_v54 = vld [vmem:[#allocation5 + $0x708] ss:$16 sps:$4 sm:$0xff]  }
 0x147   : > { %2636 = vmatprep.subr.bf16.mxu0 %v6906_v55  ;;  %3088 = vmatprep.subr.bf16.mxu1 %v6909_v56  ;;  %v5544_v55 = vcombine.low %v474_v44, %v478_v45  ;;  %v482_v56 = vld [vmem:[%s7864_s18 + $0x150] sm:$0xff]  ;;  %v459_v45 = vld [vmem:[%s7864_s18 + $0x98] sm:$0xff] }
 0x148   : > { %v7023_v44 = vld [vmem:[#allocation8 + $0x14] ss:$8 sps:$4 sm:$0xff]  }
 0x149   : > { %2598 = vmatmul.mubr.bf16.gmra.mrb[28].mxu0 %v5566_v59  ;;  %3050 = vmatmul.mubr.bf16.gmra.mrb[28].mxu1 %v5566_v59  ;;  %v6975_v59 = vld [vmem:[#allocation5 + $0x72c] ss:$16 sps:$4 sm:$0xff]  }
 0x14a   : > { %2637 = vmatpush1.bf16.msra.mxu0 %v6904_v57  ;;  %3089 = vmatpush1.bf16.msra.mxu1 %v6907_v58  ;;  %v486_v57 = vld [vmem:[%s7864_s18 + $0x170] sm:$0xff] }
 0x14b   : > { %2638 = vmatprep.subr.bf16.mxu0 %v6912_v62  ;;  %3090 = vmatprep.subr.bf16.mxu1 %v6915_v63  ;;  %v6972_v58 = vld [vmem:[#allocation5 + $0x724] ss:$16 sps:$4 sm:$0xff]   ;;  %v5553_v61 = vcombine.high %v482_v56, %v486_v57  ;;  %v6973_v62 = vld [vmem:[#allocation5 + $0x728] ss:$16 sps:$4 sm:$0xff]  }
 0x14c   : > { %2640 = vmatprep.mubr.bf16.mxu0 %v5513_v0  ;;  %3092 = vmatprep.mubr.bf16.mxu1 %v5513_v0  ;;  %v6978_v63 = vld [vmem:[#allocation5 + $0x744] ss:$16 sps:$4 sm:$0xff]   ;;  %v6981_v0 = vld [vmem:[#allocation5 + $0x74c] ss:$16 sps:$4 sm:$0xff]  }
 0x14e   : > { %2639 = vmatpush1.bf16.msra.mxu0 %v6910_v1  ;;  %3091 = vmatpush1.bf16.msra.mxu1 %v6913_v2  ;;  %v490_v1 = vld [vmem:[%s7864_s18 + $0x190] sm:$0xff] }
 0x14f   : > { %2721 = vmatprep.subr.bf16.mxu0 %v6918_v3  ;;  %3173 = vmatprep.subr.bf16.mxu1 %v6921_v4  ;;  %v494_v2 = vld [vmem:[%s7864_s18 + $0x1b0] sm:$0xff]  ;;  %v6979_v4 = vld [vmem:[#allocation5 + $0x748] ss:$16 sps:$4 sm:$0xff]  }
 0x150   : > { %v6976_v3 = vld [vmem:[#allocation5 + $0x740] ss:$16 sps:$4 sm:$0xff]  }
 0x151   : > { %2641 = vmatmul.mubr.bf16.vlgmr.msra.gmra.mrb[0].mxu0 %v5512_v6  ;;  %3093 = vmatmul.mubr.bf16.vlgmr.msra.gmra.mrb[0].mxu1 %v5512_v6  ;;  %v6984_v6 = vld [vmem:[#allocation5 + $0x764] ss:$16 sps:$4 sm:$0xff]  }
 0x152   : > { %2722 = vmatpush1.bf16.msra.mxu0 %v6916_v5  ;;  %3174 = vmatpush1.bf16.msra.mxu1 %v6919_v7  ;;  %v5552_v5 = vcombine.low %v482_v56, %v486_v57  ;;  %v6987_v7 = vld [vmem:[#allocation5 + $0x76c] ss:$16 sps:$4 sm:$0xff]  }
 0x153   : > { %2723 = vmatprep.subr.bf16.mxu0 %v6924_v10  ;;  %3175 = vmatprep.subr.bf16.mxu1 %v6927_v11  ;;  %v5561_v10 = vcombine.high %v490_v1, %v494_v2  ;;  %v6990_v11 = vld [vmem:[#allocation5 + $0x784] ss:$16 sps:$4 sm:$0xff]   ;;  %v467_v57 = vld [vmem:[%s7864_s18 + $0xd8] sm:$0xff] }
 0x154   : > { %2650 = vmatprep.mubr.bf16.mxu0 %v5521_v12  ;;  %3102 = vmatprep.mubr.bf16.mxu1 %v5521_v12  ;;  %v6993_v12 = vld [vmem:[#allocation5 + $0x78c] ss:$16 sps:$4 sm:$0xff]  }
 0x155   : > { %v7035_v56 = vld [vmem:[#allocation8 + $0x34] ss:$8 sps:$4 sm:$0xff]  }
 0x156   : > { %2724 = vmatpush1.bf16.msra.mxu0 %v6922_v13  ;;  %3176 = vmatpush1.bf16.msra.mxu1 %v6925_v14  ;;  %v498_v13 = vld [vmem:[%s7864_s18 + $0x1d0] sm:$0xff] }
 0x157   : > { %2725 = vmatprep.subr.bf16.mxu0 %v6930_v15  ;;  %3177 = vmatprep.subr.bf16.mxu1 %v6933_v16  ;;  %v502_v14 = vld [vmem:[%s7864_s18 + $0x1f0] sm:$0xff]  ;;  %v6991_v16 = vld [vmem:[#allocation5 + $0x788] ss:$16 sps:$4 sm:$0xff]  }
 0x158   : > { %v6988_v15 = vld [vmem:[#allocation5 + $0x780] ss:$16 sps:$4 sm:$0xff]  }
 0x159   : > { %2651 = vmatmul.mubr.bf16.gmra.mrb[4].mxu0 %v5520_v19  ;;  %3103 = vmatmul.mubr.bf16.gmra.mrb[4].mxu1 %v5520_v19  ;;  %v6999_v19 = vld [vmem:[#allocation5 + $0x7ac] ss:$16 sps:$4 sm:$0xff]  }
 0x15a   : > { %2726 = vmatpush1.bf16.msra.mxu0 %v6928_v17  ;;  %3178 = vmatpush1.bf16.msra.mxu1 %v6931_v18  ;;  %v5560_v17 = vcombine.low %v490_v1, %v494_v2  ;;  %v6996_v18 = vld [vmem:[#allocation5 + $0x7a4] ss:$16 sps:$4 sm:$0xff]   ;;  %v7036_v1 = vld [vmem:[#allocation7 + $0x40] ss:$8 sps:$4 sm:$0xff]  }
 0x15b   : > { %2727 = vmatprep.subr.bf16.mxu0 %v6936_v22  ;;  %3179 = vmatprep.subr.bf16.mxu1 %v6939_v23  ;;  %v5569_v22 = vcombine.high %v498_v13, %v502_v14  ;;  %v7002_v23 = vld [vmem:[#allocation5 + $0x7c4] ss:$16 sps:$4 sm:$0xff]   ;;  %v7039_v2 = vld [vmem:[#allocation8 + $0x40] ss:$8 sps:$4 sm:$0xff]  }
 0x15c   : > { %2660 = vmatprep.mubr.bf16.mxu0 %v5529_v24  ;;  %3112 = vmatprep.mubr.bf16.mxu1 %v5529_v24  ;;  %v7005_v24 = vld [vmem:[#allocation5 + $0x7cc] ss:$16 sps:$4 sm:$0xff]  }
 0x15e   : > { %2728 = vmatpush1.bf16.msra.mxu0 %v6934_v25  ;;  %3180 = vmatpush1.bf16.msra.mxu1 %v6937_v26  ;;  %v443_v25 = vld [vmem:[%s7864_s18 + $0x18] sm:$0xff] }
 0x15f   : > { %2729 = vmatprep.subr.bf16.mxu0 %v6942_v27  ;;  %3181 = vmatprep.subr.bf16.mxu1 %v6945_v28  ;;  %v447_v26 = vld [vmem:[%s7864_s18 + $0x38] sm:$0xff]  ;;  %v7000_v27 = vld [vmem:[#allocation5 + $0x7c0] ss:$16 sps:$4 sm:$0xff]  }
 0x160   : > { %v7003_v28 = vld [vmem:[#allocation5 + $0x7c8] ss:$16 sps:$4 sm:$0xff]  }
 0x161   : > { %2661 = vmatmul.mubr.bf16.gmra.mrb[8].mxu0 %v5528_v31  ;;  %3113 = vmatmul.mubr.bf16.gmra.mrb[8].mxu1 %v5528_v31  ;;  %v7011_v31 = vld [vmem:[#allocation5 + $0x7ec] ss:$16 sps:$4 sm:$0xff]  }
 0x162   : > { %2730 = vmatpush1.bf16.msra.mxu0 %v6940_v29  ;;  %3182 = vmatpush1.bf16.msra.mxu1 %v6943_v30  ;;  %v5568_v29 = vcombine.low %v498_v13, %v502_v14  ;;  %v7008_v30 = vld [vmem:[#allocation5 + $0x7e4] ss:$16 sps:$4 sm:$0xff]   ;;  %v7048_v13 = vld [vmem:[#allocation7 + $0x60] ss:$8 sps:$4 sm:$0xff]  }
 0x163   : > { %2731 = vmatprep.subr.bf16.mxu0 %v6948_v34  ;;  %3183 = vmatprep.subr.bf16.mxu1 %v6951_v35  ;;  %v5515_v34 = vcombine.high %v443_v25, %v447_v26  ;;  %v451_v35 = vld [vmem:[%s7864_s18 + $0x58] sm:$0xff]  ;;  %v7051_v14 = vld [vmem:[#allocation8 + $0x60] ss:$8 sps:$4 sm:$0xff]  }
 0x164   : > { %2670 = vmatprep.mubr.bf16.mxu0 %v5537_v36  ;;  %3122 = vmatprep.mubr.bf16.mxu1 %v5537_v36  ;;  %v455_v36 = vld [vmem:[%s7864_s18 + $0x78] sm:$0xff] }
 0x166   : > { %2732 = vmatpush1.bf16.msra.mxu0 %v6946_v37  ;;  %3184 = vmatpush1.bf16.msra.mxu1 %v6949_v38  ;;  %v7014_v37 = vld [vmem:[#allocation7 + $0x4] ss:$8 sps:$4 sm:$0xff]  }
 0x167   : > { %2733 = vmatprep.subr.bf16.mxu0 %v6954_v39  ;;  %3185 = vmatprep.subr.bf16.mxu1 %v6957_v40  ;;  %v7017_v38 = vld [vmem:[#allocation8 + $0x4] ss:$8 sps:$4 sm:$0xff]   ;;  %v5514_v39 = vcombine.low %v443_v25, %v447_v26  ;;  %v7012_v40 = vld [vmem:[#allocation7] ss:$8 sps:$4 sm:$0xff]  }
 0x168   : > { %v7060_v25 = vld [vmem:[#allocation7 + $0x80] ss:$8 sps:$4 sm:$0xff]  }
 0x169   : > { %2671 = vmatmul.mubr.bf16.gmra.mrb[12].mxu0 %v5536_v43  ;;  %3123 = vmatmul.mubr.bf16.gmra.mrb[12].mxu1 %v5536_v43  ;;  %v7020_v43 = vld [vmem:[#allocation7 + $0x14] ss:$8 sps:$4 sm:$0xff]   ;;  %v7063_v26 = vld [vmem:[#allocation8 + $0x80] ss:$8 sps:$4 sm:$0xff]  }
 0x16a   : > { %2734 = vmatpush1.bf16.msra.mxu0 %v6952_v41  ;;  %3186 = vmatpush1.bf16.msra.mxu1 %v6955_v42  ;;  %v7015_v41 = vld [vmem:[#allocation8] ss:$8 sps:$4 sm:$0xff]   ;;  %v5523_v42 = vcombine.high %v451_v35, %v455_v36 }
 0x16b   : > { %2735 = vmatprep.subr.bf16.mxu0 %v6960_v46  ;;  %3187 = vmatprep.subr.bf16.mxu1 %v6963_v47  ;;  %v463_v46 = vld [vmem:[%s7864_s18 + $0xb8] sm:$0xff] }
 0x16c   : > { %2680 = vmatprep.mubr.bf16.mxu0 %v5545_v48  ;;  %3132 = vmatprep.mubr.bf16.mxu1 %v5545_v48  ;;  %v7018_v47 = vld [vmem:[#allocation7 + $0x10] ss:$8 sps:$4 sm:$0xff]  }
 0x16d   : > { %v7021_v48 = vld [vmem:[#allocation8 + $0x10] ss:$8 sps:$4 sm:$0xff]  }
 0x16e   : > { %2736 = vmatpush1.bf16.msra.mxu0 %v6958_v49  ;;  %3188 = vmatpush1.bf16.msra.mxu1 %v6961_v50  ;;  %v7026_v49 = vld [vmem:[#allocation7 + $0x24] ss:$8 sps:$4 sm:$0xff]  }
 0x16f   : > { %2737 = vmatprep.subr.bf16.mxu0 %v6966_v51  ;;  %3189 = vmatprep.subr.bf16.mxu1 %v6969_v52  ;;  %v7029_v50 = vld [vmem:[#allocation8 + $0x24] ss:$8 sps:$4 sm:$0xff]   ;;  %v5522_v51 = vcombine.low %v451_v35, %v455_v36  ;;  %v5531_v52 = vcombine.high %v459_v45, %v463_v46 }
 0x171   : > { %2681 = vmatmul.mubr.bf16.gmra.mrb[16].mxu0 %v5544_v55  ;;  %3133 = vmatmul.mubr.bf16.gmra.mrb[16].mxu1 %v5544_v55  ;;  %v7032_v55 = vld [vmem:[#allocation7 + $0x34] ss:$8 sps:$4 sm:$0xff]  }
 0x172   : > { %2738 = vmatpush1.bf16.msra.mxu0 %v6964_v53  ;;  %3190 = vmatpush1.bf16.msra.mxu1 %v6967_v54  ;;  %v7024_v53 = vld [vmem:[#allocation7 + $0x20] ss:$8 sps:$4 sm:$0xff]  }
 0x173   : > { %2739 = vmatprep.subr.bf16.mxu0 %v6972_v58  ;;  %3191 = vmatprep.subr.bf16.mxu1 %v6975_v59  ;;  %v7027_v54 = vld [vmem:[#allocation8 + $0x20] ss:$8 sps:$4 sm:$0xff]   ;;  %v471_v58 = vld [vmem:[%s7864_s18 + $0xf8] sm:$0xff] }
 0x174   : > { %2690 = vmatprep.mubr.bf16.mxu0 %v5553_v61  ;;  %3142 = vmatprep.mubr.bf16.mxu1 %v5553_v61  ;;  %v7030_v59 = vld [vmem:[#allocation7 + $0x30] ss:$8 sps:$4 sm:$0xff]   ;;  %v7038_v61 = vld [vmem:[#allocation7 + $0x44] ss:$8 sps:$4 sm:$0xff]  }
 0x176   : > { %2740 = vmatpush1.bf16.msra.mxu0 %v6970_v60  ;;  %3192 = vmatpush1.bf16.msra.mxu1 %v6973_v62  ;;  %v7033_v60 = vld [vmem:[#allocation8 + $0x30] ss:$8 sps:$4 sm:$0xff]   ;;  %v7041_v62 = vld [vmem:[#allocation8 + $0x44] ss:$8 sps:$4 sm:$0xff]  }
 0x177   : > { %2741 = vmatprep.subr.bf16.mxu0 %v6978_v63  ;;  %3193 = vmatprep.subr.bf16.mxu1 %v6981_v0  ;;  %v5530_v63 = vcombine.low %v459_v45, %v463_v46  ;;  %v5539_v0 = vcombine.high %v467_v57, %v471_v58  ;;  %v7086_v45 = vld [vmem:[#allocation7 + $0xc4] ss:$8 sps:$4 sm:$0xff]  }
 0x178   : > { %v7089_v46 = vld [vmem:[#allocation8 + $0xc4] ss:$8 sps:$4 sm:$0xff]  }
 0x179   : > { %2691 = vmatmul.mubr.bf16.gmra.mrb[20].mxu0 %v5552_v5  ;;  %3143 = vmatmul.mubr.bf16.gmra.mrb[20].mxu1 %v5552_v5  ;;  %v475_v5 = vld [vmem:[%s7864_s18 + $0x118] sm:$0xff] }
 0x17a   : > { %2742 = vmatpush1.bf16.msra.mxu0 %v6976_v3  ;;  %3194 = vmatpush1.bf16.msra.mxu1 %v6979_v4  ;;  %v7044_v3 = vld [vmem:[#allocation7 + $0x54] ss:$8 sps:$4 sm:$0xff]  }
 0x17b   : > { %2743 = vmatprep.subr.bf16.mxu0 %v6984_v6  ;;  %3195 = vmatprep.subr.bf16.mxu1 %v6987_v7  ;;  %v7047_v4 = vld [vmem:[#allocation8 + $0x54] ss:$8 sps:$4 sm:$0xff]   ;;  %v7042_v7 = vld [vmem:[#allocation7 + $0x50] ss:$8 sps:$4 sm:$0xff]  }
 0x17c   : > { %2700 = vmatprep.mubr.bf16.mxu0 %v5561_v10  ;;  %3152 = vmatprep.mubr.bf16.mxu1 %v5561_v10  ;;  %v479_v6 = vld [vmem:[%s7864_s18 + $0x138] sm:$0xff]  ;;  %v7053_v10 = vld [vmem:[#allocation8 + $0x64] ss:$8 sps:$4 sm:$0xff]  }
 0x17e   : > { %2744 = vmatpush1.bf16.msra.mxu0 %v6982_v8  ;;  %3196 = vmatpush1.bf16.msra.mxu1 %v6985_v9  ;;  %v7045_v8 = vld [vmem:[#allocation8 + $0x50] ss:$8 sps:$4 sm:$0xff]   ;;  %v7050_v9 = vld [vmem:[#allocation7 + $0x64] ss:$8 sps:$4 sm:$0xff]  }
 0x17f   : > { %2745 = vmatprep.subr.bf16.mxu0 %v6990_v11  ;;  %3197 = vmatprep.subr.bf16.mxu1 %v6993_v12  ;;  %v5538_v11 = vcombine.low %v467_v57, %v471_v58  ;;  %v5547_v12 = vcombine.high %v475_v5, %v479_v6  ;;  %v7101_v57 = vld [vmem:[#allocation8 + $0xe4] ss:$8 sps:$4 sm:$0xff]   ;;  %v7096_v58 = vld [vmem:[#allocation7 + $0xe0] ss:$8 sps:$4 sm:$0xff]  }
 0x181   : > { %2701 = vmatmul.mubr.bf16.gmra.mrb[24].mxu0 %v5560_v17  ;;  %3153 = vmatmul.mubr.bf16.gmra.mrb[24].mxu1 %v5560_v17  ;;  %v483_v17 = vld [vmem:[%s7864_s18 + $0x158] sm:$0xff] }
 0x182   : > { %2746 = vmatpush1.bf16.msra.mxu0 %v6988_v15  ;;  %3198 = vmatpush1.bf16.msra.mxu1 %v6991_v16  ;;  %v7056_v15 = vld [vmem:[#allocation7 + $0x74] ss:$8 sps:$4 sm:$0xff]  }
 0x183   : > { %2747 = vmatprep.subr.bf16.mxu0 %v6996_v18  ;;  %3199 = vmatprep.subr.bf16.mxu1 %v6999_v19  ;;  %v7059_v16 = vld [vmem:[#allocation8 + $0x74] ss:$8 sps:$4 sm:$0xff]   ;;  %v7054_v19 = vld [vmem:[#allocation7 + $0x70] ss:$8 sps:$4 sm:$0xff]  }
 0x184   : > { %2710 = vmatprep.mubr.bf16.mxu0 %v5569_v22  ;;  %3162 = vmatprep.mubr.bf16.mxu1 %v5569_v22  ;;  %v487_v18 = vld [vmem:[%s7864_s18 + $0x178] sm:$0xff]  ;;  %v7065_v22 = vld [vmem:[#allocation8 + $0x84] ss:$8 sps:$4 sm:$0xff]  }
 0x185   : > { %v5554_v35 = vcombine.low %v483_v17, %v487_v18 }
 0x186   : > { %2748 = vmatpush1.bf16.msra.mxu0 %v6994_v20  ;;  %3200 = vmatpush1.bf16.msra.mxu1 %v6997_v21  ;;  %v7057_v20 = vld [vmem:[#allocation8 + $0x70] ss:$8 sps:$4 sm:$0xff]   ;;  %v7062_v21 = vld [vmem:[#allocation7 + $0x84] ss:$8 sps:$4 sm:$0xff]  }
 0x187   : > { %2749 = vmatprep.subr.bf16.mxu0 %v7002_v23  ;;  %3201 = vmatprep.subr.bf16.mxu1 %v7005_v24  ;;  %v5546_v23 = vcombine.low %v475_v5, %v479_v6  ;;  %v5555_v24 = vcombine.high %v483_v17, %v487_v18  ;;  %v760_v6 = vld [vmem:[%s8473_s2] sm:$0xf] }
 0x189   : > { %2711 = vmatmul.mubr.bf16.gmra.mrb[28].mxu0 %v5568_v29  ;;  %3163 = vmatmul.mubr.bf16.gmra.mrb[28].mxu1 %v5568_v29  ;;  %v491_v29 = vld [vmem:[%s7864_s18 + $0x198] sm:$0xff] }
 0x18a   : > { %2750 = vmatpush1.bf16.msra.mxu0 %v7000_v27  ;;  %3202 = vmatpush1.bf16.msra.mxu1 %v7003_v28  ;;  %v7068_v27 = vld [vmem:[#allocation7 + $0x94] ss:$8 sps:$4 sm:$0xff]  }
 0x18b   : > { %2751 = vmatprep.subr.bf16.mxu0 %v7008_v30  ;;  %3203 = vmatprep.subr.bf16.mxu1 %v7011_v31  ;;  %v7071_v28 = vld [vmem:[#allocation8 + $0x94] ss:$8 sps:$4 sm:$0xff]   ;;  %v7066_v31 = vld [vmem:[#allocation7 + $0x90] ss:$8 sps:$4 sm:$0xff]  }
 0x18c   : > { %2753 = vmatprep.mubr.bf16.mxu0 %v5515_v34  ;;  %3205 = vmatprep.mubr.bf16.mxu1 %v5515_v34  ;;  %v495_v30 = vld [vmem:[%s7864_s18 + $0x1b8] sm:$0xff]  ;;  %v7077_v34 = vld [vmem:[#allocation8 + $0xa4] ss:$8 sps:$4 sm:$0xff]  }
 0x18d   : > { %v5563_v36 = vcombine.high %v491_v29, %v495_v30 }
 0x18e   : > { %2752 = vmatpush1.bf16.msra.mxu0 %v7006_v32  ;;  %3204 = vmatpush1.bf16.msra.mxu1 %v7009_v33  ;;  %v7069_v32 = vld [vmem:[#allocation8 + $0x90] ss:$8 sps:$4 sm:$0xff]   ;;  %v7074_v33 = vld [vmem:[#allocation7 + $0xa4] ss:$8 sps:$4 sm:$0xff]  }
 0x18f   : > { %3970 = vmatprep.subr.bf16.mxu0 %v7014_v37  ;;  %4784 = vmatprep.subr.bf16.mxu1 %v7017_v38  ;;  %v7072_v37 = vld [vmem:[#allocation7 + $0xa0] ss:$8 sps:$4 sm:$0xff]  }
 0x190   : > { %v7075_v38 = vld [vmem:[#allocation8 + $0xa0] ss:$8 sps:$4 sm:$0xff]  }
 0x191   : > { %2754 = vmatmul.mubr.bf16.vlgmr.msra.gmra.mrb[0].mxu0 %v5514_v39  ;;  %3206 = vmatmul.mubr.bf16.vlgmr.msra.gmra.mrb[0].mxu1 %v5514_v39  ;;  %v7080_v39 = vld [vmem:[#allocation7 + $0xb4] ss:$8 sps:$4 sm:$0xff]  }
 0x192   : > { %2763 = vmatprep.mubr.bf16.mxu0 %v5523_v42  ;;  %3215 = vmatprep.mubr.bf16.mxu1 %v5523_v42  ;;  %v503_v42 = vld [vmem:[%s7864_s18 + $0x1f8] sm:$0xff] }
 0x193   : > { %3971 = vmatpush1.bf16.msra.mxu0 %v7012_v40  ;;  %4785 = vmatpush1.bf16.msra.mxu1 %v7015_v41  ;;  %v7083_v40 = vld [vmem:[#allocation8 + $0xb4] ss:$8 sps:$4 sm:$0xff]  }
 0x194   : > { %3972 = vmatprep.subr.bf16.mxu0 %v7020_v43  ;;  %4786 = vmatprep.subr.bf16.mxu1 %v7023_v44  ;;  %v499_v41 = vld [vmem:[%s7864_s18 + $0x1d8] sm:$0xff] }
 0x195   : > { %v7078_v43 = vld [vmem:[#allocation7 + $0xb0] ss:$8 sps:$4 sm:$0xff]  }
 0x196   : > { %v7081_v44 = vld [vmem:[#allocation8 + $0xb0] ss:$8 sps:$4 sm:$0xff]  }
 0x197   : > { %3973 = vmatpush1.bf16.msra.mxu0 %v7018_v47  ;;  %4787 = vmatpush1.bf16.msra.mxu1 %v7021_v48  ;;  %v5562_v47 = vcombine.low %v491_v29, %v495_v30  ;;  %v5571_v48 = vcombine.high %v499_v41, %v503_v42 }
 0x198   : > { %3974 = vmatprep.subr.bf16.mxu0 %v7026_v49  ;;  %4788 = vmatprep.subr.bf16.mxu1 %v7029_v50  ;;  %v7084_v49 = vld [vmem:[#allocation7 + $0xc0] ss:$8 sps:$4 sm:$0xff]  }
 0x199   : > { %2764 = vmatmul.mubr.bf16.gmra.mrb[4].mxu0 %v5522_v51  ;;  %3216 = vmatmul.mubr.bf16.gmra.mrb[4].mxu1 %v5522_v51  ;;  %v7087_v50 = vld [vmem:[#allocation8 + $0xc0] ss:$8 sps:$4 sm:$0xff]   ;;  %v7092_v51 = vld [vmem:[#allocation7 + $0xd4] ss:$8 sps:$4 sm:$0xff]  }
 0x19a   : > { %2773 = vmatprep.mubr.bf16.mxu0 %v5531_v52  ;;  %3225 = vmatprep.mubr.bf16.mxu1 %v5531_v52  ;;  %v7095_v52 = vld [vmem:[#allocation8 + $0xd4] ss:$8 sps:$4 sm:$0xff]  }
 0x19b   : > { %3975 = vmatpush1.bf16.msra.mxu0 %v7024_v53  ;;  %4789 = vmatpush1.bf16.msra.mxu1 %v7027_v54  ;;  %v7090_v53 = vld [vmem:[#allocation7 + $0xd0] ss:$8 sps:$4 sm:$0xff]  }
 0x19c   : > { %3976 = vmatprep.subr.bf16.mxu0 %v7032_v55  ;;  %4790 = vmatprep.subr.bf16.mxu1 %v7035_v56  ;;  %v7093_v54 = vld [vmem:[#allocation8 + $0xd0] ss:$8 sps:$4 sm:$0xff]   ;;  %v5570_v55 = vcombine.low %v499_v41, %v503_v42  ;;  %v7098_v56 = vld [vmem:[#allocation7 + $0xe4] ss:$8 sps:$4 sm:$0xff]  }
 0x19f   : > { %3977 = vmatpush1.bf16.msra.mxu0 %v7030_v59  ;;  %4791 = vmatpush1.bf16.msra.mxu1 %v7033_v60  ;;  %v7099_v59 = vld [vmem:[#allocation8 + $0xe0] ss:$8 sps:$4 sm:$0xff]   ;;  %v7104_v60 = vld [vmem:[#allocation7 + $0xf4] ss:$8 sps:$4 sm:$0xff]  }
 0x1a0   : > { %3978 = vmatprep.subr.bf16.mxu0 %v7038_v61  ;;  %4792 = vmatprep.subr.bf16.mxu1 %v7041_v62  ;;  %v7107_v61 = vld [vmem:[#allocation8 + $0xf4] ss:$8 sps:$4 sm:$0xff]   ;;  %v7102_v62 = vld [vmem:[#allocation7 + $0xf0] ss:$8 sps:$4 sm:$0xff]  }
 0x1a1   : > { %2774 = vmatmul.mubr.bf16.gmra.mrb[8].mxu0 %v5530_v63  ;;  %3226 = vmatmul.mubr.bf16.gmra.mrb[8].mxu1 %v5530_v63  ;;  %v7105_v63 = vld [vmem:[#allocation8 + $0xf0] ss:$8 sps:$4 sm:$0xff]  }
 0x1a2   : > { %2783 = vmatprep.mubr.bf16.mxu0 %v5539_v0  ;;  %3235 = vmatprep.mubr.bf16.mxu1 %v5539_v0  ;;  %v7110_v0 = vld [vmem:[#allocation7 + $0x104] ss:$8 sps:$4 sm:$0xff]  }
 0x1a3   : > { %3979 = vmatpush1.bf16.msra.mxu0 %v7036_v1  ;;  %4793 = vmatpush1.bf16.msra.mxu1 %v7039_v2  ;;  %v7113_v1 = vld [vmem:[#allocation8 + $0x104] ss:$8 sps:$4 sm:$0xff]   ;;  %v762_v2 = vlaneseq }
 0x1a4   : > { %3980 = vmatprep.subr.bf16.mxu0 %v7044_v3  ;;  %4794 = vmatprep.subr.bf16.mxu1 %v7047_v4 }
 0x1a5   : > { %v763_v3 = vshrl.u32 %v762_v2, 7 }
 0x1a7   : > { %3981 = vmatpush1.bf16.msra.mxu0 %v7042_v7  ;;  %4795 = vmatpush1.bf16.msra.mxu1 %v7045_v8  ;;  %v7942_v4 = vsub.s32 0, %v763_v3  ;;  %v772_v5 = vsub.s32 2, %v763_v3  ;;  %v7947_v7 = vsub.s32 1, %v763_v3  ;;  %v776_v8 = vsub.s32 3, %v763_v3 }
 0x1a8   : > { %3982 = vmatprep.subr.bf16.mxu0 %v7050_v9  ;;  %4796 = vmatprep.subr.bf16.mxu1 %v7053_v10 }
 0x1a9   : > { %2784 = vmatmul.mubr.bf16.gmra.mrb[12].mxu0 %v5538_v11  ;;  %3236 = vmatmul.mubr.bf16.gmra.mrb[12].mxu1 %v5538_v11  ;;  %v7950_v9 = vrot.slane %v760_v6, %v7942_v4  ;;  %v7952_v10 = vrot.slane %v760_v6, %v772_v5  ;;  %v7955_v11 = vrot.slane %v760_v6, %v7947_v7 }
 0x1aa   : > { %2793 = vmatprep.mubr.bf16.mxu0 %v5547_v12  ;;  %3245 = vmatprep.mubr.bf16.mxu1 %v5547_v12  ;;  %v7957_v12 = vrot.slane %v760_v6, %v776_v8  ;;  %v7114_v6 = vld [vmem:[#allocation7 + $0x110] ss:$8 sps:$4 sm:$0xff]  }
 0x1ab   : > { %3983 = vmatpush1.bf16.msra.mxu0 %v7048_v13  ;;  %4797 = vmatpush1.bf16.msra.mxu1 %v7051_v14 }
 0x1ac   : > { %3984 = vmatprep.subr.bf16.mxu0 %v7056_v15  ;;  %4798 = vmatprep.subr.bf16.mxu1 %v7059_v16 }
 0x1af   : > { %3985 = vmatpush1.bf16.msra.mxu0 %v7054_v19  ;;  %4799 = vmatpush1.bf16.msra.mxu1 %v7057_v20 }
 0x1b0   : > { %3986 = vmatprep.subr.bf16.mxu0 %v7062_v21  ;;  %4800 = vmatprep.subr.bf16.mxu1 %v7065_v22 }
 0x1b1   : > { %2794 = vmatmul.mubr.bf16.gmra.mrb[16].mxu0 %v5546_v23  ;;  %3246 = vmatmul.mubr.bf16.gmra.mrb[16].mxu1 %v5546_v23 }
 0x1b2   : > { %2803 = vmatprep.mubr.bf16.mxu0 %v5555_v24  ;;  %3255 = vmatprep.mubr.bf16.mxu1 %v5555_v24 }
 0x1b3   : > { %3987 = vmatpush1.bf16.msra.mxu0 %v7060_v25  ;;  %4801 = vmatpush1.bf16.msra.mxu1 %v7063_v26 }
 0x1b4   : > { %3988 = vmatprep.subr.bf16.mxu0 %v7068_v27  ;;  %4802 = vmatprep.subr.bf16.mxu1 %v7071_v28 }
 0x1b7   : > { %3989 = vmatpush1.bf16.msra.mxu0 %v7066_v31  ;;  %4803 = vmatpush1.bf16.msra.mxu1 %v7069_v32 }
 0x1b8   : > { %3990 = vmatprep.subr.bf16.mxu0 %v7074_v33  ;;  %4804 = vmatprep.subr.bf16.mxu1 %v7077_v34 }
 0x1b9   : > { %2804 = vmatmul.mubr.bf16.gmra.mrb[20].mxu0 %v5554_v35  ;;  %3256 = vmatmul.mubr.bf16.gmra.mrb[20].mxu1 %v5554_v35 }
 0x1ba   : > { %2813 = vmatprep.mubr.bf16.mxu0 %v5563_v36  ;;  %3265 = vmatprep.mubr.bf16.mxu1 %v5563_v36 }
 0x1bb   : > { %3991 = vmatpush1.bf16.msra.mxu0 %v7072_v37  ;;  %4805 = vmatpush1.bf16.msra.mxu1 %v7075_v38 }
 0x1bc   : > { %3992 = vmatprep.subr.bf16.mxu0 %v7080_v39  ;;  %4806 = vmatprep.subr.bf16.mxu1 %v7083_v40 }
 0x1bf   : > { %3993 = vmatpush1.bf16.msra.mxu0 %v7078_v43  ;;  %4807 = vmatpush1.bf16.msra.mxu1 %v7081_v44 }
 0x1c0   : > { %3994 = vmatprep.subr.bf16.mxu0 %v7086_v45  ;;  %4808 = vmatprep.subr.bf16.mxu1 %v7089_v46 }
 0x1c1   : > { %2814 = vmatmul.mubr.bf16.gmra.mrb[24].mxu0 %v5562_v47  ;;  %3266 = vmatmul.mubr.bf16.gmra.mrb[24].mxu1 %v5562_v47  ;;  %v7108_v47 = vld [vmem:[#allocation7 + $0x100] ss:$8 sps:$4 sm:$0xff]  }
 0x1c2   : > { %2823 = vmatprep.mubr.bf16.mxu0 %v5571_v48  ;;  %3275 = vmatprep.mubr.bf16.mxu1 %v5571_v48  ;;  %v7111_v48 = vld [vmem:[#allocation8 + $0x100] ss:$8 sps:$4 sm:$0xff]  }
 0x1c3   : > { %3995 = vmatpush1.bf16.msra.mxu0 %v7084_v49  ;;  %4809 = vmatpush1.bf16.msra.mxu1 %v7087_v50 }
 0x1c4   : > { %3996 = vmatprep.subr.bf16.mxu0 %v7092_v51  ;;  %4810 = vmatprep.subr.bf16.mxu1 %v7095_v52 }
 0x1c7   : > { %3997 = vmatpush1.bf16.msra.mxu0 %v7090_v53  ;;  %4811 = vmatpush1.bf16.msra.mxu1 %v7093_v54  ;;  %v7116_v53 = vld [vmem:[#allocation7 + $0x114] ss:$8 sps:$4 sm:$0xff]  }
 0x1c8   : > { %3998 = vmatprep.subr.bf16.mxu0 %v7098_v56  ;;  %4812 = vmatprep.subr.bf16.mxu1 %v7101_v57  ;;  %v7119_v54 = vld [vmem:[#allocation8 + $0x114] ss:$8 sps:$4 sm:$0xff]  }
 0x1c9   : > { %2824 = vmatmul.mubr.bf16.gmra.mrb[28].mxu0 %v5570_v55  ;;  %3276 = vmatmul.mubr.bf16.gmra.mrb[28].mxu1 %v5570_v55 }
 0x1cb   : > { %3999 = vmatpush1.bf16.msra.mxu0 %v7096_v58  ;;  %4813 = vmatpush1.bf16.msra.mxu1 %v7099_v59 }
 0x1cc   : > { %4000 = vmatprep.subr.bf16.mxu0 %v7104_v60  ;;  %4814 = vmatprep.subr.bf16.mxu1 %v7107_v61 }
 0x1cf   : > { %4001 = vmatpush1.bf16.msra.mxu0 %v7102_v62  ;;  %4815 = vmatpush1.bf16.msra.mxu1 %v7105_v63 }
 0x1d0   : > { %4083 = vmatprep.subr.bf16.mxu0 %v7110_v0  ;;  %4897 = vmatprep.subr.bf16.mxu1 %v7113_v1 }
 0x264   : > { %v2755_v13 = vpop.f32.mrb[0].mxu0  ;;  %v3207_v14 = vpop.f32.mrb[0].mxu1 }
 0x265   : > { %v6159_v15 = vadd.f32 %v2755_v13, %v7950_v9  ;;  %v6191_v16 = vadd.f32 %v3207_v14, %v7952_v10  ;;  %v2757_v17 = vpop.f32.mrb[1].mxu0  ;;  %v3209_v18 = vpop.f32.mrb[1].mxu1  ;;  %v7117_v14 = vld [vmem:[#allocation8 + $0x110] ss:$8 sps:$4 sm:$0xff]  }
 0x266   : > { %v6160_v19 = vadd.f32 %v2757_v17, %v7955_v11  ;;  %v6192_v20 = vadd.f32 %v3209_v18, %v7957_v12  ;;  %v2759_v21 = vpop.f32.mrb[2].mxu0  ;;  %v3211_v22 = vpop.f32.mrb[2].mxu1 }
 0x267   : > { %v3286_v23 = vmax.f32 %v6159_v15, 0.0  ;;  %v3288_v24 = vmax.f32 %v6191_v16, 0.0  ;;  %v6161_v25 = vadd.f32 %v2759_v21, %v7950_v9  ;;  %v6193_v26 = vadd.f32 %v3211_v22, %v7952_v10  ;;  %v2761_v27 = vpop.f32.mrb[3].mxu0  ;;  %v3213_v28 = vpop.f32.mrb[3].mxu1  ;;  %v7122_v15 = vld [vmem:[#allocation7 + $0x124] ss:$8 sps:$4 sm:$0xff]  }
 0x268   : > { %v3287_v29 = vmax.f32 %v6160_v19, 0.0  ;;  %v3289_v30 = vmax.f32 %v6192_v20, 0.0  ;;  %v6162_v31 = vadd.f32 %v2761_v27, %v7955_v11  ;;  %v6194_v32 = vadd.f32 %v3213_v28, %v7957_v12  ;;  %v7120_v28 = vld [vmem:[#allocation7 + $0x120] ss:$8 sps:$4 sm:$0xff]  }
 0x269   : > { %v3290_v33 = vmax.f32 %v6161_v25, 0.0  ;;  %v3292_v34 = vmax.f32 %v6193_v26, 0.0 }
 0x26a   : > { %v6045_v35 = vpack.c.bf16 %v3287_v29, %v3286_v23  ;;  %v6046_v36 = vpack.c.bf16 %v3289_v30, %v3288_v24  ;;  %v3291_v37 = vmax.f32 %v6162_v31, 0.0  ;;  %v3293_v38 = vmax.f32 %v6194_v32, 0.0 }
 0x26b   : > { %v3350_v39 = vpack.c.bf16 %v3290_v33, %v3286_v23  ;;  %v7968_v40 = vpack.c.bf16 %v3292_v34, %v3288_v24 }
 0x26c   : > { %3542 = vst [vmem:[%s7970_s29] sm:$0xff] %v6045_v35  ;;  %3543 = vst [vmem:[%s7970_s29 + $0x8] sm:$0xff] %v6046_v36  ;;  %v3351_v41 = vpack.c.bf16 %v3291_v37, %v3287_v29  ;;  %v6047_v42 = vpack.c.bf16 %v3291_v37, %v3290_v33  ;;  %v7974_v43 = vpack.c.bf16 %v3293_v38, %v3289_v30  ;;  %v2765_v45 = vpop.f32.mrb[4].mxu0  ;;  %v3217_v46 = vpop.f32.mrb[4].mxu1  ;;  %v7125_v29 = vld [vmem:[#allocation8 + $0x124] ss:$8 sps:$4 sm:$0xff]  }
 0x26d   : > { %v6048_v44 = vpack.c.bf16 %v3293_v38, %v3292_v34  ;;  %v6163_v49 = vadd.f32 %v2765_v45, %v7950_v9  ;;  %v6195_v50 = vadd.f32 %v3217_v46, %v7952_v10  ;;  %v2767_v51 = vpop.f32.mrb[5].mxu0  ;;  %v3219_v52 = vpop.f32.mrb[5].mxu1  ;;  %v7123_v34 = vld [vmem:[#allocation8 + $0x120] ss:$8 sps:$4 sm:$0xff]   ;;  %v7128_v35 = vld [vmem:[#allocation7 + $0x134] ss:$8 sps:$4 sm:$0xff]  }
 0x26e   : > { %3544 = vst [vmem:[%s7970_s29 + $0x10] sm:$0xff] %v6047_v42  ;;  %v6164_v55 = vadd.f32 %v2767_v51, %v7955_v11  ;;  %v6196_v56 = vadd.f32 %v3219_v52, %v7957_v12  ;;  %v2769_v57 = vpop.f32.mrb[6].mxu0  ;;  %v3221_v58 = vpop.f32.mrb[6].mxu1  ;;  %4002 = vmatprep.mubr.bf16.mxu0 %v3351_v41  ;;  %4816 = vmatprep.mubr.bf16.mxu1 %v3351_v41  ;;  %v7131_v41 = vld [vmem:[#allocation8 + $0x134] ss:$8 sps:$4 sm:$0xff]  }
 0x26f   : > { %3545 = vst [vmem:[%s7970_s29 + $0x18] sm:$0xff] %v6048_v44  ;;  %v3294_v59 = vmax.f32 %v6163_v49, 0.0  ;;  %v3296_v60 = vmax.f32 %v6195_v50, 0.0  ;;  %v6165_v61 = vadd.f32 %v2769_v57, %v7950_v9  ;;  %v6197_v62 = vadd.f32 %v3221_v58, %v7952_v10  ;;  %v2771_v63 = vpop.f32.mrb[7].mxu0  ;;  %v3223_v0 = vpop.f32.mrb[7].mxu1  ;;  %4003 = vmatmul.mubr.bf16.vlgmr.msra.gmra.mrb[32].mxu0 %v3350_v39  ;;  %4817 = vmatmul.mubr.bf16.vlgmr.msra.gmra.mrb[32].mxu1 %v3350_v39 }
 0x270   : > { %v3295_v1 = vmax.f32 %v6164_v55, 0.0  ;;  %v3297_v2 = vmax.f32 %v6196_v56, 0.0  ;;  %v6166_v3 = vadd.f32 %v2771_v63, %v7955_v11  ;;  %v6198_v5 = vadd.f32 %v3223_v0, %v7957_v12  ;;  %4084 = vmatpush1.bf16.msra.mxu0 %v7108_v47  ;;  %4898 = vmatpush1.bf16.msra.mxu1 %v7111_v48  ;;  %v7129_v56 = vld [vmem:[#allocation8 + $0x130] ss:$8 sps:$4 sm:$0xff]   ;;  %v7134_v57 = vld [vmem:[#allocation7 + $0x144] ss:$8 sps:$4 sm:$0xff]  }
 0x271   : > { %v3298_v8 = vmax.f32 %v6165_v61, 0.0  ;;  %v3300_v13 = vmax.f32 %v6197_v62, 0.0  ;;  %4085 = vmatprep.subr.bf16.mxu0 %v7116_v53  ;;  %4899 = vmatprep.subr.bf16.mxu1 %v7119_v54  ;;  %v7126_v53 = vld [vmem:[#allocation7 + $0x130] ss:$8 sps:$4 sm:$0xff]  }
 0x272   : > { %v6049_v16 = vpack.c.bf16 %v3295_v1, %v3294_v59  ;;  %v6050_v17 = vpack.c.bf16 %v3297_v2, %v3296_v60  ;;  %v3299_v18 = vmax.f32 %v6166_v3, 0.0  ;;  %v3301_v19 = vmax.f32 %v6198_v5, 0.0 }
 0x273   : > { %v3354_v20 = vpack.c.bf16 %v3298_v8, %v3294_v59  ;;  %v7986_v21 = vpack.c.bf16 %v3300_v13, %v3296_v60 }
 0x274   : > { %3546 = vst [vmem:[%s7970_s29 + $0x20] sm:$0xff] %v6049_v16  ;;  %3547 = vst [vmem:[%s7970_s29 + $0x28] sm:$0xff] %v6050_v17  ;;  %v3355_v22 = vpack.c.bf16 %v3299_v18, %v3295_v1  ;;  %v6051_v23 = vpack.c.bf16 %v3299_v18, %v3298_v8  ;;  %v7990_v24 = vpack.c.bf16 %v3301_v19, %v3297_v2  ;;  %v2775_v26 = vpop.f32.mrb[8].mxu0  ;;  %v3227_v27 = vpop.f32.mrb[8].mxu1  ;;  %4086 = vmatpush1.bf16.msra.mxu0 %v7114_v6  ;;  %v7132_v8 = vld [vmem:[#allocation7 + $0x140] ss:$8 sps:$4 sm:$0xff]  }
 0x275   : > { %v6052_v25 = vpack.c.bf16 %v3301_v19, %v3300_v13  ;;  %v6167_v30 = vadd.f32 %v2775_v26, %v7950_v9  ;;  %v6199_v31 = vadd.f32 %v3227_v27, %v7952_v10  ;;  %4900 = vmatpush1.bf16.msra.mxu1 %v7117_v14  ;;  %v2777_v32 = vpop.f32.mrb[9].mxu0  ;;  %v3229_v33 = vpop.f32.mrb[9].mxu1  ;;  %4087 = vmatprep.subr.bf16.mxu0 %v7122_v15  ;;  %v7137_v13 = vld [vmem:[#allocation8 + $0x144] ss:$8 sps:$4 sm:$0xff]   ;;  %v7135_v18 = vld [vmem:[#allocation8 + $0x140] ss:$8 sps:$4 sm:$0xff]  }
 0x276   : > { %3548 = vst [vmem:[%s7970_s29 + $0x30] sm:$0xff] %v6051_v23  ;;  %v6168_v36 = vadd.f32 %v2777_v32, %v7955_v11  ;;  %v6200_v37 = vadd.f32 %v3229_v33, %v7957_v12  ;;  %v2779_v38 = vpop.f32.mrb[10].mxu0  ;;  %v3231_v39 = vpop.f32.mrb[10].mxu1  ;;  %4012 = vmatprep.mubr.bf16.mxu0 %v3355_v22  ;;  %4826 = vmatprep.mubr.bf16.mxu1 %v3355_v22  ;;  %v7140_v19 = vld [vmem:[#allocation7 + $0x154] ss:$8 sps:$4 sm:$0xff]  }
 0x277   : > { %3549 = vst [vmem:[%s7970_s29 + $0x38] sm:$0xff] %v6052_v25  ;;  %v3302_v42 = vmax.f32 %v6167_v30, 0.0  ;;  %v3304_v44 = vmax.f32 %v6199_v31, 0.0  ;;  %v6169_v45 = vadd.f32 %v2779_v38, %v7950_v9  ;;  %v6201_v46 = vadd.f32 %v3231_v39, %v7952_v10  ;;  %v2781_v47 = vpop.f32.mrb[11].mxu0  ;;  %v3233_v48 = vpop.f32.mrb[11].mxu1  ;;  %4013 = vmatmul.mubr.bf16.gmra.mrb[36].mxu0 %v3354_v20  ;;  %4827 = vmatmul.mubr.bf16.gmra.mrb[36].mxu1 %v3354_v20 }
 0x278   : > { %v3303_v49 = vmax.f32 %v6168_v36, 0.0  ;;  %v3305_v50 = vmax.f32 %v6200_v37, 0.0  ;;  %v6170_v51 = vadd.f32 %v2781_v47, %v7955_v11  ;;  %v6202_v52 = vadd.f32 %v3233_v48, %v7957_v12  ;;  %4901 = vmatprep.subr.bf16.mxu1 %v7125_v29  ;;  %4088 = vmatpush1.bf16.msra.mxu0 %v7120_v28  ;;  %v7143_v26 = vld [vmem:[#allocation8 + $0x154] ss:$8 sps:$4 sm:$0xff]   ;;  %v7138_v37 = vld [vmem:[#allocation7 + $0x150] ss:$8 sps:$4 sm:$0xff]  }
 0x279   : > { %v3306_v54 = vmax.f32 %v6169_v45, 0.0  ;;  %v3308_v55 = vmax.f32 %v6201_v46, 0.0  ;;  %4902 = vmatpush1.bf16.msra.mxu1 %v7123_v34  ;;  %4089 = vmatprep.subr.bf16.mxu0 %v7128_v35 }
 0x27a   : > { %v6053_v58 = vpack.c.bf16 %v3303_v49, %v3302_v42  ;;  %v6054_v59 = vpack.c.bf16 %v3305_v50, %v3304_v44  ;;  %v3307_v60 = vmax.f32 %v6170_v51, 0.0  ;;  %v3309_v61 = vmax.f32 %v6202_v52, 0.0  ;;  %4903 = vmatprep.subr.bf16.mxu1 %v7131_v41  ;;  %v7141_v41 = vld [vmem:[#allocation8 + $0x150] ss:$8 sps:$4 sm:$0xff]  }
 0x27b   : > { %v3358_v62 = vpack.c.bf16 %v3306_v54, %v3302_v42  ;;  %v8002_v63 = vpack.c.bf16 %v3308_v55, %v3304_v44  ;;  %v7146_v42 = vld [vmem:[#allocation7 + $0x164] ss:$8 sps:$4 sm:$0xff]  }
 0x27c   : > { %3550 = vst [vmem:[%s7970_s29 + $0x40] sm:$0xff] %v6053_v58  ;;  %3551 = vst [vmem:[%s7970_s29 + $0x48] sm:$0xff] %v6054_v59  ;;  %v3359_v0 = vpack.c.bf16 %v3307_v60, %v3303_v49  ;;  %v6055_v1 = vpack.c.bf16 %v3307_v60, %v3306_v54  ;;  %v8006_v2 = vpack.c.bf16 %v3309_v61, %v3305_v50  ;;  %v2785_v5 = vpop.f32.mrb[12].mxu0  ;;  %v3237_v6 = vpop.f32.mrb[12].mxu1  ;;  %4090 = vmatpush1.bf16.msra.mxu0 %v7126_v53 }
 0x27d   : > { %v6056_v3 = vpack.c.bf16 %v3309_v61, %v3308_v55  ;;  %v6171_v14 = vadd.f32 %v2785_v5, %v7950_v9  ;;  %v6203_v15 = vadd.f32 %v3237_v6, %v7952_v10  ;;  %4904 = vmatpush1.bf16.msra.mxu1 %v7129_v56  ;;  %v2787_v16 = vpop.f32.mrb[13].mxu0  ;;  %v3239_v17 = vpop.f32.mrb[13].mxu1  ;;  %4091 = vmatprep.subr.bf16.mxu0 %v7134_v57  ;;  %v7144_v56 = vld [vmem:[#allocation7 + $0x160] ss:$8 sps:$4 sm:$0xff]   ;;  %v7149_v57 = vld [vmem:[#allocation8 + $0x164] ss:$8 sps:$4 sm:$0xff]  }
 0x27e   : > { %3552 = vst [vmem:[%s7970_s29 + $0x50] sm:$0xff] %v6055_v1  ;;  %v6172_v20 = vadd.f32 %v2787_v16, %v7955_v11  ;;  %v6204_v22 = vadd.f32 %v3239_v17, %v7957_v12  ;;  %v2789_v23 = vpop.f32.mrb[14].mxu0  ;;  %v3241_v25 = vpop.f32.mrb[14].mxu1  ;;  %4022 = vmatprep.mubr.bf16.mxu0 %v3359_v0  ;;  %4836 = vmatprep.mubr.bf16.mxu1 %v3359_v0  ;;  %v7152_v0 = vld [vmem:[#allocation7 + $0x174] ss:$8 sps:$4 sm:$0xff]  }
 0x27f   : > { %3553 = vst [vmem:[%s7970_s29 + $0x58] sm:$0xff] %v6056_v3  ;;  %v3310_v27 = vmax.f32 %v6171_v14, 0.0  ;;  %v3312_v28 = vmax.f32 %v6203_v15, 0.0  ;;  %v6173_v29 = vadd.f32 %v2789_v23, %v7950_v9  ;;  %v6205_v30 = vadd.f32 %v3241_v25, %v7952_v10  ;;  %v2791_v31 = vpop.f32.mrb[15].mxu0  ;;  %v3243_v32 = vpop.f32.mrb[15].mxu1  ;;  %4023 = vmatmul.mubr.bf16.gmra.mrb[40].mxu0 %v3358_v62  ;;  %4837 = vmatmul.mubr.bf16.gmra.mrb[40].mxu1 %v3358_v62 }
 0x280   : > { %v3311_v33 = vmax.f32 %v6172_v20, 0.0  ;;  %v3313_v34 = vmax.f32 %v6204_v22, 0.0  ;;  %v6174_v35 = vadd.f32 %v2791_v31, %v7955_v11  ;;  %v6206_v36 = vadd.f32 %v3243_v32, %v7957_v12  ;;  %4905 = vmatprep.subr.bf16.mxu1 %v7137_v13  ;;  %4092 = vmatpush1.bf16.msra.mxu0 %v7132_v8  ;;  %v7147_v62 = vld [vmem:[#allocation8 + $0x160] ss:$8 sps:$4 sm:$0xff]   ;;  %v7155_v8 = vld [vmem:[#allocation8 + $0x174] ss:$8 sps:$4 sm:$0xff]  }
 0x281   : > { %v3314_v38 = vmax.f32 %v6173_v29, 0.0  ;;  %v3316_v39 = vmax.f32 %v6205_v30, 0.0  ;;  %4906 = vmatpush1.bf16.msra.mxu1 %v7135_v18  ;;  %4093 = vmatprep.subr.bf16.mxu0 %v7140_v19  ;;  %v7150_v25 = vld [vmem:[#allocation7 + $0x170] ss:$8 sps:$4 sm:$0xff]   ;;  %v7158_v29 = vld [vmem:[#allocation7 + $0x184] ss:$8 sps:$4 sm:$0xff]  }
 0x282   : > { %v6057_v44 = vpack.c.bf16 %v3311_v33, %v3310_v27  ;;  %v6058_v45 = vpack.c.bf16 %v3313_v34, %v3312_v28  ;;  %v3315_v46 = vmax.f32 %v6174_v35, 0.0  ;;  %v3317_v47 = vmax.f32 %v6206_v36, 0.0  ;;  %4907 = vmatprep.subr.bf16.mxu1 %v7143_v26 }
 0x283   : > { %v3362_v48 = vpack.c.bf16 %v3314_v38, %v3310_v27  ;;  %v8018_v49 = vpack.c.bf16 %v3316_v39, %v3312_v28  ;;  %v7153_v28 = vld [vmem:[#allocation8 + $0x170] ss:$8 sps:$4 sm:$0xff]  }
 0x284   : > { %3554 = vst [vmem:[%s7970_s29 + $0x60] sm:$0xff] %v6057_v44  ;;  %3555 = vst [vmem:[%s7970_s29 + $0x68] sm:$0xff] %v6058_v45  ;;  %v3363_v50 = vpack.c.bf16 %v3315_v46, %v3311_v33  ;;  %v6059_v51 = vpack.c.bf16 %v3315_v46, %v3314_v38  ;;  %v8022_v52 = vpack.c.bf16 %v3317_v47, %v3313_v34  ;;  %v2795_v54 = vpop.f32.mrb[16].mxu0  ;;  %v3247_v55 = vpop.f32.mrb[16].mxu1  ;;  %4094 = vmatpush1.bf16.msra.mxu0 %v7138_v37  ;;  %v7156_v44 = vld [vmem:[#allocation7 + $0x180] ss:$8 sps:$4 sm:$0xff]  }
 0x285   : > { %v6060_v53 = vpack.c.bf16 %v3317_v47, %v3316_v39  ;;  %v6175_v58 = vadd.f32 %v2795_v54, %v7950_v9  ;;  %v6207_v59 = vadd.f32 %v3247_v55, %v7952_v10  ;;  %4908 = vmatpush1.bf16.msra.mxu1 %v7141_v41  ;;  %v2797_v60 = vpop.f32.mrb[17].mxu0  ;;  %v3249_v61 = vpop.f32.mrb[17].mxu1  ;;  %4095 = vmatprep.subr.bf16.mxu0 %v7146_v42  ;;  %v7161_v45 = vld [vmem:[#allocation8 + $0x184] ss:$8 sps:$4 sm:$0xff]  }
 0x286   : > { %3556 = vst [vmem:[%s7970_s29 + $0x70] sm:$0xff] %v6059_v51  ;;  %v6176_v1 = vadd.f32 %v2797_v60, %v7955_v11  ;;  %v6208_v3 = vadd.f32 %v3249_v61, %v7957_v12  ;;  %v2799_v5 = vpop.f32.mrb[18].mxu0  ;;  %v3251_v6 = vpop.f32.mrb[18].mxu1  ;;  %4032 = vmatprep.mubr.bf16.mxu0 %v3363_v50  ;;  %4846 = vmatprep.mubr.bf16.mxu1 %v3363_v50  ;;  %v7159_v51 = vld [vmem:[#allocation8 + $0x180] ss:$8 sps:$4 sm:$0xff]  }
 0x287   : > { %3557 = vst [vmem:[%s7970_s29 + $0x78] sm:$0xff] %v6060_v53  ;;  %v3318_v13 = vmax.f32 %v6175_v58, 0.0  ;;  %v3320_v14 = vmax.f32 %v6207_v59, 0.0  ;;  %v6177_v15 = vadd.f32 %v2799_v5, %v7950_v9  ;;  %v6209_v16 = vadd.f32 %v3251_v6, %v7952_v10  ;;  %v2801_v17 = vpop.f32.mrb[19].mxu0  ;;  %v3253_v18 = vpop.f32.mrb[19].mxu1  ;;  %4033 = vmatmul.mubr.bf16.gmra.mrb[44].mxu0 %v3362_v48  ;;  %4847 = vmatmul.mubr.bf16.gmra.mrb[44].mxu1 %v3362_v48 }
 0x288   : > { %v3319_v19 = vmax.f32 %v6176_v1, 0.0  ;;  %v3321_v20 = vmax.f32 %v6208_v3, 0.0  ;;  %v6178_v22 = vadd.f32 %v2801_v17, %v7955_v11  ;;  %v6210_v23 = vadd.f32 %v3253_v18, %v7957_v12  ;;  %4909 = vmatprep.subr.bf16.mxu1 %v7149_v57  ;;  %4096 = vmatpush1.bf16.msra.mxu0 %v7144_v56  ;;  %v7164_v53 = vld [vmem:[#allocation7 + $0x194] ss:$8 sps:$4 sm:$0xff]   ;;  %v7170_v17 = vld [vmem:[#allocation7 + $0x1a4] ss:$8 sps:$4 sm:$0xff]  }
 0x289   : > { %v3322_v26 = vmax.f32 %v6177_v15, 0.0  ;;  %v3324_v27 = vmax.f32 %v6209_v16, 0.0  ;;  %4910 = vmatpush1.bf16.msra.mxu1 %v7147_v62  ;;  %4097 = vmatprep.subr.bf16.mxu0 %v7152_v0  ;;  %v7167_v58 = vld [vmem:[#allocation8 + $0x194] ss:$8 sps:$4 sm:$0xff]   ;;  %v7165_v16 = vld [vmem:[#allocation8 + $0x190] ss:$8 sps:$4 sm:$0xff]  }
 0x28a   : > { %v6061_v30 = vpack.c.bf16 %v3319_v19, %v3318_v13  ;;  %v6062_v31 = vpack.c.bf16 %v3321_v20, %v3320_v14  ;;  %v3323_v32 = vmax.f32 %v6178_v22, 0.0  ;;  %v3325_v33 = vmax.f32 %v6210_v23, 0.0  ;;  %4911 = vmatprep.subr.bf16.mxu1 %v7155_v8 }
 0x28b   : > { %v3366_v34 = vpack.c.bf16 %v3322_v26, %v3318_v13  ;;  %v8034_v35 = vpack.c.bf16 %v3324_v27, %v3320_v14  ;;  %v7162_v13 = vld [vmem:[#allocation7 + $0x190] ss:$8 sps:$4 sm:$0xff]  }
 0x28c   : > { %3558 = vst [vmem:[%s7970_s29 + $0x80] sm:$0xff] %v6061_v30  ;;  %3559 = vst [vmem:[%s7970_s29 + $0x88] sm:$0xff] %v6062_v31  ;;  %v3367_v36 = vpack.c.bf16 %v3323_v32, %v3319_v19  ;;  %v6063_v37 = vpack.c.bf16 %v3323_v32, %v3322_v26  ;;  %v8038_v38 = vpack.c.bf16 %v3325_v33, %v3321_v20  ;;  %v2805_v41 = vpop.f32.mrb[20].mxu0  ;;  %v3257_v42 = vpop.f32.mrb[20].mxu1  ;;  %4098 = vmatpush1.bf16.msra.mxu0 %v7150_v25  ;;  %v7168_v32 = vld [vmem:[#allocation7 + $0x1a0] ss:$8 sps:$4 sm:$0xff]  }
 0x28d   : > { %v6064_v39 = vpack.c.bf16 %v3325_v33, %v3324_v27  ;;  %v6179_v46 = vadd.f32 %v2805_v41, %v7950_v9  ;;  %v6211_v47 = vadd.f32 %v3257_v42, %v7952_v10  ;;  %4912 = vmatpush1.bf16.msra.mxu1 %v7153_v28  ;;  %v2807_v48 = vpop.f32.mrb[21].mxu0  ;;  %v3259_v50 = vpop.f32.mrb[21].mxu1  ;;  %4099 = vmatprep.subr.bf16.mxu0 %v7158_v29  ;;  %v7173_v33 = vld [vmem:[#allocation8 + $0x1a4] ss:$8 sps:$4 sm:$0xff]   ;;  %v7171_v41 = vld [vmem:[#allocation8 + $0x1a0] ss:$8 sps:$4 sm:$0xff]  }
 0x28e   : > { %3560 = vst [vmem:[%s7970_s29 + $0x90] sm:$0xff] %v6063_v37  ;;  %v6180_v54 = vadd.f32 %v2807_v48, %v7955_v11  ;;  %v6212_v55 = vadd.f32 %v3259_v50, %v7957_v12  ;;  %v2809_v56 = vpop.f32.mrb[22].mxu0  ;;  %v3261_v57 = vpop.f32.mrb[22].mxu1  ;;  %4042 = vmatprep.mubr.bf16.mxu0 %v3367_v36  ;;  %4856 = vmatprep.mubr.bf16.mxu1 %v3367_v36  ;;  %v7176_v42 = vld [vmem:[#allocation7 + $0x1b4] ss:$8 sps:$4 sm:$0xff]  }
 0x28f   : > { %3561 = vst [vmem:[%s7970_s29 + $0x98] sm:$0xff] %v6064_v39  ;;  %v3326_v59 = vmax.f32 %v6179_v46, 0.0  ;;  %v3328_v60 = vmax.f32 %v6211_v47, 0.0  ;;  %v6181_v61 = vadd.f32 %v2809_v56, %v7950_v9  ;;  %v6213_v62 = vadd.f32 %v3261_v57, %v7952_v10  ;;  %v2811_v0 = vpop.f32.mrb[23].mxu0  ;;  %v3263_v1 = vpop.f32.mrb[23].mxu1  ;;  %4043 = vmatmul.mubr.bf16.gmra.mrb[48].mxu0 %v3366_v34  ;;  %4857 = vmatmul.mubr.bf16.gmra.mrb[48].mxu1 %v3366_v34 }
 0x290   : > { %v3327_v3 = vmax.f32 %v6180_v54, 0.0  ;;  %v3329_v5 = vmax.f32 %v6212_v55, 0.0  ;;  %v6182_v6 = vadd.f32 %v2811_v0, %v7955_v11  ;;  %v6214_v8 = vadd.f32 %v3263_v1, %v7957_v12  ;;  %4913 = vmatprep.subr.bf16.mxu1 %v7161_v45  ;;  %4100 = vmatpush1.bf16.msra.mxu0 %v7156_v44  ;;  %v7179_v48 = vld [vmem:[#allocation8 + $0x1b4] ss:$8 sps:$4 sm:$0xff]   ;;  %v7177_v1 = vld [vmem:[#allocation8 + $0x1b0] ss:$8 sps:$4 sm:$0xff]  }
 0x291   : > { %v3330_v14 = vmax.f32 %v6181_v61, 0.0  ;;  %v3332_v15 = vmax.f32 %v6213_v62, 0.0  ;;  %4914 = vmatpush1.bf16.msra.mxu1 %v7159_v51  ;;  %4101 = vmatprep.subr.bf16.mxu0 %v7164_v53  ;;  %v7174_v61 = vld [vmem:[#allocation7 + $0x1b0] ss:$8 sps:$4 sm:$0xff]  }
 0x292   : > { %v6065_v18 = vpack.c.bf16 %v3327_v3, %v3326_v59  ;;  %v6066_v19 = vpack.c.bf16 %v3329_v5, %v3328_v60  ;;  %v3331_v20 = vmax.f32 %v6182_v6, 0.0  ;;  %v3333_v22 = vmax.f32 %v6214_v8, 0.0  ;;  %4915 = vmatprep.subr.bf16.mxu1 %v7167_v58 }
 0x293   : > { %v3370_v23 = vpack.c.bf16 %v3330_v14, %v3326_v59  ;;  %v8050_v25 = vpack.c.bf16 %v3332_v15, %v3328_v60 }
 0x294   : > { %3562 = vst [vmem:[%s7970_s29 + $0xa0] sm:$0xff] %v6065_v18  ;;  %3563 = vst [vmem:[%s7970_s29 + $0xa8] sm:$0xff] %v6066_v19  ;;  %v3371_v26 = vpack.c.bf16 %v3331_v20, %v3327_v3  ;;  %v6067_v27 = vpack.c.bf16 %v3331_v20, %v3330_v14  ;;  %v8054_v28 = vpack.c.bf16 %v3333_v22, %v3329_v5  ;;  %v2815_v30 = vpop.f32.mrb[24].mxu0  ;;  %v3267_v31 = vpop.f32.mrb[24].mxu1  ;;  %4102 = vmatpush1.bf16.msra.mxu0 %v7162_v13  ;;  %v7182_v3 = vld [vmem:[#allocation7 + $0x1c4] ss:$8 sps:$4 sm:$0xff]  }
 0x295   : > { %v6068_v29 = vpack.c.bf16 %v3333_v22, %v3332_v15  ;;  %v6183_v34 = vadd.f32 %v2815_v30, %v7950_v9  ;;  %v6215_v36 = vadd.f32 %v3267_v31, %v7952_v10  ;;  %4916 = vmatpush1.bf16.msra.mxu1 %v7165_v16  ;;  %v2817_v37 = vpop.f32.mrb[25].mxu0  ;;  %v3269_v39 = vpop.f32.mrb[25].mxu1  ;;  %4103 = vmatprep.subr.bf16.mxu0 %v7170_v17 }
 0x296   : > { %3564 = vst [vmem:[%s7970_s29 + $0xb0] sm:$0xff] %v6067_v27  ;;  %v6184_v44 = vadd.f32 %v2817_v37, %v7955_v11  ;;  %v6216_v45 = vadd.f32 %v3269_v39, %v7957_v12  ;;  %v2819_v46 = vpop.f32.mrb[26].mxu0  ;;  %v3271_v47 = vpop.f32.mrb[26].mxu1  ;;  %4052 = vmatprep.mubr.bf16.mxu0 %v3371_v26  ;;  %4866 = vmatprep.mubr.bf16.mxu1 %v3371_v26  ;;  %v7185_v26 = vld [vmem:[#allocation8 + $0x1c4] ss:$8 sps:$4 sm:$0xff]  }
 0x297   : > { %3565 = vst [vmem:[%s7970_s29 + $0xb8] sm:$0xff] %v6068_v29  ;;  %v3334_v50 = vmax.f32 %v6183_v34, 0.0  ;;  %v3336_v51 = vmax.f32 %v6215_v36, 0.0  ;;  %v6185_v53 = vadd.f32 %v2819_v46, %v7950_v9  ;;  %v6217_v54 = vadd.f32 %v3271_v47, %v7952_v10  ;;  %v2821_v55 = vpop.f32.mrb[27].mxu0  ;;  %v3273_v56 = vpop.f32.mrb[27].mxu1  ;;  %4053 = vmatmul.mubr.bf16.gmra.mrb[52].mxu0 %v3370_v23  ;;  %4867 = vmatmul.mubr.bf16.gmra.mrb[52].mxu1 %v3370_v23 }
 0x298   : > { %v3335_v57 = vmax.f32 %v6184_v44, 0.0  ;;  %v3337_v58 = vmax.f32 %v6216_v45, 0.0  ;;  %v6186_v59 = vadd.f32 %v2821_v55, %v7955_v11  ;;  %v6218_v60 = vadd.f32 %v3273_v56, %v7957_v12  ;;  %4917 = vmatprep.subr.bf16.mxu1 %v7173_v33  ;;  %4104 = vmatpush1.bf16.msra.mxu0 %v7168_v32  ;;  %v7180_v23 = vld [vmem:[#allocation7 + $0x1c0] ss:$8 sps:$4 sm:$0xff]   ;;  %v7188_v33 = vld [vmem:[#allocation7 + $0x1d4] ss:$8 sps:$4 sm:$0xff]  }
 0x299   : > { %v3338_v62 = vmax.f32 %v6185_v53, 0.0  ;;  %v3340_v0 = vmax.f32 %v6217_v54, 0.0  ;;  %4918 = vmatpush1.bf16.msra.mxu1 %v7171_v41  ;;  %4105 = vmatprep.subr.bf16.mxu0 %v7176_v42  ;;  %v7183_v32 = vld [vmem:[#allocation8 + $0x1c0] ss:$8 sps:$4 sm:$0xff]   ;;  %v7191_v41 = vld [vmem:[#allocation8 + $0x1d4] ss:$8 sps:$4 sm:$0xff]  }
 0x29a   : > { %v6069_v5 = vpack.c.bf16 %v3335_v57, %v3334_v50  ;;  %v6070_v6 = vpack.c.bf16 %v3337_v58, %v3336_v51  ;;  %v3339_v8 = vmax.f32 %v6186_v59, 0.0  ;;  %v3341_v13 = vmax.f32 %v6218_v60, 0.0  ;;  %4919 = vmatprep.subr.bf16.mxu1 %v7179_v48  ;;  %v7186_v55 = vld [vmem:[#allocation7 + $0x1d0] ss:$8 sps:$4 sm:$0xff]  }
 0x29b   : > { %v3374_v14 = vpack.c.bf16 %v3338_v62, %v3334_v50  ;;  %v8066_v15 = vpack.c.bf16 %v3340_v0, %v3336_v51 }
 0x29c   : > { %3566 = vst [vmem:[%s7970_s29 + $0xc0] sm:$0xff] %v6069_v5  ;;  %3567 = vst [vmem:[%s7970_s29 + $0xc8] sm:$0xff] %v6070_v6  ;;  %v3375_v16 = vpack.c.bf16 %v3339_v8, %v3335_v57  ;;  %v6071_v17 = vpack.c.bf16 %v3339_v8, %v3338_v62  ;;  %v8070_v18 = vpack.c.bf16 %v3341_v13, %v3337_v58  ;;  %v2825_v20 = vpop.f32.mrb[28].mxu0  ;;  %v3277_v22 = vpop.f32.mrb[28].mxu1  ;;  %4106 = vmatpush1.bf16.msra.mxu0 %v7174_v61  ;;  %v7192_v5 = vld [vmem:[#allocation7 + $0x1e0] ss:$8 sps:$4 sm:$0xff]  }
 0x29d   : > { %v6072_v19 = vpack.c.bf16 %v3341_v13, %v3340_v0  ;;  %v6187_v27 = vadd.f32 %v2825_v20, %v7950_v9  ;;  %v6219_v29 = vadd.f32 %v3277_v22, %v7952_v10  ;;  %4920 = vmatpush1.bf16.msra.mxu1 %v7177_v1  ;;  %v2827_v30 = vpop.f32.mrb[29].mxu0  ;;  %v3279_v31 = vpop.f32.mrb[29].mxu1  ;;  %4107 = vmatprep.subr.bf16.mxu0 %v7182_v3  ;;  %v7197_v6 = vld [vmem:[#allocation8 + $0x1e4] ss:$8 sps:$4 sm:$0xff]   ;;  %v7195_v8 = vld [vmem:[#allocation8 + $0x1e0] ss:$8 sps:$4 sm:$0xff]  }
 0x29e   : > { %3568 = vst [vmem:[%s7970_s29 + $0xd0] sm:$0xff] %v6071_v17  ;;  %v6188_v34 = vadd.f32 %v2827_v30, %v7955_v11  ;;  %v6220_v36 = vadd.f32 %v3279_v31, %v7957_v12  ;;  %v2829_v37 = vpop.f32.mrb[30].mxu0  ;;  %v3281_v39 = vpop.f32.mrb[30].mxu1  ;;  %4062 = vmatprep.mubr.bf16.mxu0 %v3375_v16  ;;  %4876 = vmatprep.mubr.bf16.mxu1 %v3375_v16  ;;  %v7200_v13 = vld [vmem:[#allocation7 + $0x1f4] ss:$8 sps:$4 sm:$0xff]  }
 0x29f   : > { %3569 = vst [vmem:[%s7970_s29 + $0xd8] sm:$0xff] %v6072_v19  ;;  %v3342_v42 = vmax.f32 %v6187_v27, 0.0  ;;  %v3344_v44 = vmax.f32 %v6219_v29, 0.0  ;;  %v6189_v45 = vadd.f32 %v2829_v37, %v7950_v9  ;;  %v6221_v46 = vadd.f32 %v3281_v39, %v7952_v10  ;;  %v2831_v47 = vpop.f32.mrb[31].mxu0  ;;  %v3283_v48 = vpop.f32.mrb[31].mxu1  ;;  %4063 = vmatmul.mubr.bf16.gmra.mrb[56].mxu0 %v3374_v14  ;;  %4877 = vmatmul.mubr.bf16.gmra.mrb[56].mxu1 %v3374_v14  ;;  %v7218_v19 = vld [vmem:[%s8478_s7 + $0x78] sm:$0xff]  }
 0x2a0   : > { %v3343_v50 = vmax.f32 %v6188_v34, 0.0  ;;  %v3345_v51 = vmax.f32 %v6220_v36, 0.0  ;;  %v6190_v53 = vadd.f32 %v2831_v47, %v7955_v11  ;;  %v6222_v54 = vadd.f32 %v3283_v48, %v7957_v12  ;;  %4921 = vmatprep.subr.bf16.mxu1 %v7185_v26  ;;  %4108 = vmatpush1.bf16.msra.mxu0 %v7180_v23  ;;  %v7189_v9 = vld [vmem:[#allocation8 + $0x1d0] ss:$8 sps:$4 sm:$0xff]   ;;  %v7194_v10 = vld [vmem:[#allocation7 + $0x1e4] ss:$8 sps:$4 sm:$0xff]  }
 0x2a1   : > { %v3346_v56 = vmax.f32 %v6189_v45, 0.0  ;;  %v3348_v57 = vmax.f32 %v6221_v46, 0.0  ;;  %4922 = vmatpush1.bf16.msra.mxu1 %v7183_v32  ;;  %4109 = vmatprep.subr.bf16.mxu0 %v7188_v33  ;;  %v7203_v14 = vld [vmem:[#allocation8 + $0x1f4] ss:$8 sps:$4 sm:$0xff]   ;;  %v7198_v16 = vld [vmem:[#allocation7 + $0x1f0] ss:$8 sps:$4 sm:$0xff]  }
 0x2a2   : > { %v6073_v58 = vpack.c.bf16 %v3343_v50, %v3342_v42  ;;  %v6074_v59 = vpack.c.bf16 %v3345_v51, %v3344_v44  ;;  %v3347_v60 = vmax.f32 %v6190_v53, 0.0  ;;  %v3349_v61 = vmax.f32 %v6222_v54, 0.0  ;;  %4923 = vmatprep.subr.bf16.mxu1 %v7191_v41  ;;  %v7201_v17 = vld [vmem:[#allocation8 + $0x1f0] ss:$8 sps:$4 sm:$0xff]   ;;  %v3638_v22 = vld [vmem:[%s8475_s4] sm:$0x3] }
 0x2a3   : > { %v3378_v11 = vpack.c.bf16 %v3346_v56, %v3342_v42  ;;  %v3380_v12 = vpack.c.bf16 %v3348_v57, %v3344_v44  ;;  %v7219_v20 = vld [vmem:[%s8478_s7 + $0x38] sm:$0xff]   ;;  %v8166_v23 = vrot.slane %v3638_v22, %v7942_v4  ;;  %v4452_v26 = vld [vmem:[%s8477_s6] sm:$0x3]  ;;  %v8172_v27 = vrot.slane %v3638_v22, %v7947_v7 }
 0x2a4   : > { %3570 = vst [vmem:[%s7970_s29 + $0xe0] sm:$0xff] %v6073_v58  ;;  %3571 = vst [vmem:[%s7970_s29 + $0xe8] sm:$0xff] %v6074_v59  ;;  %v3379_v62 = vpack.c.bf16 %v3347_v60, %v3343_v50  ;;  %v6075_v0 = vpack.c.bf16 %v3347_v60, %v3346_v56  ;;  %v3381_v1 = vpack.c.bf16 %v3349_v61, %v3345_v51  ;;  %4110 = vmatpush1.bf16.msra.mxu0 %v7186_v55 }
 0x2a5   : > { %v6076_v3 = vpack.c.bf16 %v3349_v61, %v3348_v57  ;;  %4924 = vmatpush1.bf16.msra.mxu1 %v7189_v9  ;;  %4111 = vmatprep.subr.bf16.mxu0 %v7194_v10  ;;  %v8176_v31 = vrot.slane %v4452_v26, %v7942_v4  ;;  %v8180_v41 = vrot.slane %v4452_v26, %v7947_v7 }
 0x2a6   : > { %3572 = vst [vmem:[%s7970_s29 + $0xf0] sm:$0xff] %v6075_v0  ;;  %4072 = vmatprep.mubr.bf16.mxu0 %v3379_v62  ;;  %4886 = vmatprep.mubr.bf16.mxu1 %v3379_v62 }
 0x2a7   : > { %3573 = vst [vmem:[%s7970_s29 + $0xf8] sm:$0xff] %v6076_v3  ;;  %4073 = vmatmul.mubr.bf16.gmra.mrb[60].mxu0 %v3378_v11  ;;  %4887 = vmatmul.mubr.bf16.gmra.mrb[60].mxu1 %v3378_v11 }
 0x2a8   : > { %4925 = vmatprep.subr.bf16.mxu1 %v7197_v6  ;;  %4112 = vmatpush1.bf16.msra.mxu0 %v7192_v5 }
 0x2a9   : > { %4115 = vmatprep.mubr.bf16.mxu0 %v7974_v43  ;;  %4926 = vmatpush1.bf16.msra.mxu1 %v7195_v8 }
 0x2aa   : > { %4929 = vmatprep.mubr.bf16.mxu1 %v7974_v43  ;;  %4113 = vmatprep.subr.bf16.mxu0 %v7200_v13  ;;  %v7205_v43 = vld [vmem:[%s8478_s7] sm:$0xff]  }
 0x2ab   : > { %4927 = vmatprep.subr.bf16.mxu1 %v7203_v14 }
 0x2ac   : > { %4114 = vmatpush1.bf16.msra.mxu0 %v7198_v16 }
 0x2ad   : > { %4928 = vmatpush1.bf16.msra.mxu1 %v7201_v17 }
 0x2af   : > { %4116 = vmatmul.mubr.bf16.vlgmr.msra.gmra.mrb[32].mxu0 %v7968_v40 }
 0x2b0   : > { %4930 = vmatmul.mubr.bf16.vlgmr.msra.gmra.mrb[32].mxu1 %v7968_v40  ;;  %4125 = vmatprep.mubr.bf16.mxu0 %v7990_v24  ;;  %v7204_v40 = vld [vmem:[%s8478_s7 + $0x40] sm:$0xff]  }
 0x2b1   : > { %4939 = vmatprep.mubr.bf16.mxu1 %v7990_v24  ;;  %6079 = vmatprep.subr.bf16.mxu0 %v7204_v40  ;;  %v7207_v24 = vld [vmem:[%s8478_s7 + $0x8] sm:$0xff]  }
 0x2b2   : > { %6143 = vmatprep.subr.bf16.mxu1 %v7204_v40  ;;  %6080 = vmatpush3.bf16.msra.mxu0 %v7205_v43 }
 0x2b3   : > { %6151 = vmatpush3.bf16.msra.mxu1 %v7205_v43 }
 0x2b7   : > { %4126 = vmatmul.mubr.bf16.gmra.mrb[36].mxu0 %v7986_v21 }
 0x2b8   : > { %4940 = vmatmul.mubr.bf16.gmra.mrb[36].mxu1 %v7986_v21  ;;  %4135 = vmatprep.mubr.bf16.mxu0 %v8006_v2  ;;  %v7206_v21 = vld [vmem:[%s8478_s7 + $0x48] sm:$0xff]  }
 0x2b9   : > { %4949 = vmatprep.mubr.bf16.mxu1 %v8006_v2  ;;  %6081 = vmatprep.subr.bf16.mxu0 %v7206_v21  ;;  %v7209_v2 = vld [vmem:[%s8478_s7 + $0x10] sm:$0xff]  }
 0x2ba   : > { %6144 = vmatprep.subr.bf16.mxu1 %v7206_v21  ;;  %6082 = vmatpush3.bf16.msra.mxu0 %v7207_v24 }
 0x2bb   : > { %6152 = vmatpush3.bf16.msra.mxu1 %v7207_v24 }
 0x2bf   : > { %4136 = vmatmul.mubr.bf16.gmra.mrb[40].mxu0 %v8002_v63 }
 0x2c0   : > { %4950 = vmatmul.mubr.bf16.gmra.mrb[40].mxu1 %v8002_v63  ;;  %4145 = vmatprep.mubr.bf16.mxu0 %v8022_v52  ;;  %v7208_v63 = vld [vmem:[%s8478_s7 + $0x50] sm:$0xff]  }
 0x2c1   : > { %4959 = vmatprep.mubr.bf16.mxu1 %v8022_v52  ;;  %6083 = vmatprep.subr.bf16.mxu0 %v7208_v63  ;;  %v7211_v52 = vld [vmem:[%s8478_s7 + $0x18] sm:$0xff]  }
 0x2c2   : > { %6145 = vmatprep.subr.bf16.mxu1 %v7208_v63  ;;  %6084 = vmatpush3.bf16.msra.mxu0 %v7209_v2 }
 0x2c3   : > { %6153 = vmatpush3.bf16.msra.mxu1 %v7209_v2 }
 0x2c7   : > { %4146 = vmatmul.mubr.bf16.gmra.mrb[44].mxu0 %v8018_v49 }
 0x2c8   : > { %4960 = vmatmul.mubr.bf16.gmra.mrb[44].mxu1 %v8018_v49  ;;  %4155 = vmatprep.mubr.bf16.mxu0 %v8038_v38  ;;  %v7210_v49 = vld [vmem:[%s8478_s7 + $0x58] sm:$0xff]  }
 0x2c9   : > { %4969 = vmatprep.mubr.bf16.mxu1 %v8038_v38  ;;  %6085 = vmatprep.subr.bf16.mxu0 %v7210_v49  ;;  %v7213_v38 = vld [vmem:[%s8478_s7 + $0x20] sm:$0xff]  }
 0x2ca   : > { %6146 = vmatprep.subr.bf16.mxu1 %v7210_v49  ;;  %6086 = vmatpush3.bf16.msra.mxu0 %v7211_v52 }
 0x2cb   : > { %6154 = vmatpush3.bf16.msra.mxu1 %v7211_v52 }
 0x2cf   : > { %4156 = vmatmul.mubr.bf16.gmra.mrb[48].mxu0 %v8034_v35 }
 0x2d0   : > { %4970 = vmatmul.mubr.bf16.gmra.mrb[48].mxu1 %v8034_v35  ;;  %4165 = vmatprep.mubr.bf16.mxu0 %v8054_v28  ;;  %v7212_v35 = vld [vmem:[%s8478_s7 + $0x60] sm:$0xff]  }
 0x2d1   : > { %4979 = vmatprep.mubr.bf16.mxu1 %v8054_v28  ;;  %6087 = vmatprep.subr.bf16.mxu0 %v7212_v35  ;;  %v7215_v28 = vld [vmem:[%s8478_s7 + $0x28] sm:$0xff]  }
 0x2d2   : > { %6147 = vmatprep.subr.bf16.mxu1 %v7212_v35  ;;  %6088 = vmatpush3.bf16.msra.mxu0 %v7213_v38 }
 0x2d3   : > { %6155 = vmatpush3.bf16.msra.mxu1 %v7213_v38 }
 0x2d7   : > { %4166 = vmatmul.mubr.bf16.gmra.mrb[52].mxu0 %v8050_v25 }
 0x2d8   : > { %4980 = vmatmul.mubr.bf16.gmra.mrb[52].mxu1 %v8050_v25  ;;  %4175 = vmatprep.mubr.bf16.mxu0 %v8070_v18  ;;  %v7214_v25 = vld [vmem:[%s8478_s7 + $0x68] sm:$0xff]  }
 0x2d9   : > { %4989 = vmatprep.mubr.bf16.mxu1 %v8070_v18  ;;  %6089 = vmatprep.subr.bf16.mxu0 %v7214_v25  ;;  %v7217_v18 = vld [vmem:[%s8478_s7 + $0x30] sm:$0xff]  }
 0x2da   : > { %6148 = vmatprep.subr.bf16.mxu1 %v7214_v25  ;;  %6090 = vmatpush3.bf16.msra.mxu0 %v7215_v28 }
 0x2db   : > { %6156 = vmatpush3.bf16.msra.mxu1 %v7215_v28 }
 0x2df   : > { %4176 = vmatmul.mubr.bf16.gmra.mrb[56].mxu0 %v8066_v15 }
 0x2e0   : > { %4990 = vmatmul.mubr.bf16.gmra.mrb[56].mxu1 %v8066_v15  ;;  %4185 = vmatprep.mubr.bf16.mxu0 %v3381_v1  ;;  %v7216_v15 = vld [vmem:[%s8478_s7 + $0x70] sm:$0xff]  }
 0x2e1   : > { %4999 = vmatprep.mubr.bf16.mxu1 %v3381_v1  ;;  %6091 = vmatprep.subr.bf16.mxu0 %v7216_v15 }
 0x2e2   : > { %6149 = vmatprep.subr.bf16.mxu1 %v7216_v15  ;;  %6092 = vmatpush3.bf16.msra.mxu0 %v7217_v18 }
 0x2e3   : > { %6157 = vmatpush3.bf16.msra.mxu1 %v7217_v18  ;;  %6093 = vmatprep.subr.bf16.mxu0 %v7218_v19 }
 0x2e4   : > { %6150 = vmatprep.subr.bf16.mxu1 %v7218_v19 }
 0x2e6   : > { %6094 = vmatpush3.bf16.msra.mxu0 %v7219_v20 }
 0x2e7   : > { %4186 = vmatmul.mubr.bf16.gmra.mrb[60].mxu0 %v3380_v12  ;;  %6158 = vmatpush3.bf16.msra.mxu1 %v7219_v20 }
 0x2e8   : > { %5000 = vmatmul.mubr.bf16.gmra.mrb[60].mxu1 %v3380_v12 }
 0x382   : > { %v4117_v29 = vpop.f32.mrb[32].mxu0 }
 0x383   : > { %v6223_v30 = vadd.f32 %v4117_v29, %v8166_v23  ;;  %v4931_v32 = vpop.f32.mrb[32].mxu1  ;;  %v4119_v33 = vpop.f32.mrb[33].mxu0 }
 0x384   : > { %v6224_v34 = vadd.f32 %v4119_v33, %v8172_v27  ;;  %v4933_v36 = vpop.f32.mrb[33].mxu1  ;;  %v4121_v37 = vpop.f32.mrb[34].mxu0  ;;  %v6255_v4 = vadd.f32 %v4931_v32, %v8176_v31 }
 0x385   : > { %v5924_v39 = vmul.f32 -1.442695, %v6223_v30  ;;  %v6225_v42 = vadd.f32 %v4121_v37, %v8166_v23  ;;  %v4935_v44 = vpop.f32.mrb[34].mxu1  ;;  %v4123_v45 = vpop.f32.mrb[35].mxu0  ;;  %v6256_v53 = vadd.f32 %v4933_v36, %v8180_v41 }
 0x386   : > { %v5925_v46 = vmul.f32 -1.442695, %v6224_v34  ;;  %v6226_v47 = vadd.f32 %v4123_v45, %v8172_v27  ;;  %v4937_v48 = vpop.f32.mrb[35].mxu1  ;;  %v6257_v7 = vadd.f32 %v4935_v44, %v8176_v31 }
 0x387   : > { %7220 = vpow2.f32 %v5924_v39  ;;  %v5926_v50 = vmul.f32 -1.442695, %v6225_v42  ;;  %v6258_v59 = vadd.f32 %v4937_v48, %v8180_v41 }
 0x388   : > { %7222 = vpow2.f32 %v5925_v46  ;;  %v5927_v51 = vmul.f32 -1.442695, %v6226_v47 }
 0x389   : > { %7224 = vpow2.f32 %v5926_v50 }
 0x38a   : > { %v4127_v54 = vpop.f32.mrb[36].mxu0  ;;  %7226 = vtanh.f32 %v6255_v4 }
 0x38b   : > { %v6227_v55 = vadd.f32 %v4127_v54, %v8166_v23  ;;  %v4941_v56 = vpop.f32.mrb[36].mxu1  ;;  %v4129_v57 = vpop.f32.mrb[37].mxu0  ;;  %7228 = vpow2.f32 %v5927_v51 }
 0x38c   : > { %v6228_v9 = vadd.f32 %v4129_v57, %v8172_v27  ;;  %v4943_v10 = vpop.f32.mrb[37].mxu1  ;;  %v4131_v58 = vpop.f32.mrb[38].mxu0  ;;  %7230 = vtanh.f32 %v6256_v53  ;;  %v6259_v3 = vadd.f32 %v4941_v56, %v8176_v31 }
 0x38d   : > { %v5928_v60 = vmul.f32 -1.442695, %v6227_v55  ;;  %v6229_v61 = vadd.f32 %v4131_v58, %v8166_v23  ;;  %v4945_v11 = vpop.f32.mrb[38].mxu1  ;;  %v4133_v12 = vpop.f32.mrb[39].mxu0  ;;  %7232 = vtanh.f32 %v6257_v7  ;;  %v6260_v63 = vadd.f32 %v4943_v10, %v8180_v41 }
 0x38e   : > { %v5929_v62 = vmul.f32 -1.442695, %v6228_v9  ;;  %v6230_v0 = vadd.f32 %v4133_v12, %v8172_v27  ;;  %v8192_v1 = vpop.f32.mrb[39].mxu1  ;;  %v6261_v26 = vadd.f32 %v4945_v11, %v8176_v31 }
 0x38f   : > { %7234 = vpow2.f32 %v5928_v60  ;;  %v5930_v5 = vmul.f32 -1.442695, %v6229_v61  ;;  %v6262_v56 = vadd.f32 %v8192_v1, %v8180_v41 }
 0x390   : > { %7236 = vpow2.f32 %v5929_v62  ;;  %v5931_v14 = vmul.f32 -1.442695, %v6230_v0 }
 0x391   : > { %v7221_v6 = vpop.eup %7220  ;;  %7238 = vtanh.f32 %v6258_v59 }
 0x392   : > { %v7223_v8 = vpop.eup %7222  ;;  %v4292_v13 = vadd.f32 1.0, %v7221_v6  ;;  %7240 = vpow2.f32 %v5930_v5  ;;  %v4137_v16 = vpop.f32.mrb[40].mxu0 }
 0x393   : > { %v4293_v17 = vadd.f32 1.0, %v7223_v8  ;;  %7242 = vtanh.f32 %v6259_v3  ;;  %v6231_v40 = vadd.f32 %v4137_v16, %v8166_v23  ;;  %v4951_v43 = vpop.f32.mrb[40].mxu1  ;;  %v4139_v21 = vpop.f32.mrb[41].mxu0 }
 0x394   : > { %v7225_v24 = vpop.eup %7224  ;;  %7244 = vrcp.f32 %v4292_v13  ;;  %v8197_v2 = vpop.f32.mrb[41].mxu1  ;;  %v6232_v18 = vadd.f32 %v4139_v21, %v8172_v27  ;;  %v6263_v62 = vadd.f32 %v4951_v43, %v8176_v31 }
 0x395   : > { %v4141_v49 = vpop.f32.mrb[42].mxu0  ;;  %v7227_v52 = vpop.eup %7226  ;;  %7246 = vrcp.f32 %v4293_v17  ;;  %v4294_v35 = vadd.f32 1.0, %v7225_v24  ;;  %v5932_v15 = vmul.f32 -1.442695, %v6231_v40  ;;  %v6264_v17 = vadd.f32 %v8197_v2, %v8180_v41 }
 0x396   : > { %v8199_v38 = vpop.f32.mrb[42].mxu1  ;;  %v4143_v25 = vpop.f32.mrb[43].mxu0  ;;  %7248 = vpow2.f32 %v5931_v14  ;;  %v6233_v32 = vadd.f32 %v4141_v49, %v8166_v23  ;;  %v5933_v36 = vmul.f32 -1.442695, %v6232_v18 }
 0x397   : > { %v7229_v28 = vpop.eup %7228  ;;  %v8202_v19 = vpop.f32.mrb[43].mxu1  ;;  %7250 = vrcp.f32 %v4294_v35  ;;  %v6234_v47 = vadd.f32 %v4143_v25, %v8172_v27 }
 0x398   : > { %v7231_v20 = vpop.eup %7230  ;;  %v4295_v22 = vadd.f32 1.0, %v7229_v28  ;;  %7252 = vtanh.f32 %v6260_v63  ;;  %v5934_v53 = vmul.f32 -1.442695, %v6233_v32 }
 0x399   : > { %v7233_v29 = vpop.eup %7232  ;;  %v5935_v60 = vmul.f32 -1.442695, %v6234_v47 }
 0x39a   : > { %v7235_v30 = vpop.eup %7234  ;;  %7254 = vrcp.f32 %v4295_v22  ;;  %v4147_v37 = vpop.f32.mrb[44].mxu0 }
 0x39b   : > { %v7237_v33 = vpop.eup %7236  ;;  %v4296_v34 = vadd.f32 1.0, %v7235_v30  ;;  %7256 = vpow2.f32 %v5932_v15  ;;  %v8206_v44 = vpop.f32.mrb[44].mxu1  ;;  %v6235_v57 = vadd.f32 %v4147_v37, %v8166_v23  ;;  %v6265_v15 = vadd.f32 %v8199_v38, %v8176_v31 }
 0x39c   : > { %v7239_v39 = vpop.eup %7238  ;;  %v4297_v42 = vadd.f32 1.0, %v7237_v33  ;;  %7258 = vtanh.f32 %v6261_v26  ;;  %v4149_v45 = vpop.f32.mrb[45].mxu0 }
 0x39d   : > { %v7241_v46 = vpop.eup %7240  ;;  %7260 = vrcp.f32 %v4296_v34  ;;  %v8209_v48 = vpop.f32.mrb[45].mxu1  ;;  %v6236_v0 = vadd.f32 %v4149_v45, %v8172_v27  ;;  %v5936_v5 = vmul.f32 -1.442695, %v6235_v57 }
 0x39e   : > { %v4151_v4 = vpop.f32.mrb[46].mxu0  ;;  %v7243_v50 = vpop.eup %7242  ;;  %7262 = vrcp.f32 %v4297_v42  ;;  %v4298_v51 = vadd.f32 1.0, %v7241_v46 }
 0x39f   : > { %v8211_v7 = vpop.f32.mrb[46].mxu1  ;;  %v4153_v54 = vpop.f32.mrb[47].mxu0  ;;  %7264 = vpow2.f32 %v5933_v36  ;;  %v6237_v40 = vadd.f32 %v4151_v4, %v8166_v23  ;;  %v6266_v36 = vadd.f32 %v8202_v19, %v8180_v41 }
 0x3a0   : > { %v7245_v55 = vpop.eup %7244  ;;  %v8216_v9 = vpop.f32.mrb[47].mxu1  ;;  %7266 = vrcp.f32 %v4298_v51 }
 0x3a1   : > { %v7247_v10 = vpop.eup %7246  ;;  %v5042_v58 = vmul.f32 %v7245_v55, %v7227_v52  ;;  %7268 = vpow2.f32 %v5934_v53  ;;  %v5937_v52 = vmul.f32 -1.442695, %v6236_v0 }
 0x3a2   : > { %v7249_v59 = vpop.eup %7248  ;;  %v5043_v61 = vmul.f32 %v7247_v10, %v7231_v20  ;;  %7270 = vtanh.f32 %v6262_v56  ;;  %v4157_v6 = vpop.f32.mrb[48].mxu0  ;;  %v6238_v20 = vadd.f32 %v4153_v54, %v8172_v27 }
 0x3a3   : > { %v7251_v11 = vpop.eup %7250  ;;  %v4299_v12 = vadd.f32 1.0, %v7249_v59  ;;  %v8220_v13 = vpop.f32.mrb[48].mxu1  ;;  %v6239_v37 = vadd.f32 %v4157_v6, %v8166_v23 }
 0x3a4   : > { %v7253_v3 = vpop.eup %7252  ;;  %v5044_v1 = vmul.f32 %v7251_v11, %v7233_v29  ;;  %v4159_v14 = vpop.f32.mrb[49].mxu0  ;;  %v5938_v29 = vmul.f32 -1.442695, %v6237_v40  ;;  %v5939_v46 = vmul.f32 -1.442695, %v6238_v20 }
 0x3a5   : > { %v7255_v8 = vpop.eup %7254  ;;  %7272 = vrcp.f32 %v4299_v12  ;;  %v8225_v43 = vpop.f32.mrb[49].mxu1  ;;  %v6240_v56 = vadd.f32 %v4159_v14, %v8172_v27  ;;  %v5940_v59 = vmul.f32 -1.442695, %v6239_v37  ;;  %v6269_v14 = vadd.f32 %v8211_v7, %v8176_v31 }
 0x3a6   : > { %v7257_v16 = vpop.eup %7256  ;;  %7274 = vpow2.f32 %v5935_v60  ;;  %v4161_v21 = vpop.f32.mrb[50].mxu0  ;;  %v5045_v24 = vmul.f32 %v7255_v8, %v7239_v39  ;;  %v5074_v30 = vpack.c.bf16 %v5044_v1, %v5042_v58 }
 0x3a7   : > { %v7259_v63 = vpop.eup %7258  ;;  %v4300_v49 = vadd.f32 1.0, %v7257_v16  ;;  %7276 = vtanh.f32 %v6263_v62  ;;  %v8227_v35 = vpop.f32.mrb[50].mxu1  ;;  %v6241_v11 = vadd.f32 %v4161_v21, %v8166_v23  ;;  %v6268_v62 = vadd.f32 %v8209_v48, %v8180_v41 }
 0x3a8   : > { %v8229_v25 = vpop.f32.mrb[51].mxu0  ;;  %v7261_v28 = vpop.eup %7260  ;;  %7278 = vpow2.f32 %v5936_v5  ;;  %v5075_v22 = vpack.c.bf16 %v5045_v24, %v5043_v61  ;;  %v5941_v6 = vmul.f32 -1.442695, %v6240_v56  ;;  %v6272_v56 = vadd.f32 %v8225_v43, %v8180_v41 }
 0x3a9   : > { %v8233_v2 = vpop.f32.mrb[51].mxu1  ;;  %v7263_v18 = vpop.eup %7262  ;;  %7280 = vrcp.f32 %v4300_v49  ;;  %v8238_v38 = vmul.f32 %v7261_v28, %v7243_v50  ;;  %v6267_v50 = vadd.f32 %v8206_v44, %v8176_v31  ;;  %v5942_v24 = vmul.f32 -1.442695, %v6241_v11 }
 0x3aa   : > { %v7265_v26 = vpop.eup %7264  ;;  %7282 = vtanh.f32 %v6264_v17  ;;  %v5047_v32 = vmul.f32 %v7263_v18, %v7253_v3  ;;  %5257 = vmatprep.mubr.bf16.mxu0 %v5075_v22  ;;  %v8241_v39 = vpop.f32.mrb[52].mxu0  ;;  %v6242_v48 = vadd.f32 %v8229_v25, %v8172_v27  ;;  %v6270_v25 = vadd.f32 %v8216_v9, %v8180_v41 }
 0x3ab   : > { %v7267_v33 = vpop.eup %7266  ;;  %v4301_v34 = vadd.f32 1.0, %v7265_v26  ;;  %7284 = vpow2.f32 %v5937_v52  ;;  %5258 = vmatmul.mubr.bf16.vlgmr.msra.gmra.mrb[64].mxu0 %v5074_v30  ;;  %v8243_v47 = vpop.f32.mrb[52].mxu1  ;;  %v6273_v11 = vadd.f32 %v8227_v35, %v8176_v31 }
 0x3ac   : > { %7286 = vtanh.f32 %v6265_v15  ;;  %v5048_v42 = vmul.f32 %v7267_v33, %v7259_v63  ;;  %v7269_v45 = vpop.eup %7268  ;;  %v8245_v4 = vpop.f32.mrb[53].mxu0 }
 0x3ad   : > { %7288 = vrcp.f32 %v4301_v34  ;;  %v7271_v51 = vpop.eup %7270  ;;  %v4302_v19 = vadd.f32 1.0, %v7269_v45  ;;  %v8249_v53 = vpop.f32.mrb[53].mxu1 }
 0x3ae   : > { %7290 = vpow2.f32 %v5938_v29  ;;  %v8251_v54 = vpop.f32.mrb[54].mxu0  ;;  %v8254_v57 = vpop.f32.mrb[54].mxu1  ;;  %v5076_v3 = vpack.c.bf16 %v5048_v42, %v8238_v38 }
 0x3af   : > { %v7273_v55 = vpop.eup %7272  ;;  %7292 = vtanh.f32 %v6266_v36  ;;  %v8256_v10 = vpop.f32.mrb[55].mxu0  ;;  %v6243_v36 = vadd.f32 %v8241_v39, %v8166_v23 }
 0x3b0   : > { %v7275_v58 = vpop.eup %7274  ;;  %7294 = vrcp.f32 %v4302_v19  ;;  %v8258_v60 = vpop.f32.mrb[55].mxu1  ;;  %v5049_v0 = vmul.f32 %v7273_v55, %v7271_v51 }
 0x3b1   : > { %v7277_v61 = vpop.eup %7276  ;;  %v4303_v44 = vadd.f32 1.0, %v7275_v58  ;;  %7296 = vpow2.f32 %v5939_v46  ;;  %v5943_v46 = vmul.f32 -1.442695, %v6242_v48  ;;  %v6244_v58 = vadd.f32 %v8245_v4, %v8172_v27 }
 0x3b2   : > { %v7279_v12 = vpop.eup %7278  ;;  %7298 = vtanh.f32 %v6267_v50  ;;  %v5077_v16 = vpack.c.bf16 %v5049_v0, %v5047_v32  ;;  %v4177_v17 = vpop.f32.mrb[56].mxu0  ;;  %v6271_v50 = vadd.f32 %v8220_v13, %v8176_v31  ;;  %v6245_v0 = vadd.f32 %v8251_v54, %v8166_v23 }
 0x3b3   : > { %v7281_v1 = vpop.eup %7280  ;;  %7300 = vrcp.f32 %v4303_v44  ;;  %v4304_v5 = vadd.f32 1.0, %v7279_v12  ;;  %v8271_v63 = vadd.f32 %v4177_v17, %v8166_v23  ;;  %v4991_v49 = vpop.f32.mrb[56].mxu1  ;;  %v5944_v12 = vmul.f32 -1.442695, %v6243_v36 }
 0x3b4   : > { %v7283_v8 = vpop.eup %7282  ;;  %7302 = vpow2.f32 %v5940_v59  ;;  %v8266_v40 = vmul.f32 %v7281_v1, %v7277_v61  ;;  %v4179_v52 = vpop.f32.mrb[57].mxu0  ;;  %5265 = vmatprep.mubr.bf16.mxu0 %v5077_v16  ;;  %v8274_v7 = vadd.f32 %v4991_v49, %v8176_v31 }
 0x3b5   : > { %v7285_v21 = vpop.eup %7284  ;;  %7304 = vrcp.f32 %v4304_v5  ;;  %v8277_v18 = vadd.f32 %v4179_v52, %v8172_v27  ;;  %v4993_v20 = vpop.f32.mrb[57].mxu1  ;;  %5266 = vmatmul.mubr.bf16.gmra.mrb[68].mxu0 %v5076_v3  ;;  %v6246_v52 = vadd.f32 %v8256_v10, %v8172_v27  ;;  %v5946_v10 = vmul.f32 -1.442695, %v6245_v0 }
 0x3b6   : > { %v7287_v28 = vpop.eup %7286  ;;  %v4305_v15 = vadd.f32 1.0, %v7285_v21  ;;  %7306 = vtanh.f32 %v6268_v62  ;;  %v4181_v22 = vpop.f32.mrb[58].mxu0  ;;  %v8282_v29 = vadd.f32 %v4993_v20, %v8180_v41 }
 0x3b7   : > { %v7289_v26 = vpop.eup %7288  ;;  %7308 = vpow2.f32 %v5941_v6  ;;  %v8285_v30 = vadd.f32 %v4181_v22, %v8166_v23  ;;  %v4995_v32 = vpop.f32.mrb[58].mxu1 }
 0x3b8   : > { %v4183_v33 = vpop.f32.mrb[59].mxu0  ;;  %v7291_v34 = vpop.eup %7290  ;;  %7310 = vrcp.f32 %v4305_v15  ;;  %v8290_v38 = vadd.f32 %v4995_v32, %v8176_v31  ;;  %v5051_v39 = vmul.f32 %v7289_v26, %v7283_v8 }
 0x3b9   : > { %v8293_v9 = vadd.f32 %v4183_v33, %v8172_v27  ;;  %v4997_v37 = vpop.f32.mrb[59].mxu1  ;;  %v7293_v42 = vpop.eup %7292  ;;  %v4306_v45 = vadd.f32 1.0, %v7291_v34  ;;  %7312 = vtanh.f32 %v6269_v14 }
 0x3ba   : > { %v8296_v51 = vadd.f32 %v4997_v37, %v8180_v41  ;;  %v7295_v19 = vpop.eup %7294  ;;  %7314 = vpow2.f32 %v5942_v24  ;;  %v4187_v62 = vpop.f32.mrb[60].mxu0 }
 0x3bb   : > { %v7297_v55 = vpop.eup %7296  ;;  %7316 = vrcp.f32 %v4306_v45  ;;  %v5052_v59 = vmul.f32 %v7295_v19, %v7287_v28  ;;  %v8310_v43 = vadd.f32 %v4187_v62, %v8166_v23  ;;  %v5001_v4 = vpop.f32.mrb[60].mxu1  ;;  %v6274_v45 = vadd.f32 %v8233_v2, %v8180_v41 }
 0x3bc   : > { %v7299_v61 = vpop.eup %7298  ;;  %v4307_v44 = vadd.f32 1.0, %v7297_v55  ;;  %7318 = vtanh.f32 %v6270_v25  ;;  %v4189_v1 = vpop.f32.mrb[61].mxu0  ;;  %v8313_v8 = vadd.f32 %v5001_v4, %v8176_v31  ;;  %v5947_v19 = vmul.f32 -1.442695, %v6246_v52 }
 0x3bd   : > { %v7301_v13 = vpop.eup %7300  ;;  %7320 = vpow2.f32 %v5943_v46  ;;  %v5078_v3 = vpack.c.bf16 %v5052_v59, %v8266_v40  ;;  %v8316_v35 = vadd.f32 %v4189_v1, %v8172_v27  ;;  %v5003_v14 = vpop.f32.mrb[61].mxu1  ;;  %v5945_v40 = vmul.f32 -1.442695, %v6244_v58 }
 0x3be   : > { %v7303_v5 = vpop.eup %7302  ;;  %7322 = vrcp.f32 %v4307_v44  ;;  %v5053_v6 = vmul.f32 %v7301_v13, %v7293_v42  ;;  %v4191_v16 = vpop.f32.mrb[62].mxu0  ;;  %v8319_v21 = vadd.f32 %v5003_v14, %v8180_v41 }
 0x3bf   : > { %v7305_v17 = vpop.eup %7304  ;;  %v4308_v54 = vadd.f32 1.0, %v7303_v5  ;;  %7324 = vtanh.f32 %v6271_v50  ;;  %v5005_v24 = vpop.f32.mrb[62].mxu1  ;;  %v8324_v15 = vadd.f32 %v4191_v16, %v8166_v23 }
 0x3c0   : > { %v4193_v48 = vpop.f32.mrb[63].mxu0  ;;  %v7307_v49 = vpop.eup %7306  ;;  %7326 = vpow2.f32 %v5944_v12  ;;  %v5079_v28 = vpack.c.bf16 %v5053_v6, %v5051_v39  ;;  %v8327_v26 = vadd.f32 %v5005_v24, %v8176_v31  ;;  %v5054_v36 = vmul.f32 %v7305_v17, %v7299_v61 }
 0x3c1   : > { %v5007_v20 = vpop.f32.mrb[63].mxu1  ;;  %v7309_v22 = vpop.eup %7308  ;;  %7328 = vrcp.f32 %v4308_v54  ;;  %v8330_v25 = vadd.f32 %v4193_v48, %v8172_v27  ;;  %v5948_v61 = vmul.f32 -1.442695, %v8271_v63  ;;  %v6277_v63 = vadd.f32 %v8254_v57, %v8176_v31 }
 0x3c2   : > { %v8333_v32 = vadd.f32 %v5007_v20, %v8180_v41  ;;  %v7311_v33 = vpop.eup %7310  ;;  %v4309_v34 = vadd.f32 1.0, %v7309_v22  ;;  %7330 = vtanh.f32 %v6272_v56  ;;  %5273 = vmatprep.mubr.bf16.mxu0 %v5079_v28  ;;  %v6275_v56 = vadd.f32 %v8243_v47, %v8176_v31 }
 0x3c3   : > { %v7313_v23 = vpop.eup %7312  ;;  %7332 = vpow2.f32 %v5945_v40  ;;  %5274 = vmatmul.mubr.bf16.gmra.mrb[72].mxu0 %v5078_v3  ;;  %v5055_v37 = vmul.f32 %v7311_v33, %v7307_v49  ;;  %v5949_v3 = vmul.f32 -1.442695, %v8277_v18  ;;  %v6278_v54 = vadd.f32 %v8258_v60, %v8180_v41 }
 0x3c4   : > { %v7315_v42 = vpop.eup %7314  ;;  %7334 = vrcp.f32 %v4309_v34  ;;  %v5951_v31 = vmul.f32 -1.442695, %v8293_v9  ;;  %v5952_v28 = vmul.f32 -1.442695, %v8310_v43  ;;  %v5953_v9 = vmul.f32 -1.442695, %v8316_v35 }
 0x3c5   : > { %v7317_v27 = vpop.eup %7316  ;;  %v4310_v46 = vadd.f32 1.0, %v7315_v42  ;;  %7336 = vtanh.f32 %v6273_v11  ;;  %v6276_v11 = vadd.f32 %v8249_v53, %v8180_v41  ;;  %v5950_v53 = vmul.f32 -1.442695, %v8285_v30 }
 0x3c6   : > { %v7319_v50 = vpop.eup %7318  ;;  %7338 = vpow2.f32 %v5946_v10  ;;  %v5056_v39 = vmul.f32 %v7317_v27, %v7313_v23 }
 0x3c7   : > { %v7321_v55 = vpop.eup %7320  ;;  %7340 = vrcp.f32 %v4310_v46 }
 0x3c8   : > { %v7323_v58 = vpop.eup %7322  ;;  %v4311_v59 = vadd.f32 1.0, %v7321_v55  ;;  %7342 = vtanh.f32 %v6274_v45  ;;  %v5080_v44 = vpack.c.bf16 %v5056_v39, %v5054_v36  ;;  %v5954_v45 = vmul.f32 -1.442695, %v8324_v15 }
 0x3c9   : > { %v7325_v12 = vpop.eup %7324  ;;  %7344 = vpow2.f32 %v5947_v19  ;;  %v5057_v2 = vmul.f32 %v7323_v58, %v7319_v50  ;;  %v5955_v50 = vmul.f32 -1.442695, %v8330_v25 }
 0x3ca   : > { %v7327_v62 = vpop.eup %7326  ;;  %7346 = vrcp.f32 %v4311_v59 }
 0x3cb   : > { %v7329_v13 = vpop.eup %7328  ;;  %v4312_v0 = vadd.f32 1.0, %v7327_v62  ;;  %7348 = vtanh.f32 %v6275_v56  ;;  %v5081_v47 = vpack.c.bf16 %v5057_v2, %v5055_v37 }
 0x3cc   : > { %v7331_v4 = vpop.eup %7330  ;;  %v5058_v1 = vmul.f32 %v7329_v13, %v7325_v12  ;;  %7350 = vpow2.f32 %v5948_v61 }
 0x3cd   : > { %v7333_v5 = vpop.eup %7332  ;;  %7352 = vrcp.f32 %v4312_v0  ;;  %5281 = vmatprep.mubr.bf16.mxu0 %v5081_v47 }
 0x3ce   : > { %v7335_v6 = vpop.eup %7334  ;;  %v4313_v14 = vadd.f32 1.0, %v7333_v5  ;;  %7354 = vtanh.f32 %v6276_v11  ;;  %5282 = vmatmul.mubr.bf16.gmra.mrb[76].mxu0 %v5080_v44 }
 0x3cf   : > { %v7337_v16 = vpop.eup %7336  ;;  %7356 = vpow2.f32 %v5949_v3  ;;  %v5059_v17 = vmul.f32 %v7335_v6, %v7331_v4 }
 0x3d0   : > { %v7339_v18 = vpop.eup %7338  ;;  %7358 = vrcp.f32 %v4313_v14 }
 0x3d1   : > { %v7341_v40 = vpop.eup %7340  ;;  %v4314_v24 = vadd.f32 1.0, %v7339_v18  ;;  %7360 = vtanh.f32 %v6277_v63 }
 0x3d2   : > { %v7343_v57 = vpop.eup %7342  ;;  %v5060_v48 = vmul.f32 %v7341_v40, %v7337_v16  ;;  %7362 = vpow2.f32 %v5950_v53 }
 0x3d3   : > { %v7345_v49 = vpop.eup %7344  ;;  %7364 = vrcp.f32 %v4314_v24 }
 0x3d4   : > { %v7347_v30 = vpop.eup %7346  ;;  %v4315_v52 = vadd.f32 1.0, %v7345_v49  ;;  %7366 = vtanh.f32 %v6278_v54  ;;  %v5082_v20 = vpack.c.bf16 %v5060_v48, %v5058_v1 }
 0x3d5   : > { %v7349_v22 = vpop.eup %7348  ;;  %7368 = vpow2.f32 %v5951_v31  ;;  %v5061_v33 = vmul.f32 %v7347_v30, %v7343_v57 }
 0x3d6   : > { %v7351_v41 = vpop.eup %7350  ;;  %7370 = vrcp.f32 %v4315_v52 }
 0x3d7   : > { %v7353_v60 = vpop.eup %7352  ;;  %v4316_v34 = vadd.f32 1.0, %v7351_v41  ;;  %7372 = vtanh.f32 %v8274_v7  ;;  %v5083_v10 = vpack.c.bf16 %v5061_v33, %v5059_v17 }
 0x3d8   : > { %v7355_v36 = vpop.eup %7354  ;;  %7374 = vpow2.f32 %v5952_v28  ;;  %v5062_v23 = vmul.f32 %v7353_v60, %v7349_v22 }
 0x3d9   : > { %v7357_v37 = vpop.eup %7356  ;;  %7376 = vrcp.f32 %v4316_v34  ;;  %5289 = vmatprep.mubr.bf16.mxu1 %v5083_v10 }
 0x3da   : > { %v7359_v43 = vpop.eup %7358  ;;  %v4317_v42 = vadd.f32 1.0, %v7357_v37  ;;  %7378 = vtanh.f32 %v8282_v29  ;;  %5290 = vmatmul.mubr.bf16.vlgmr.msra.gmra.mrb[64].mxu1 %v5082_v20 }
 0x3db   : > { %v7361_v27 = vpop.eup %7360  ;;  %7380 = vpow2.f32 %v5953_v9  ;;  %v5063_v46 = vmul.f32 %v7359_v43, %v7355_v36 }
 0x3dc   : > { %v7363_v7 = vpop.eup %7362  ;;  %7382 = vrcp.f32 %v4317_v42 }
 0x3dd   : > { %v7365_v35 = vpop.eup %7364  ;;  %v4318_v19 = vadd.f32 1.0, %v7363_v7  ;;  %7384 = vtanh.f32 %v8290_v38 }
 0x3de   : > { %v7367_v39 = vpop.eup %7366  ;;  %7386 = vpow2.f32 %v5954_v45  ;;  %v5064_v55 = vmul.f32 %v7365_v35, %v7361_v27 }
 0x3df   : > { %v7369_v56 = vpop.eup %7368  ;;  %7388 = vrcp.f32 %v4318_v19 }
 0x3e0   : > { %v7371_v29 = vpop.eup %7370  ;;  %v4319_v58 = vadd.f32 1.0, %v7369_v56  ;;  %7390 = vtanh.f32 %v8296_v51  ;;  %v5084_v15 = vpack.c.bf16 %v5064_v55, %v5062_v23 }
 0x3e1   : > { %v7373_v59 = vpop.eup %7372  ;;  %7392 = vpow2.f32 %v5955_v50  ;;  %v5065_v61 = vmul.f32 %v7371_v29, %v7367_v39 }
 0x3e2   : > { %v7375_v44 = vpop.eup %7374  ;;  %7394 = vrcp.f32 %v4319_v58 }
 0x3e3   : > { %v7377_v12 = vpop.eup %7376  ;;  %v4320_v2 = vadd.f32 1.0, %v7375_v44  ;;  %v5085_v38 = vpack.c.bf16 %v5065_v61, %v5063_v46  ;;  %7396 = vtanh.f32 %v8313_v8 }
 0x3e4   : > { %v7379_v62 = vpop.eup %7378  ;;  %v5066_v25 = vmul.f32 %v7377_v12, %v7373_v59 }
 0x3e5   : > { %v7381_v11 = vpop.eup %7380  ;;  %7398 = vrcp.f32 %v4320_v2  ;;  %5297 = vmatprep.mubr.bf16.mxu1 %v5085_v38 }
 0x3e6   : > { %v7383_v13 = vpop.eup %7382  ;;  %v4321_v0 = vadd.f32 1.0, %v7381_v11  ;;  %5298 = vmatmul.mubr.bf16.gmra.mrb[68].mxu1 %v5084_v15  ;;  %7400 = vtanh.f32 %v8319_v21 }
 0x3e7   : > { %v7385_v51 = vpop.eup %7384  ;;  %v5067_v3 = vmul.f32 %v7383_v13, %v7379_v62 }
 0x3e8   : > { %v7387_v47 = vpop.eup %7386  ;;  %7402 = vrcp.f32 %v4321_v0 }
 0x3e9   : > { %v7389_v4 = vpop.eup %7388  ;;  %v4322_v1 = vadd.f32 1.0, %v7387_v47  ;;  %7404 = vtanh.f32 %v8327_v26 }
 0x3ea   : > { %v7391_v5 = vpop.eup %7390  ;;  %v5068_v63 = vmul.f32 %v7389_v4, %v7385_v51 }
 0x3eb   : > { %v7393_v8 = vpop.eup %7392  ;;  %7406 = vrcp.f32 %v4322_v1 }
 0x3ec   : > { %v7395_v6 = vpop.eup %7394  ;;  %v4323_v14 = vadd.f32 1.0, %v7393_v8  ;;  %v5086_v53 = vpack.c.bf16 %v5068_v63, %v5066_v25  ;;  %7408 = vtanh.f32 %v8333_v32 }
 0x3ed   : > { %v5069_v16 = vmul.f32 %v7395_v6, %v7391_v5  ;;  %v7397_v17 = vpop.eup %7396 }
 0x3ee   : > { %7410 = vrcp.f32 %v4323_v14 }
 0x3ef   : > { %v7399_v21 = vpop.eup %7398  ;;  %v5087_v18 = vpack.c.bf16 %v5069_v16, %v5067_v3 }
 0x3f0   : > { %v5070_v54 = vmul.f32 %v7399_v21, %v7397_v17  ;;  %v7401_v40 = vpop.eup %7400 }
 0x3f1   : > { %5305 = vmatprep.mubr.bf16.mxu1 %v5087_v18 }
 0x3f2   : > { %v7403_v24 = vpop.eup %7402  ;;  %5306 = vmatmul.mubr.bf16.gmra.mrb[72].mxu1 %v5086_v53 }
 0x3f3   : > { %v5071_v26 = vmul.f32 %v7403_v24, %v7401_v40  ;;  %v7405_v31 = vpop.eup %7404 }
 0x3f5   : > { %v7407_v57 = vpop.eup %7406 }
 0x3f6   : > { %v5072_v48 = vmul.f32 %v7407_v57, %v7405_v31  ;;  %v7409_v49 = vpop.eup %7408 }
 0x3f8   : > { %v7411_v32 = vpop.eup %7410  ;;  %v5088_v30 = vpack.c.bf16 %v5072_v48, %v5070_v54 }
 0x3f9   : > { %v5073_v52 = vmul.f32 %v7411_v32, %v7409_v49 }
 0x3fb   : > { %v5089_v28 = vpack.c.bf16 %v5073_v52, %v5071_v26 }
 0x3fd   : > { %5313 = vmatprep.mubr.bf16.mxu1 %v5089_v28 }
 0x3fe   : > { %5314 = vmatmul.mubr.bf16.gmra.mrb[76].mxu1 %v5088_v30 }
 0x3ff   : > { %7539 = shalt.err (!%p7536_p4)
}
 0x400   : > { %s7540_s29 = scalar_lea.hbm %s8365_s19, 4096  ;;  %s7544_s20 = scalar_lea.hbm %s8480_s9, 8192 }
 0x401   : > { %p7541_p9 = scmp.ne.s32.totalorder %s8365_s19, %s7540_s29  ;;  %p7545_p8 = scmp.lt.u32.totalorder %s8365_s19, %s8480_s9 }
 0x402   : > { %p7546_p13 = scmp.lt.u32.totalorder %s7544_s20, %s7540_s29  ;;  %p7548_p10 = scmp.lt.u32.totalorder %s7540_s29, %s8365_s19 }
 0x403   : > { %p7542_p0 = pnand %p7541_p9, %p7812_p5 }
 0x404   : > { %p7547_p6 = por %p7546_p13, %p7545_p8 }
 0x405   : > { %p7543_p11 = pneg %p7542_p0 }
 0x406   : > { %p7549_p3 = por %p7548_p10, %p7547_p6 }
 0x408   : > { %p7550_p7 = pnand %p7549_p3, %p7543_p11 }
 0x40a   : > { %7553 = shalt.err (!%p7550_p7)
}
 0x40b   : > { %s7613_s11 = smov 256   ;;  %s7614_s18 = smov 16   ;;  %vm5322_vm0 = vcmask 15360  }
 0x40c   : > { %6557 = dma.vmem_to_hbm [thread:$0]  (%p7812_p5), %s8368_s21, 4096, %s8365_s19, %s5340_s13, %s7613_s11, %s7613_s11, %s7614_s18  }
 0x40d   : > { %s5506_s23 = sshll.u32 %s7691_s17, 4  ;;  %s8507_s29 = sld [smem:[#allocation18_spill]] }
 0x40e   : > { %p434_p12 = scmp.lt.s32.totalorder %s5506_s23, 31  ;;  %s8508_s20 = sld [smem:[#allocation19_spill]] }
 0x410   : > { %s8518_s23 = smov (!%p434_p12, %s5506_s23), 31 }
 0x411   : > { %s5507_s26 = sshll.u32 %s8518_s23, 3 }
 0x413   : > { %v8398_v22 = vld [vmem:[%s8507_s29] ss:$0 sm:$0xff] }
 0x414   : > { %s8403_s27 = scalar_lea.vmem %s8508_s20, %s5507_s26 }
 0x47e   : > { %v6095_v20 = vpop.f32.mrb[64].mxu0 }
 0x47f   : > { %v6096_v33 = vpop.f32.mrb[65].mxu0 }
 0x480   : > { %v6097_v41 = vadd.f32 %v6096_v33, %v6095_v20  ;;  %v6098_v60 = vpop.f32.mrb[66].mxu0 }
 0x481   : > { %v6099_v34 = vpop.f32.mrb[67].mxu0 }
 0x482   : > { %v5260_v9 = vadd.f32 %v6097_v41, %v8398_v22  ;;  %v6100_v10 = vadd.f32 %v6099_v34, %v6098_v60 }
 0x484   : > { %5323 = vst.msk [vmem:[%s8403_s27] sm:$0xff] %vm5322_vm0, %v5260_v9  ;;  %v5263_v36 = vadd.f32 %v6100_v10, %v8398_v22 }
 0x486   : > { %5324 = vst.msk [vmem:[%s8403_s27 + $0x8] sm:$0xff] %vm5322_vm0, %v5263_v36 }
 0x488   : > { %v6101_v23 = vpop.f32.mrb[68].mxu0 }
 0x489   : > { %v6102_v37 = vpop.f32.mrb[69].mxu0 }
 0x48a   : > { %v6103_v43 = vadd.f32 %v6102_v37, %v6101_v23  ;;  %v6104_v42 = vpop.f32.mrb[70].mxu0 }
 0x48b   : > { %v6105_v45 = vpop.f32.mrb[71].mxu0 }
 0x48c   : > { %v5268_v27 = vadd.f32 %v6103_v43, %v8398_v22  ;;  %v6106_v46 = vadd.f32 %v6105_v45, %v6104_v42 }
 0x48e   : > { %5325 = vst.msk [vmem:[%s8403_s27 + $0x10] sm:$0xff] %vm5322_vm0, %v5268_v27  ;;  %v5271_v7 = vadd.f32 %v6106_v46, %v8398_v22 }
 0x490   : > { %5326 = vst.msk [vmem:[%s8403_s27 + $0x18] sm:$0xff] %vm5322_vm0, %v5271_v7 }
 0x496   : > { %v6107_v35 = vpop.f32.mrb[72].mxu0 }
 0x497   : > { %v6108_v19 = vpop.f32.mrb[73].mxu0 }
 0x498   : > { %v6109_v50 = vadd.f32 %v6108_v19, %v6107_v35  ;;  %v6110_v39 = vpop.f32.mrb[74].mxu0 }
 0x499   : > { %v6111_v55 = vpop.f32.mrb[75].mxu0 }
 0x49a   : > { %v5276_v56 = vadd.f32 %v6109_v50, %v8398_v22  ;;  %v6112_v29 = vadd.f32 %v6111_v55, %v6110_v39 }
 0x49c   : > { %5327 = vst.msk [vmem:[%s8403_s27 + $0x20] sm:$0xff] %vm5322_vm0, %v5276_v56  ;;  %v5279_v58 = vadd.f32 %v6112_v29, %v8398_v22 }
 0x49e   : > { %5328 = vst.msk [vmem:[%s8403_s27 + $0x28] sm:$0xff] %vm5322_vm0, %v5279_v58 }
 0x4a1   : > { %v6113_v15 = vpop.f32.mrb[76].mxu0 }
 0x4a2   : > { %v6114_v59 = vpop.f32.mrb[77].mxu0 }
 0x4a3   : > { %v6115_v61 = vadd.f32 %v6114_v59, %v6113_v15  ;;  %v6116_v44 = vpop.f32.mrb[78].mxu0 }
 0x4a4   : > { %v6117_v12 = vpop.f32.mrb[79].mxu0 }
 0x4a5   : > { %v5284_v2 = vadd.f32 %v6115_v61, %v8398_v22  ;;  %v6118_v38 = vadd.f32 %v6117_v12, %v6116_v44 }
 0x4a7   : > { %5329 = vst.msk [vmem:[%s8403_s27 + $0x30] sm:$0xff] %vm5322_vm0, %v5284_v2  ;;  %v5287_v62 = vadd.f32 %v6118_v38, %v8398_v22 }
 0x4a9   : > { %5330 = vst.msk [vmem:[%s8403_s27 + $0x38] sm:$0xff] %vm5322_vm0, %v5287_v62 }
 0x4ad   : > { %v6119_v25 = vpop.f32.mrb[64].mxu1 }
 0x4ae   : > { %v6120_v11 = vpop.f32.mrb[65].mxu1 }
 0x4af   : > { %v6121_v13 = vadd.f32 %v6120_v11, %v6119_v25  ;;  %v6122_v0 = vpop.f32.mrb[66].mxu1 }
 0x4b0   : > { %v6123_v51 = vpop.f32.mrb[67].mxu1 }
 0x4b1   : > { %v5292_v3 = vadd.f32 %v6121_v13, %v8398_v22  ;;  %v6124_v47 = vadd.f32 %v6123_v51, %v6122_v0 }
 0x4b3   : > { %5331 = vst.msk [vmem:[%s8403_s27 + $0x40] sm:$0xff] %vm5322_vm0, %v5292_v3  ;;  %v5295_v4 = vadd.f32 %v6124_v47, %v8398_v22 }
 0x4b5   : > { %5332 = vst.msk [vmem:[%s8403_s27 + $0x48] sm:$0xff] %vm5322_vm0, %v5295_v4 }
 0x4b9   : > { %v6125_v1 = vpop.f32.mrb[68].mxu1 }
 0x4ba   : > { %v6126_v5 = vpop.f32.mrb[69].mxu1 }
 0x4bb   : > { %v6127_v63 = vadd.f32 %v6126_v5, %v6125_v1  ;;  %v6128_v8 = vpop.f32.mrb[70].mxu1 }
 0x4bc   : > { %v6129_v6 = vpop.f32.mrb[71].mxu1 }
 0x4bd   : > { %v5300_v14 = vadd.f32 %v6127_v63, %v8398_v22  ;;  %v6130_v53 = vadd.f32 %v6129_v6, %v6128_v8 }
 0x4bf   : > { %5333 = vst.msk [vmem:[%s8403_s27 + $0x50] sm:$0xff] %vm5322_vm0, %v5300_v14  ;;  %v5303_v16 = vadd.f32 %v6130_v53, %v8398_v22 }
 0x4c1   : > { %5334 = vst.msk [vmem:[%s8403_s27 + $0x58] sm:$0xff] %vm5322_vm0, %v5303_v16 }
 0x4c5   : > { %v6131_v17 = vpop.f32.mrb[72].mxu1 }
 0x4c6   : > { %v6132_v21 = vpop.f32.mrb[73].mxu1 }
 0x4c7   : > { %v6133_v18 = vadd.f32 %v6132_v21, %v6131_v17  ;;  %v6134_v54 = vpop.f32.mrb[74].mxu1 }
 0x4c8   : > { %v6135_v40 = vpop.f32.mrb[75].mxu1 }
 0x4c9   : > { %v5308_v24 = vadd.f32 %v6133_v18, %v8398_v22  ;;  %v6136_v26 = vadd.f32 %v6135_v40, %v6134_v54 }
 0x4cb   : > { %5335 = vst.msk [vmem:[%s8403_s27 + $0x60] sm:$0xff] %vm5322_vm0, %v5308_v24  ;;  %v5311_v31 = vadd.f32 %v6136_v26, %v8398_v22 }
 0x4cd   : > { %5336 = vst.msk [vmem:[%s8403_s27 + $0x68] sm:$0xff] %vm5322_vm0, %v5311_v31 }
 0x4d1   : > { %v6137_v57 = vpop.f32.mrb[76].mxu1 }
 0x4d2   : > { %v6138_v48 = vpop.f32.mrb[77].mxu1 }
 0x4d3   : > { %v6139_v49 = vadd.f32 %v6138_v48, %v6137_v57  ;;  %v6140_v32 = vpop.f32.mrb[78].mxu1 }
 0x4d4   : > { %v6141_v30 = vpop.f32.mrb[79].mxu1 }
 0x4d5   : > { %v5316_v52 = vadd.f32 %v6139_v49, %v8398_v22  ;;  %v6142_v28 = vadd.f32 %v6141_v30, %v6140_v32 }
 0x4d7   : > { %5337 = vst.msk [vmem:[%s8403_s27 + $0x70] sm:$0xff] %vm5322_vm0, %v5316_v52  ;;  %v5319_v20 = vadd.f32 %v6142_v28, %v8398_v22 }
 0x4d9   : > { %5338 = vst.msk [vmem:[%s8403_s27 + $0x78] sm:$0xff] %vm5322_vm0, %v5319_v20 }
 0x4da PF: > { %s8509_s17 = sld [smem:[#allocation15_spill]]  ;;  %s8510_s12 = sld [smem:[#allocation16_spill]] }
 0x4db   : > { %p8512_p2 = scmp.ge.s32.totalorder %s7600_s16, 2 }
 0x4e0   : > { %s5378_s1 = sand.u32 1, %s8509_s17   ;;  %p8511_p5 = scmp.ne.s32.totalorder %s8510_s12, 0 }
 0x4e1   : > { %s5379_s19 = scalar_lea.sflag [#allocation4], %s5378_s1 }
 0x4e2   : > { %p6574_p1 = pnand %p8512_p2, %p8511_p5 }
 0x4e4   : > { %7583 = dma.done.wait (!%p6574_p1), %s5379_s19, 4096  }
 0x4e5   : > { %7585 = vsyncadd (!%p6574_p1), %s5379_s19, 4294963200  ;;  %p26_p4 = scmp.ge.s32.totalorder %s7780_s30, 4   ;;  %s8513_s13 = smov %s7592_s14 }
 0x4e6   : > { %s8514_s14 = smov %s7596_s15  ;;  %s8515_s15 = smov %s7808_s24 }
 0x4e7   : > { %s8516_s16 = smov %s7780_s30  ;;  %28 = sbr.rel (!%p26_p4) target bundleno = 11 (0xb), region = 125 }
 0x4ee   :  { %5392 = vsyncpa [#allocation3], 1 }
 0x4ef   :  { %5394 = vsyncpa [#allocation3 + $0x1], 1 }
 0x4f0   :  { %5395 = vsyncpa [#allocation6], 1 }
 0x4f1   :  { %5396 = vsyncpa [#allocation9], 1 }
 0x4f2   :  { %5397 = vsyncpa [#allocation4], 1 }
 0x4f3   :  { %5399 = vsyncpa [#allocation4 + $0x1], 1 }

</bundles_post_ra>
